<compile_context>
chip_gen: v7x
topology: tpu7x:2x2x1
jax: 0.10.0
libtpu: 0.0.40
codegen_flags: <defaults>
</compile_context>

<pallas_src>
import math

import jax
import jax.numpy as jnp
from jax.experimental import pallas as pl
from jax.experimental.pallas import tpu as pltpu

# ------------------------- configuration (module hyper-params) -------------------------
B = 2             # batch size
N_NODE = 8        # nodes per graph
SENT_DIM = 32     # sentence-vector dim
H = 32            # concept_dim == hidden_size
N_NTYPE = 4
N_ETYPE = 6
N_CONCEPT = 50
K_LAYERS = 2      # number of GNN layers (k)
HEAD_COUNT = 4    # GAT heads
N_ATT_HEAD = 2    # pooler heads
E_EDGES = 12      # graph edges (before self loops)

DPH = H // HEAD_COUNT        # GAT dim per head
D_K = H // N_ATT_HEAD        # pooler dim per head

# kernel operand count: 9 data + 8 shared weights + 6 per GAT layer + 10 head weights
_NUM_INPUTS = 9 + 8 + 6 * K_LAYERS + 10


# ----------------------------------- helpers -------------------------------------------
def _gelu(x):
    # tanh-approximation GELU used by the original module's GELU class
    return 0.5 * x * (1.0 + jnp.tanh(math.sqrt(2.0 / math.pi) * (x + 0.044715 * x ** 3)))


def fold_bn(w, b, bn, eps=1e-5):
    """Fold eval-mode BatchNorm1d into the preceding Linear (w: [in, out], b: [out])."""
    scale = bn["gamma"] / jnp.sqrt(bn["var"] + eps)
    return w * scale[None, :], b * scale + bn["beta"] - bn["mean"] * scale


def _full_block(shape):
    """Full-extent block (exempt from (8,128) tiling rule) for the grid=(1,) fused call."""
    nd = len(shape)
    return pl.BlockSpec(tuple(shape), lambda i, _nd=nd: (0,) * _nd)


# --------------------------------- parameter init --------------------------------------
def _bn_identity(n):
    return {"gamma": jnp.ones((n,), jnp.float32),
            "beta": jnp.zeros((n,), jnp.float32),
            "mean": jnp.zeros((n,), jnp.float32),
            "var": jnp.ones((n,), jnp.float32)}


def init_params(key, init_range=0.02):
    keys = iter(jax.random.split(key, 64))

    def lin(fan_in, fan_out):
        w = jax.random.normal(next(keys), (fan_in, fan_out), jnp.float32) * init_range
        b = jnp.zeros((fan_out,), jnp.float32)
        return w, b

    p = {}
    p["svec2nvec_w"], p["svec2nvec_b"] = lin(SENT_DIM, H)
    p["concept_emb"] = jax.random.normal(next(keys), (N_CONCEPT, H), jnp.float32) * init_range
    p["emb_node_type_w"], p["emb_node_type_b"] = lin(N_NTYPE, H // 2)
    p["emb_score_w"], p["emb_score_b"] = lin(H // 2, H // 2)
    # shared edge encoder: Linear -> BN -> ReLU -> Linear
    p["ee_w1"], p["ee_b1"] = lin(N_ETYPE + 1 + 2 * N_NTYPE, H)
    p["ee_bn"] = _bn_identity(H)
    p["ee_w2"], p["ee_b2"] = lin(H, H)
    p["gat"] = []
    for _ in range(K_LAYERS):
        lp = {}
        lp["wk"], lp["bk"] = lin(3 * H, H)
        lp["wm"], lp["bm"] = lin(3 * H, H)
        lp["wq"], lp["bq"] = lin(2 * H, H)
        lp["mlp_w1"], lp["mlp_b1"] = lin(H, H)
        lp["mlp_bn"] = _bn_identity(H)
        lp["mlp_w2"], lp["mlp_b2"] = lin(H, H)
        p["gat"].append(lp)
    p["vh_w"], p["vh_b"] = lin(H, H)
    p["vx_w"], p["vx_b"] = lin(H, H)
    p["pool_wq"], p["pool_bq"] = lin(SENT_DIM, N_ATT_HEAD * D_K)
    p["pool_wk"], p["pool_bk"] = lin(H, N_ATT_HEAD * D_K)
    p["pool_wv"], p["pool_bv"] = lin(H, N_ATT_HEAD * D_K)
    p["sen_fc_w"], p["sen_fc_b"] = lin(SENT_DIM, 1)
    p["gra_fc_w"], p["gra_fc_b"] = lin(2 * H, 1)
    return p


# ---------------------- one-time weight packing / BN folding (hoisted) -----------------
def prepare_params(p):
    """Pack and fold weights ONCE, outside the traced forward."""
    h = H
    inv_s = 1.0 / math.sqrt(DPH)
    wp = {"concept_emb": p["concept_emb"]}

    wp["w_svec"] = p["svec2nvec_w"]
    wp["b_svec"] = p["svec2nvec_b"].reshape(1, h)

    # node-type | node-score embeddings -> one block-diagonal matmul
    w_nfe = jnp.zeros((N_NTYPE + h // 2, h), jnp.float32)
    w_nfe = w_nfe.at[:N_NTYPE, : h // 2].set(p["emb_node_type_w"])
    w_nfe = w_nfe.at[N_NTYPE:, h // 2:].set(p["emb_score_w"])
    wp["w_nfe"] = w_nfe
    wp["b_nfe"] = jnp.concatenate([p["emb_node_type_b"], p["emb_score_b"]]).reshape(1, h)

    w1f, b1f = fold_bn(p["ee_w1"], p["ee_b1"], p["ee_bn"])
    wp["w_ee1"], wp["b_ee1"] = w1f, b1f.reshape(1, h)
    wp["w_ee2"], wp["b_ee2"] = p["ee_w2"], p["ee_b2"].reshape(1, h)

    # per-layer key|msg|query packed projection over the concatenated [x_i | x_j | edge] input
    wp["layers"] = []
    for lp in p["gat"]:
        w_kmq = jnp.zeros((5 * h, 3 * h), jnp.float32)
        w_kmq = w_kmq.at[0:2 * h, 0:h].set(lp["wk"][0:2 * h])            # key  <- x_i
        w_kmq = w_kmq.at[4 * h:5 * h, 0:h].set(lp["wk"][2 * h:3 * h])    # key  <- edge
        w_kmq = w_kmq.at[2 * h:4 * h, h:2 * h].set(lp["wm"][0:2 * h])    # msg  <- x_j
        w_kmq = w_kmq.at[4 * h:5 * h, h:2 * h].set(lp["wm"][2 * h:3 * h])  # msg <- edge
        w_kmq = w_kmq.at[2 * h:4 * h, 2 * h:3 * h].set(lp["wq"] * inv_s)  # query (pre-scaled)
        b_kmq = jnp.concatenate([lp["bk"], lp["bm"], lp["bq"] * inv_s]).reshape(1, 3 * h)
        wm1, bm1 = fold_bn(lp["mlp_w1"], lp["mlp_b1"], lp["mlp_bn"])
        wp["layers"].append({
            "w_kmq": w_kmq, "b_kmq": b_kmq,
            "w_m1": wm1, "b_m1": bm1.reshape(1, h),
            "w_m2": lp["mlp_w2"], "b_m2": lp["mlp_b2"].reshape(1, h),
        })

    # GELU(Vh(H) + Vx(X)) == GELU([H | X] @ [Vh; Vx] + (bh + bx))
    wp["w_vhx"] = jnp.concatenate([p["vh_w"], p["vx_w"]], axis=0)
    wp["b_vhx"] = (p["vh_b"] + p["vx_b"]).reshape(1, h)

    wp["w_pq"] = p["pool_wq"]
    wp["b_pq"] = p["pool_bq"].reshape(1, N_ATT_HEAD * D_K)
    wp["w_pkv"] = jnp.concatenate([p["pool_wk"], p["pool_wv"]], axis=1)   # key | value packed
    wp["b_pkv"] = jnp.concatenate([p["pool_bk"], p["pool_bv"]]).reshape(1, 2 * N_ATT_HEAD * D_K)

    wp["w_sen"], wp["b_sen"] = p["sen_fc_w"], p["sen_fc_b"].reshape(1, 1)
    wp["w_gra"], wp["b_gra"] = p["gra_fc_w"], p["gra_fc_b"].reshape(1, 1)
    return wp


# ------------------------------- fused Pallas kernel -----------------------------------
def _qagnn_fused_kernel(*refs):
    """Single-invocation fused QAGNN forward.  All operands live in VMEM for the whole
    kernel; graph gathers / scatter-adds are one-hot matmuls on the MXU; the per-head
    segment softmax uses masked in-register reductions, so no intermediate ever round-trips
    through HBM."""
    (sent_ref, concept_ref, ctx_ref, nfe_in_ref, edge_feat_ref,
     m_src_ref, m_tgt_ref, m_tgt_t_ref, neg_mask_ref,
     w_svec, b_svec, w_nfe, b_nfe, w_ee1, b_ee1, w_ee2, b_ee2) = refs[:17]
    layer_refs = refs[17:17 + 6 * K_LAYERS]
    (w_vhx, b_vhx, w_pq, b_pq, w_pkv, b_pkv,
     w_sen, b_sen, w_gra, b_gra) = refs[17 + 6 * K_LAYERS:_NUM_INPUTS]
    logits_ref, sen_ref, gra_ref = refs[_NUM_INPUTS:]

    f32 = jnp.float32

    def mm(a, b):
        return jnp.dot(a, b, preferred_element_type=f32)

    sent = sent_ref[...]                       # (B, SENT_DIM)
    m_src = m_src_ref[...]                     # (E+N, N)  src one-hot
    m_tgt = m_tgt_ref[...]                     # (E+N, N)  tgt one-hot
    m_tgt_t = m_tgt_t_ref[...]                 # (N, E+N)  scatter-add matrix
    neg_src = (1.0 - m_src) * 1e30             # additive "-inf" off-segment mask (hoisted)

    # gnn_input: GELU(svec2nvec(sent)) scattered into the per-graph context rows + concept emb
    gnn_in0 = _gelu(mm(sent, w_svec[...]) + b_svec[...])                   # (B, H)
    h_in = concept_ref[...] + mm(ctx_ref[...], gnn_in0)                    # (B*n_node, H)

    # node_feature_extra = [GELU(type emb) | GELU(score emb)]  (block-diag packed weight)
    nfe = _gelu(mm(nfe_in_ref[...], w_nfe[...]) + b_nfe[...])              # (N, H)

    # shared edge encoder: Linear -> BN(folded) -> ReLU -> Linear (same output every layer)
    e1 = jnp.maximum(mm(edge_feat_ref[...], w_ee1[...]) + b_ee1[...], 0.0)
    edge_emb = mm(e1, w_ee2[...]) + b_ee2[...]                             # (E+N, H)

    x_cur = h_in
    for l in range(K_LAYERS):
        w_kmq, b_kmq, w_m1, b_m1, w_m2, b_m2 = layer_refs[6 * l:6 * l + 6]
        x2 = jnp.concatenate([x_cur, nfe], axis=1)                         # (N, 2H)
        x_i = mm(m_tgt, x2)                                                # target feats (E+N, 2H)
        x_j = mm(m_src, x2)                                                # source feats (E+N, 2H)
        # packed key|msg|query projection -> one lane-dense (E+N, 3H) matmul
        kmq = mm(jnp.concatenate([x_i, x_j, edge_emb], axis=1), w_kmq[...]) + b_kmq[...]
        key = kmq[:, 0:H]
        msg = kmq[:, H:2 * H]
        qry = kmq[:, 2 * H:3 * H]                                          # already * 1/sqrt(dph)
        prod = key * qry

        weighted_parts = []
        for hd in range(HEAD_COUNT):
            sl = slice(hd * DPH, (hd + 1) * DPH)
            s_h = jnp.sum(prod[:, sl], axis=1, keepdims=True)              # (E+N, 1) head score
            # torch_geometric.utils.softmax grouped by SOURCE node (scale_att_wei_to_tgt=False;
            # aggregation below is over targets -- faithful to the original module)
            seg_max = jnp.max(m_src * s_h - neg_src, axis=0, keepdims=True)    # (1, N)
            max_e = jnp.max(m_src * seg_max - neg_src, axis=1, keepdims=True)  # gather -> (E+N, 1)
            ex = jnp.exp(s_h - max_e)
            seg_sum = jnp.sum(m_src * ex, axis=0, keepdims=True)               # (1, N)
            sum_e = jnp.sum(m_src * seg_sum, axis=1, keepdims=True)            # gather -> (E+N, 1)
            alpha_h = ex / (sum_e + 1e-16)
            weighted_parts.append(msg[:, sl] * alpha_h)
        weighted = jnp.concatenate(weighted_parts, axis=1)                 # (E+N, H)

        aggr = mm(m_tgt_t, weighted)                                       # scatter-add over tgt (N, H)
        m1 = jnp.maximum(mm(aggr, w_m1[...]) + b_m1[...], 0.0)             # mlp Linear+BN(folded)+ReLU
        x_cur = _gelu(mm(m1, w_m2[...]) + b_m2[...])                       # mlp Linear + mp_helper GELU

    # GELU(Vh(H) + Vx(X)) with stacked [Vh; Vx] weight
    gnn_out = _gelu(mm(jnp.concatenate([h_in, x_cur], axis=1), w_vhx[...]) + b_vhx[...])   # (N, H)

    # MultiheadAttPoolLayer (dropouts identity) + fc heads
    qs = mm(sent, w_pq[...]) + b_pq[...]                                   # (B, H)
    kv = mm(gnn_out, w_pkv[...]) + b_pkv[...]                              # (N, 2H) packed key|value
    neg_mask = neg_mask_ref[...]                                           # (n_node, B) additive mask
    inv_t = 1.0 / math.sqrt(D_K)

    gra_rows = []
    for b in range(B):                                                     # B=2, fully unrolled
        r0 = b * N_NODE
        kb = kv[r0:r0 + N_NODE, 0:H]
        vb = kv[r0:r0 + N_NODE, H:2 * H]
        qb = qs[b:b + 1, :]
        mcol = neg_mask[:, b:b + 1]
        g_parts = []
        for hd in range(N_ATT_HEAD):
            sl = slice(hd * D_K, (hd + 1) * D_K)
            logit = jnp.sum(kb[:, sl] * qb[:, sl], axis=1, keepdims=True) * inv_t + mcol
            logit = logit - jnp.max(logit, axis=0, keepdims=True)
            ew = jnp.exp(logit)
            att = ew / jnp.sum(ew, axis=0, keepdims=True)                  # softmax over nodes
            g_parts.append(jnp.sum(vb[:, sl] * att, axis=0, keepdims=True))  # (1, D_K)
        z_b = gnn_out[r0:r0 + 1, :]                                        # Z_vecs (context node)
        gra_rows.append(jnp.concatenate(g_parts + [z_b], axis=1))          # [graph_vecs | Z] (1, 2H)
    gra_in = jnp.concatenate(gra_rows, axis=0)                             # (B, 2H)

    sen = mm(sent, w_sen[...]) + b_sen[...]
    gra = mm(gra_in, w_gra[...]) + b_gra[...]
    sen_ref[...] = sen
    gra_ref[...] = gra
    logits_ref[...] = sen + gra


# -------------------------------- QAGNN_Analysis (fused) -------------------------------
def qagnn_forward(wp, sent_vecs, concept_ids, node_type_ids, node_scores,
                  adj_lengths, edge_index, edge_type):
    Bv, n_node = node_type_ids.shape
    assert Bv == B and n_node == N_NODE
    N = Bv * n_node
    h = H

    # ---------------- plain-JAX glue (data-dependent integer work only) ----------------
    flat_nt = node_type_ids.reshape(-1)

    # concept embedding lookup; context rows get GELU(svec2nvec(sent)) inside the kernel
    g1 = wp["concept_emb"][concept_ids[:, 1:] - 1]                         # (B, n_node-1, H)
    concept_part = jnp.concatenate(
        [jnp.zeros((Bv, 1, h), jnp.float32), g1], axis=1).reshape(N, h)
    ctx_rows = jnp.arange(Bv) * n_node
    ctx_scatter = jnp.zeros((N, Bv), jnp.float32).at[ctx_rows, jnp.arange(Bv)].set(1.0)

    # node-score normalization (matches the original, incl. division by adj_lengths)
    adj_f = adj_lengths.astype(jnp.float32)
    node_mask = (jnp.arange(n_node)[None, :] < adj_lengths[:, None]).astype(jnp.float32)
    ns = -node_scores
    ns = ns - ns[:, 0:1, :]
    ns = ns[:, :, 0] * node_mask
    mean_norm = jnp.sum(jnp.abs(ns), axis=1) / adj_f
    ns = (ns / (mean_norm[:, None] + 1e-5))[:, :, None]

    T = jax.nn.one_hot(flat_nt, N_NTYPE, dtype=jnp.float32)
    js = jnp.power(1.1, jnp.arange(h // 2, dtype=jnp.float32))[None, None, :]
    b_sin = jnp.sin(js * ns).reshape(N, h // 2)
    nfe_in = jnp.concatenate([T, b_sin], axis=1)                           # (N, n_ntype + h/2)

    # edge features (real edges then self loops), GATConvE self_loop=True branch
    edge_vec = jax.nn.one_hot(edge_type, N_ETYPE + 1, dtype=jnp.float32)
    self_edge_vec = jnp.zeros((N, N_ETYPE + 1), jnp.float32).at[:, N_ETYPE].set(1.0)
    head_vec = jax.nn.one_hot(flat_nt[edge_index[0]], N_NTYPE, dtype=jnp.float32)
    tail_vec = jax.nn.one_hot(flat_nt[edge_index[1]], N_NTYPE, dtype=jnp.float32)
    self_head = jax.nn.one_hot(flat_nt, N_NTYPE, dtype=jnp.float32)
    edge_feat = jnp.concatenate(
        [jnp.concatenate([edge_vec, self_edge_vec], axis=0),
         jnp.concatenate([jnp.concatenate([head_vec, tail_vec], axis=1),
                          jnp.concatenate([self_head, self_head], axis=1)], axis=0)],
        axis=1)                                                            # (E+N, n_etype+1+2*n_ntype)

    loop = jnp.arange(N, dtype=edge_index.dtype)
    src = jnp.concatenate([edge_index[0], loop])
    tgt = jnp.concatenate([edge_index[1], loop])
    m_src = jax.nn.one_hot(src, N, dtype=jnp.float32)                      # gather / segment matrix
    m_tgt = jax.nn.one_hot(tgt, N, dtype=jnp.float32)
    m_tgt_t = m_tgt.T                                                      # scatter-add matrix

    # pooler mask (additive), incl. the "un-mask node 0 if all masked" fix-up
    mask = (jnp.arange(n_node)[None, :] >= adj_lengths[:, None]) | (node_type_ids == 3)
    all_masked = jnp.all(mask, axis=1)
    mask = mask.at[:, 0].set(jnp.where(all_masked, False, mask[:, 0]))
    neg_mask_t = jnp.where(mask, -1e30, 0.0).astype(jnp.float32).T         # (n_node, B)

    # ---------------------------- single fused pallas_call -----------------------------
    inputs = [sent_vecs, concept_part, ctx_scatter, nfe_in, edge_feat,
              m_src, m_tgt, m_tgt_t, neg_mask_t,
              wp["w_svec"], wp["b_svec"], wp["w_nfe"], wp["b_nfe"],
              wp["w_ee1"], wp["b_ee1"], wp["w_ee2"], wp["b_ee2"]]
    for lw in wp["layers"]:
        inputs += [lw["w_kmq"], lw["b_kmq"], lw["w_m1"], lw["b_m1"], lw["w_m2"], lw["b_m2"]]
    inputs += [wp["w_vhx"], wp["b_vhx"], wp["w_pq"], wp["b_pq"], wp["w_pkv"], wp["b_pkv"],
               wp["w_sen"], wp["b_sen"], wp["w_gra"], wp["b_gra"]]
    assert len(inputs) == _NUM_INPUTS

    out_sds = jax.ShapeDtypeStruct((Bv, 1), jnp.float32)
    logits, sen_sco, gra_sco = pl.pallas_call(
        _qagnn_fused_kernel,
        out_shape=(out_sds, out_sds, out_sds),
        grid=(1,),
        in_specs=[_full_block(x.shape) for x in inputs],
        out_specs=(_full_block((Bv, 1)),) * 3,
        compiler_params=pltpu.CompilerParams(dimension_semantics=("arbitrary",)),
    )(*inputs)
    return logits, (sen_sco, gra_sco)


# ----------------------- pure-JAX reference (unpacked weights) -------------------------
def _dense(x, w, b, act=None):
    y = jnp.dot(x, w, precision=jax.lax.Precision.HIGHEST) + b
    if act == "relu":
        y = jnp.maximum(y, 0.0)
    elif act == "gelu":
        y = _gelu(y)
    return y


def _gnn_ref(p, H_in, edge_index, edge_type, node_type_ids, node_scores):
    Bv, n_node, h = H_in.shape
    N = Bv * n_node
    flat_ntype = node_type_ids.reshape(-1)

    T = jax.nn.one_hot(flat_ntype, N_NTYPE, dtype=jnp.float32)
    node_type_emb = _dense(T, p["emb_node_type_w"], p["emb_node_type_b"], act="gelu")
    js = jnp.power(1.1, jnp.arange(h // 2, dtype=jnp.float32))[None, None, :]
    b_sin = jnp.sin(js * node_scores)
    node_score_emb = _dense(b_sin.reshape(N, h // 2), p["emb_score_w"], p["emb_score_b"], act="gelu")
    nfe = jnp.concatenate([node_type_emb, node_score_emb], axis=1)

    edge_vec = jax.nn.one_hot(edge_type, N_ETYPE + 1, dtype=jnp.float32)
    self_edge_vec = jnp.zeros((N, N_ETYPE + 1), jnp.float32).at[:, N_ETYPE].set(1.0)
    head_vec = jax.nn.one_hot(flat_ntype[edge_index[0]], N_NTYPE, dtype=jnp.float32)
    tail_vec = jax.nn.one_hot(flat_ntype[edge_index[1]], N_NTYPE, dtype=jnp.float32)
    self_head = jax.nn.one_hot(flat_ntype, N_NTYPE, dtype=jnp.float32)
    edge_feat = jnp.concatenate(
        [jnp.concatenate([edge_vec, self_edge_vec], axis=0),
         jnp.concatenate([jnp.concatenate([head_vec, tail_vec], axis=1),
                          jnp.concatenate([self_head, self_head], axis=1)], axis=0)], axis=1)
    w1f, b1f = fold_bn(p["ee_w1"], p["ee_b1"], p["ee_bn"])
    edge_emb = _dense(_dense(edge_feat, w1f, b1f, act="relu"), p["ee_w2"], p["ee_b2"])

    loop = jnp.arange(N, dtype=edge_index.dtype)
    ei = jnp.concatenate([edge_index, jnp.stack([loop, loop])], axis=1)
    src, tgt = ei[0], ei[1]

    x_cur = H_in.reshape(N, h)
    for lp in p["gat"]:
        x2 = jnp.concatenate([x_cur, nfe], axis=1)
        x_i = x2[tgt]
        x_j = x2[src]
        key = _dense(jnp.concatenate([x_i, edge_emb], axis=1), lp["wk"], lp["bk"])
        msg = _dense(jnp.concatenate([x_j, edge_emb], axis=1), lp["wm"], lp["bm"])
        qry = _dense(x_j, lp["wq"], lp["bq"]) / math.sqrt(DPH)
        key = key.reshape(-1, HEAD_COUNT, DPH)
        msg = msg.reshape(-1, HEAD_COUNT, DPH)
        qry = qry.reshape(-1, HEAD_COUNT, DPH)
        scores = jnp.sum(qry * key, axis=2)
        seg_max = jax.ops.segment_max(scores, src, num_segments=N)
        ex = jnp.exp(scores - seg_max[src])
        seg_sum = jax.ops.segment_sum(ex, src, num_segments=N)
        alpha = ex / (seg_sum[src] + 1e-16)
        out_msg = (msg * alpha[:, :, None]).reshape(-1, h)
        aggr = jax.ops.segment_sum(out_msg, tgt, num_segments=N)
        mw1, mb1 = fold_bn(lp["mlp_w1"], lp["mlp_b1"], lp["mlp_bn"])
        m1 = _dense(aggr, mw1, mb1, act="relu")
        x_cur = _dense(m1, lp["mlp_w2"], lp["mlp_b2"], act="gelu")

    Vh = _dense(H_in.reshape(N, h), p["vh_w"], p["vh_b"])
    Vx = _dense(x_cur, p["vx_w"], p["vx_b"])
    return _gelu(Vh + Vx).reshape(Bv, n_node, h)


def qagnn_forward_ref(p, sent_vecs, concept_ids, node_type_ids, node_scores,
                      adj_lengths, edge_index, edge_type):
    Bv, n_node = node_type_ids.shape
    h = H
    gnn_input0 = _dense(sent_vecs, p["svec2nvec_w"], p["svec2nvec_b"], act="gelu")[:, None, :]
    gnn_input1 = p["concept_emb"][concept_ids[:, 1:] - 1]
    gnn_input = jnp.concatenate([gnn_input0, gnn_input1], axis=1)

    adj_f = adj_lengths.astype(jnp.float32)
    node_mask = (jnp.arange(n_node)[None, :] < adj_lengths[:, None]).astype(jnp.float32)
    ns = -node_scores
    ns = ns - ns[:, 0:1, :]
    ns = ns[:, :, 0] * node_mask
    mean_norm = jnp.sum(jnp.abs(ns), axis=1) / adj_f
    ns = (ns / (mean_norm[:, None] + 1e-5))[:, :, None]

    gnn_output = _gnn_ref(p, gnn_input, edge_index, edge_type, node_type_ids, ns)
    Z_vecs = gnn_output[:, 0]

    mask = (jnp.arange(n_node)[None, :] >= adj_lengths[:, None]) | (node_type_ids == 3)
    all_masked = jnp.all(mask, axis=1)
    mask = mask.at[:, 0].set(jnp.where(all_masked, False, mask[:, 0]))

    qs = _dense(sent_vecs, p["pool_wq"], p["pool_bq"]).reshape(Bv, N_ATT_HEAD, D_K)
    k_flat = gnn_output.reshape(Bv * n_node, h)
    ks = _dense(k_flat, p["pool_wk"], p["pool_bk"]).reshape(Bv, n_node, N_ATT_HEAD, D_K)
    vs = _dense(k_flat, p["pool_wv"], p["pool_bv"]).reshape(Bv, n_node, N_ATT_HEAD, D_K)
    attn = jnp.einsum("bhd,blhd->bhl", qs, ks,
                      precision=jax.lax.Precision.HIGHEST) / math.sqrt(D_K)
    attn = jnp.where(mask[:, None, :], -1e30, attn)
    attn = jax.nn.softmax(attn, axis=-1)
    graph_vecs = jnp.einsum("bhl,blhd->bhd", attn, vs,
                            precision=jax.lax.Precision.HIGHEST).reshape(Bv, N_ATT_HEAD * D_K)

    sen_sco = _dense(sent_vecs, p["sen_fc_w"], p["sen_fc_b"])
    gra_sco = _dense(jnp.concatenate([graph_vecs, Z_vecs], axis=1), p["gra_fc_w"], p["gra_fc_b"])
    return sen_sco + gra_sco, (sen_sco, gra_sco)


# --------------------------------------- main -------------------------------------------
if __name__ == "__main__":
    key = jax.random.PRNGKey(0)
    kp, k1, k2, k3, k4, k5, k6 = jax.random.split(key, 7)

    params = init_params(kp)
    packed = prepare_params(params)          # BN folding / weight packing hoisted (one-time)

    sent_vecs = jax.random.normal(k1, (B, SENT_DIM), jnp.float32)
    concept_ids = jax.random.randint(k2, (B, N_NODE), 1, N_CONCEPT + 1, dtype=jnp.int32)
    node_type_ids = jax.random.randint(k3, (B, N_NODE), 0, 3, dtype=jnp.int32).at[:, 0].set(3)
    node_scores = jax.random.normal(k4, (B, N_NODE, 1), jnp.float32)
    adj_lengths = jnp.array([N_NODE, N_NODE - 2], dtype=jnp.int32)
    edge_index = jax.random.randint(k5, (2, E_EDGES), 0, B * N_NODE, dtype=jnp.int32)
    edge_type = jax.random.randint(k6, (E_EDGES,), 0, N_ETYPE, dtype=jnp.int32)

    fwd = jax.jit(qagnn_forward)
    logits, (sen_sco, gra_sco) = fwd(packed, sent_vecs, concept_ids, node_type_ids,
                                     node_scores, adj_lengths, edge_index, edge_type)
    logits = jax.block_until_ready(logits)
    jax.block_until_ready(sen_sco)
    jax.block_until_ready(gra_sco)

    assert logits.shape == (B, 1)
    assert bool(jnp.all(jnp.isfinite(logits)))

    # cross-check the fused/packed kernel against a pure-JAX (XLA) reference of the module
    ref_logits, (ref_sen, ref_gra) = jax.jit(qagnn_forward_ref)(
        params, sent_vecs, concept_ids, node_type_ids, node_scores,
        adj_lengths, edge_index, edge_type)
    jax.block_until_ready(ref_logits)
    assert bool(jnp.allclose(logits, ref_logits, atol=2e-3, rtol=2e-2))
    assert bool(jnp.allclose(sen_sco, ref_sen, atol=2e-3, rtol=2e-2))
    assert bool(jnp.allclose(gra_sco, ref_gra, atol=2e-3, rtol=2e-2))

    print("KERNEL_OK")
</pallas_src>

<mosaic_0001>
module attributes {stable_mosaic.version = 11 : i64} {
  func.func @_qagnn_fused_kernel(%arg0: i32, %arg1: memref<2x32xf32, #tpu.memory_space<vmem>>, %arg2: memref<16x32xf32, #tpu.memory_space<vmem>>, %arg3: memref<16x2xf32, #tpu.memory_space<vmem>>, %arg4: memref<16x20xf32, #tpu.memory_space<vmem>>, %arg5: memref<28x15xf32, #tpu.memory_space<vmem>>, %arg6: memref<28x16xf32, #tpu.memory_space<vmem>>, %arg7: memref<28x16xf32, #tpu.memory_space<vmem>>, %arg8: memref<16x28xf32, #tpu.memory_space<vmem>>, %arg9: memref<8x2xf32, #tpu.memory_space<vmem>>, %arg10: memref<32x32xf32, #tpu.memory_space<vmem>>, %arg11: memref<1x32xf32, #tpu.memory_space<vmem>>, %arg12: memref<20x32xf32, #tpu.memory_space<vmem>>, %arg13: memref<1x32xf32, #tpu.memory_space<vmem>>, %arg14: memref<15x32xf32, #tpu.memory_space<vmem>>, %arg15: memref<1x32xf32, #tpu.memory_space<vmem>>, %arg16: memref<32x32xf32, #tpu.memory_space<vmem>>, %arg17: memref<1x32xf32, #tpu.memory_space<vmem>>, %arg18: memref<160x96xf32, #tpu.memory_space<vmem>>, %arg19: memref<1x96xf32, #tpu.memory_space<vmem>>, %arg20: memref<32x32xf32, #tpu.memory_space<vmem>>, %arg21: memref<1x32xf32, #tpu.memory_space<vmem>>, %arg22: memref<32x32xf32, #tpu.memory_space<vmem>>, %arg23: memref<1x32xf32, #tpu.memory_space<vmem>>, %arg24: memref<160x96xf32, #tpu.memory_space<vmem>>, %arg25: memref<1x96xf32, #tpu.memory_space<vmem>>, %arg26: memref<32x32xf32, #tpu.memory_space<vmem>>, %arg27: memref<1x32xf32, #tpu.memory_space<vmem>>, %arg28: memref<32x32xf32, #tpu.memory_space<vmem>>, %arg29: memref<1x32xf32, #tpu.memory_space<vmem>>, %arg30: memref<64x32xf32, #tpu.memory_space<vmem>>, %arg31: memref<1x32xf32, #tpu.memory_space<vmem>>, %arg32: memref<32x32xf32, #tpu.memory_space<vmem>>, %arg33: memref<1x32xf32, #tpu.memory_space<vmem>>, %arg34: memref<32x64xf32, #tpu.memory_space<vmem>>, %arg35: memref<1x64xf32, #tpu.memory_space<vmem>>, %arg36: memref<32x1xf32, #tpu.memory_space<vmem>>, %arg37: memref<1x1xf32, #tpu.memory_space<vmem>>, %arg38: memref<64x1xf32, #tpu.memory_space<vmem>>, %arg39: memref<1x1xf32, #tpu.memory_space<vmem>>, %arg40: memref<2x1xf32, #tpu.memory_space<vmem>>, %arg41: memref<2x1xf32, #tpu.memory_space<vmem>>, %arg42: memref<2x1xf32, #tpu.memory_space<vmem>>) attributes {dimension_semantics = [#tpu.dimension_semantics<arbitrary>], iteration_bounds = array<i64: 1>, scalar_prefetch = 0 : i64, scratch_operands = 0 : i64, tpu.core_type = #tpu.core_type<tc>, window_params = [{pipeline_mode = #tpu.pipeline_mode<synchronous>, transform_indices = @transform_0, window_bounds = array<i64: 2, 32>}, {pipeline_mode = #tpu.pipeline_mode<synchronous>, transform_indices = @transform_1, window_bounds = array<i64: 16, 32>}, {pipeline_mode = #tpu.pipeline_mode<synchronous>, transform_indices = @transform_2, window_bounds = array<i64: 16, 2>}, {pipeline_mode = #tpu.pipeline_mode<synchronous>, transform_indices = @transform_3, window_bounds = array<i64: 16, 20>}, {pipeline_mode = #tpu.pipeline_mode<synchronous>, transform_indices = @transform_4, window_bounds = array<i64: 28, 15>}, {pipeline_mode = #tpu.pipeline_mode<synchronous>, transform_indices = @transform_5, window_bounds = array<i64: 28, 16>}, {pipeline_mode = #tpu.pipeline_mode<synchronous>, transform_indices = @transform_6, window_bounds = array<i64: 28, 16>}, {pipeline_mode = #tpu.pipeline_mode<synchronous>, transform_indices = @transform_7, window_bounds = array<i64: 16, 28>}, {pipeline_mode = #tpu.pipeline_mode<synchronous>, transform_indices = @transform_8, window_bounds = array<i64: 8, 2>}, {pipeline_mode = #tpu.pipeline_mode<synchronous>, transform_indices = @transform_9, window_bounds = array<i64: 32, 32>}, {pipeline_mode = #tpu.pipeline_mode<synchronous>, transform_indices = @transform_10, window_bounds = array<i64: 1, 32>}, {pipeline_mode = #tpu.pipeline_mode<synchronous>, transform_indices = @transform_11, window_bounds = array<i64: 20, 32>}, {pipeline_mode = #tpu.pipeline_mode<synchronous>, transform_indices = @transform_12, window_bounds = array<i64: 1, 32>}, {pipeline_mode = #tpu.pipeline_mode<synchronous>, transform_indices = @transform_13, window_bounds = array<i64: 15, 32>}, {pipeline_mode = #tpu.pipeline_mode<synchronous>, transform_indices = @transform_14, window_bounds = array<i64: 1, 32>}, {pipeline_mode = #tpu.pipeline_mode<synchronous>, transform_indices = @transform_15, window_bounds = array<i64: 32, 32>}, {pipeline_mode = #tpu.pipeline_mode<synchronous>, transform_indices = @transform_16, window_bounds = array<i64: 1, 32>}, {pipeline_mode = #tpu.pipeline_mode<synchronous>, transform_indices = @transform_17, window_bounds = array<i64: 160, 96>}, {pipeline_mode = #tpu.pipeline_mode<synchronous>, transform_indices = @transform_18, window_bounds = array<i64: 1, 96>}, {pipeline_mode = #tpu.pipeline_mode<synchronous>, transform_indices = @transform_19, window_bounds = array<i64: 32, 32>}, {pipeline_mode = #tpu.pipeline_mode<synchronous>, transform_indices = @transform_20, window_bounds = array<i64: 1, 32>}, {pipeline_mode = #tpu.pipeline_mode<synchronous>, transform_indices = @transform_21, window_bounds = array<i64: 32, 32>}, {pipeline_mode = #tpu.pipeline_mode<synchronous>, transform_indices = @transform_22, window_bounds = array<i64: 1, 32>}, {pipeline_mode = #tpu.pipeline_mode<synchronous>, transform_indices = @transform_23, window_bounds = array<i64: 160, 96>}, {pipeline_mode = #tpu.pipeline_mode<synchronous>, transform_indices = @transform_24, window_bounds = array<i64: 1, 96>}, {pipeline_mode = #tpu.pipeline_mode<synchronous>, transform_indices = @transform_25, window_bounds = array<i64: 32, 32>}, {pipeline_mode = #tpu.pipeline_mode<synchronous>, transform_indices = @transform_26, window_bounds = array<i64: 1, 32>}, {pipeline_mode = #tpu.pipeline_mode<synchronous>, transform_indices = @transform_27, window_bounds = array<i64: 32, 32>}, {pipeline_mode = #tpu.pipeline_mode<synchronous>, transform_indices = @transform_28, window_bounds = array<i64: 1, 32>}, {pipeline_mode = #tpu.pipeline_mode<synchronous>, transform_indices = @transform_29, window_bounds = array<i64: 64, 32>}, {pipeline_mode = #tpu.pipeline_mode<synchronous>, transform_indices = @transform_30, window_bounds = array<i64: 1, 32>}, {pipeline_mode = #tpu.pipeline_mode<synchronous>, transform_indices = @transform_31, window_bounds = array<i64: 32, 32>}, {pipeline_mode = #tpu.pipeline_mode<synchronous>, transform_indices = @transform_32, window_bounds = array<i64: 1, 32>}, {pipeline_mode = #tpu.pipeline_mode<synchronous>, transform_indices = @transform_33, window_bounds = array<i64: 32, 64>}, {pipeline_mode = #tpu.pipeline_mode<synchronous>, transform_indices = @transform_34, window_bounds = array<i64: 1, 64>}, {pipeline_mode = #tpu.pipeline_mode<synchronous>, transform_indices = @transform_35, window_bounds = array<i64: 32, 1>}, {pipeline_mode = #tpu.pipeline_mode<synchronous>, transform_indices = @transform_36, window_bounds = array<i64: 1, 1>}, {pipeline_mode = #tpu.pipeline_mode<synchronous>, transform_indices = @transform_37, window_bounds = array<i64: 64, 1>}, {pipeline_mode = #tpu.pipeline_mode<synchronous>, transform_indices = @transform_38, window_bounds = array<i64: 1, 1>}, {pipeline_mode = #tpu.pipeline_mode<synchronous>, transform_indices = @transform_39, window_bounds = array<i64: 2, 1>}, {pipeline_mode = #tpu.pipeline_mode<synchronous>, transform_indices = @transform_40, window_bounds = array<i64: 2, 1>}, {pipeline_mode = #tpu.pipeline_mode<synchronous>, transform_indices = @transform_41, window_bounds = array<i64: 2, 1>}]} {
    %c0 = arith.constant 0 : index
    %c0_0 = arith.constant 0 : index
    %0 = vector.load %arg1[%c0, %c0_0] : memref<2x32xf32, #tpu.memory_space<vmem>>, vector<2x32xf32>
    %c0_1 = arith.constant 0 : index
    %c0_2 = arith.constant 0 : index
    %1 = vector.load %arg6[%c0_1, %c0_2] : memref<28x16xf32, #tpu.memory_space<vmem>>, vector<28x16xf32>
    %c0_3 = arith.constant 0 : index
    %c0_4 = arith.constant 0 : index
    %2 = vector.load %arg7[%c0_3, %c0_4] : memref<28x16xf32, #tpu.memory_space<vmem>>, vector<28x16xf32>
    %c0_5 = arith.constant 0 : index
    %c0_6 = arith.constant 0 : index
    %3 = vector.load %arg8[%c0_5, %c0_6] : memref<16x28xf32, #tpu.memory_space<vmem>>, vector<16x28xf32>
    %cst = arith.constant 1.000000e+00 : f32
    %4 = vector.broadcast %cst : f32 to vector<28x16xf32>
    %5 = arith.subf %4, %1 : vector<28x16xf32>
    %cst_7 = arith.constant 1.000000e+30 : f32
    %6 = vector.broadcast %cst_7 : f32 to vector<28x16xf32>
    %7 = arith.mulf %5, %6 : vector<28x16xf32>
    %c0_8 = arith.constant 0 : index
    %c0_9 = arith.constant 0 : index
    %8 = vector.load %arg10[%c0_8, %c0_9] : memref<32x32xf32, #tpu.memory_space<vmem>>, vector<32x32xf32>
    %cst_10 = arith.constant dense<0.000000e+00> : vector<2x32xf32>
    %9 = tpu.matmul %0, %8, %cst_10 {dimension_numbers = #tpu.dot_dimension_numbers<[1], [0], [0], [1], [0, 0, 1, 1], [], []>} : vector<2x32xf32>, vector<32x32xf32>, vector<2x32xf32> -> vector<2x32xf32>
    %c0_11 = arith.constant 0 : index
    %c0_12 = arith.constant 0 : index
    %10 = vector.load %arg11[%c0_11, %c0_12] : memref<1x32xf32, #tpu.memory_space<vmem>>, vector<1x32xf32>
    %11 = vector.broadcast %10 : vector<1x32xf32> to vector<2x32xf32>
    %12 = arith.addf %9, %11 : vector<2x32xf32>
    %cst_13 = arith.constant 5.000000e-01 : f32
    %13 = vector.broadcast %cst_13 : f32 to vector<2x32xf32>
    %14 = arith.mulf %13, %12 : vector<2x32xf32>
    %15 = arith.mulf %12, %12 : vector<2x32xf32>
    %16 = arith.mulf %12, %15 : vector<2x32xf32>
    %cst_14 = arith.constant 4.471500e-02 : f32
    %17 = vector.broadcast %cst_14 : f32 to vector<2x32xf32>
    %18 = arith.mulf %17, %16 : vector<2x32xf32>
    %19 = arith.addf %12, %18 : vector<2x32xf32>
    %cst_15 = arith.constant 0.797884583 : f32
    %20 = vector.broadcast %cst_15 : f32 to vector<2x32xf32>
    %21 = arith.mulf %20, %19 : vector<2x32xf32>
    %22 = math.tanh %21 : vector<2x32xf32>
    %cst_16 = arith.constant 1.000000e+00 : f32
    %23 = vector.broadcast %cst_16 : f32 to vector<2x32xf32>
    %24 = arith.addf %23, %22 : vector<2x32xf32>
    %25 = arith.mulf %14, %24 : vector<2x32xf32>
    %c0_17 = arith.constant 0 : index
    %c0_18 = arith.constant 0 : index
    %26 = vector.load %arg2[%c0_17, %c0_18] : memref<16x32xf32, #tpu.memory_space<vmem>>, vector<16x32xf32>
    %c0_19 = arith.constant 0 : index
    %c0_20 = arith.constant 0 : index
    %27 = vector.load %arg3[%c0_19, %c0_20] : memref<16x2xf32, #tpu.memory_space<vmem>>, vector<16x2xf32>
    %cst_21 = arith.constant dense<0.000000e+00> : vector<16x32xf32>
    %28 = tpu.matmul %27, %25, %cst_21 {dimension_numbers = #tpu.dot_dimension_numbers<[1], [0], [0], [1], [0, 0, 1, 1], [], []>} : vector<16x2xf32>, vector<2x32xf32>, vector<16x32xf32> -> vector<16x32xf32>
    %29 = arith.addf %26, %28 : vector<16x32xf32>
    %c0_22 = arith.constant 0 : index
    %c0_23 = arith.constant 0 : index
    %30 = vector.load %arg4[%c0_22, %c0_23] : memref<16x20xf32, #tpu.memory_space<vmem>>, vector<16x20xf32>
    %c0_24 = arith.constant 0 : index
    %c0_25 = arith.constant 0 : index
    %31 = vector.load %arg12[%c0_24, %c0_25] : memref<20x32xf32, #tpu.memory_space<vmem>>, vector<20x32xf32>
    %cst_26 = arith.constant dense<0.000000e+00> : vector<16x32xf32>
    %32 = tpu.matmul %30, %31, %cst_26 {dimension_numbers = #tpu.dot_dimension_numbers<[1], [0], [0], [1], [0, 0, 1, 1], [], []>} : vector<16x20xf32>, vector<20x32xf32>, vector<16x32xf32> -> vector<16x32xf32>
    %c0_27 = arith.constant 0 : index
    %c0_28 = arith.constant 0 : index
    %33 = vector.load %arg13[%c0_27, %c0_28] : memref<1x32xf32, #tpu.memory_space<vmem>>, vector<1x32xf32>
    %34 = vector.broadcast %33 : vector<1x32xf32> to vector<16x32xf32>
    %35 = arith.addf %32, %34 : vector<16x32xf32>
    %cst_29 = arith.constant 5.000000e-01 : f32
    %36 = vector.broadcast %cst_29 : f32 to vector<16x32xf32>
    %37 = arith.mulf %36, %35 : vector<16x32xf32>
    %38 = arith.mulf %35, %35 : vector<16x32xf32>
    %39 = arith.mulf %35, %38 : vector<16x32xf32>
    %cst_30 = arith.constant 4.471500e-02 : f32
    %40 = vector.broadcast %cst_30 : f32 to vector<16x32xf32>
    %41 = arith.mulf %40, %39 : vector<16x32xf32>
    %42 = arith.addf %35, %41 : vector<16x32xf32>
    %cst_31 = arith.constant 0.797884583 : f32
    %43 = vector.broadcast %cst_31 : f32 to vector<16x32xf32>
    %44 = arith.mulf %43, %42 : vector<16x32xf32>
    %45 = math.tanh %44 : vector<16x32xf32>
    %cst_32 = arith.constant 1.000000e+00 : f32
    %46 = vector.broadcast %cst_32 : f32 to vector<16x32xf32>
    %47 = arith.addf %46, %45 : vector<16x32xf32>
    %48 = arith.mulf %37, %47 : vector<16x32xf32>
    %c0_33 = arith.constant 0 : index
    %c0_34 = arith.constant 0 : index
    %49 = vector.load %arg5[%c0_33, %c0_34] : memref<28x15xf32, #tpu.memory_space<vmem>>, vector<28x15xf32>
    %c0_35 = arith.constant 0 : index
    %c0_36 = arith.constant 0 : index
    %50 = vector.load %arg14[%c0_35, %c0_36] : memref<15x32xf32, #tpu.memory_space<vmem>>, vector<15x32xf32>
    %cst_37 = arith.constant dense<0.000000e+00> : vector<28x32xf32>
    %51 = tpu.matmul %49, %50, %cst_37 {dimension_numbers = #tpu.dot_dimension_numbers<[1], [0], [0], [1], [0, 0, 1, 1], [], []>} : vector<28x15xf32>, vector<15x32xf32>, vector<28x32xf32> -> vector<28x32xf32>
    %c0_38 = arith.constant 0 : index
    %c0_39 = arith.constant 0 : index
    %52 = vector.load %arg15[%c0_38, %c0_39] : memref<1x32xf32, #tpu.memory_space<vmem>>, vector<1x32xf32>
    %53 = vector.broadcast %52 : vector<1x32xf32> to vector<28x32xf32>
    %54 = arith.addf %51, %53 : vector<28x32xf32>
    %cst_40 = arith.constant 0.000000e+00 : f32
    %55 = vector.broadcast %cst_40 : f32 to vector<28x32xf32>
    %56 = arith.maximumf %54, %55 : vector<28x32xf32>
    %c0_41 = arith.constant 0 : index
    %c0_42 = arith.constant 0 : index
    %57 = vector.load %arg16[%c0_41, %c0_42] : memref<32x32xf32, #tpu.memory_space<vmem>>, vector<32x32xf32>
    %cst_43 = arith.constant dense<0.000000e+00> : vector<28x32xf32>
    %58 = tpu.matmul %56, %57, %cst_43 {dimension_numbers = #tpu.dot_dimension_numbers<[1], [0], [0], [1], [0, 0, 1, 1], [], []>} : vector<28x32xf32>, vector<32x32xf32>, vector<28x32xf32> -> vector<28x32xf32>
    %c0_44 = arith.constant 0 : index
    %c0_45 = arith.constant 0 : index
    %59 = vector.load %arg17[%c0_44, %c0_45] : memref<1x32xf32, #tpu.memory_space<vmem>>, vector<1x32xf32>
    %60 = vector.broadcast %59 : vector<1x32xf32> to vector<28x32xf32>
    %61 = arith.addf %58, %60 : vector<28x32xf32>
    %62 = tpu.concatenate %29, %48 in 1 : vector<16x32xf32>, vector<16x32xf32> -> vector<16x64xf32>
    %cst_46 = arith.constant dense<0.000000e+00> : vector<28x64xf32>
    %63 = tpu.matmul %2, %62, %cst_46 {dimension_numbers = #tpu.dot_dimension_numbers<[1], [0], [0], [1], [0, 0, 1, 1], [], []>} : vector<28x16xf32>, vector<16x64xf32>, vector<28x64xf32> -> vector<28x64xf32>
    %cst_47 = arith.constant dense<0.000000e+00> : vector<28x64xf32>
    %64 = tpu.matmul %1, %62, %cst_47 {dimension_numbers = #tpu.dot_dimension_numbers<[1], [0], [0], [1], [0, 0, 1, 1], [], []>} : vector<28x16xf32>, vector<16x64xf32>, vector<28x64xf32> -> vector<28x64xf32>
    %65 = tpu.concatenate %63, %64, %61 in 1 : vector<28x64xf32>, vector<28x64xf32>, vector<28x32xf32> -> vector<28x160xf32>
    %c0_48 = arith.constant 0 : index
    %c0_49 = arith.constant 0 : index
    %66 = vector.load %arg18[%c0_48, %c0_49] : memref<160x96xf32, #tpu.memory_space<vmem>>, vector<160x96xf32>
    %cst_50 = arith.constant dense<0.000000e+00> : vector<28x96xf32>
    %67 = tpu.matmul %65, %66, %cst_50 {dimension_numbers = #tpu.dot_dimension_numbers<[1], [0], [0], [1], [0, 0, 1, 1], [], []>} : vector<28x160xf32>, vector<160x96xf32>, vector<28x96xf32> -> vector<28x96xf32>
    %c0_51 = arith.constant 0 : index
    %c0_52 = arith.constant 0 : index
    %68 = vector.load %arg19[%c0_51, %c0_52] : memref<1x96xf32, #tpu.memory_space<vmem>>, vector<1x96xf32>
    %69 = vector.broadcast %68 : vector<1x96xf32> to vector<28x96xf32>
    %70 = arith.addf %67, %69 : vector<28x96xf32>
    %71 = vector.extract_strided_slice %70 {offsets = [0, 0], sizes = [28, 32], strides = [1, 1]} : vector<28x96xf32> to vector<28x32xf32>
    %72 = vector.extract_strided_slice %70 {offsets = [0, 32], sizes = [28, 32], strides = [1, 1]} : vector<28x96xf32> to vector<28x32xf32>
    %73 = vector.extract_strided_slice %70 {offsets = [0, 64], sizes = [28, 32], strides = [1, 1]} : vector<28x96xf32> to vector<28x32xf32>
    %74 = arith.mulf %71, %73 : vector<28x32xf32>
    %75 = vector.extract_strided_slice %74 {offsets = [0, 0], sizes = [28, 8], strides = [1, 1]} : vector<28x32xf32> to vector<28x8xf32>
    %cst_53 = arith.constant dense<0.000000e+00> : vector<28xf32>
    %76 = vector.multi_reduction <add>, %75, %cst_53 [1] : vector<28x8xf32> to vector<28xf32>
    %77 = vector.shape_cast %76 : vector<28xf32> to vector<28x1xf32>
    %78 = vector.broadcast %77 : vector<28x1xf32> to vector<28x16xf32>
    %79 = arith.mulf %1, %78 : vector<28x16xf32>
    %80 = arith.subf %79, %7 : vector<28x16xf32>
    %cst_54 = arith.constant dense<0xFF800000> : vector<16xf32>
    %81 = vector.multi_reduction <maximumf>, %80, %cst_54 [0] : vector<28x16xf32> to vector<16xf32>
    %82 = vector.shape_cast %81 : vector<16xf32> to vector<1x16xf32>
    %83 = vector.broadcast %82 : vector<1x16xf32> to vector<28x16xf32>
    %84 = arith.mulf %1, %83 : vector<28x16xf32>
    %85 = arith.subf %84, %7 : vector<28x16xf32>
    %cst_55 = arith.constant dense<0xFF800000> : vector<28xf32>
    %86 = vector.multi_reduction <maximumf>, %85, %cst_55 [1] : vector<28x16xf32> to vector<28xf32>
    %87 = vector.shape_cast %86 : vector<28xf32> to vector<28x1xf32>
    %88 = arith.subf %77, %87 : vector<28x1xf32>
    %89 = math.exp %88 : vector<28x1xf32>
    %90 = vector.broadcast %89 : vector<28x1xf32> to vector<28x16xf32>
    %91 = arith.mulf %1, %90 : vector<28x16xf32>
    %cst_56 = arith.constant dense<0.000000e+00> : vector<16xf32>
    %92 = vector.multi_reduction <add>, %91, %cst_56 [0] : vector<28x16xf32> to vector<16xf32>
    %93 = vector.shape_cast %92 : vector<16xf32> to vector<1x16xf32>
    %94 = vector.broadcast %93 : vector<1x16xf32> to vector<28x16xf32>
    %95 = arith.mulf %1, %94 : vector<28x16xf32>
    %cst_57 = arith.constant dense<0.000000e+00> : vector<28xf32>
    %96 = vector.multi_reduction <add>, %95, %cst_57 [1] : vector<28x16xf32> to vector<28xf32>
    %97 = vector.shape_cast %96 : vector<28xf32> to vector<28x1xf32>
    %cst_58 = arith.constant 1.000000e-16 : f32
    %98 = vector.broadcast %cst_58 : f32 to vector<28x1xf32>
    %99 = arith.addf %97, %98 : vector<28x1xf32>
    %100 = arith.divf %89, %99 : vector<28x1xf32>
    %101 = vector.extract_strided_slice %72 {offsets = [0, 0], sizes = [28, 8], strides = [1, 1]} : vector<28x32xf32> to vector<28x8xf32>
    %102 = vector.broadcast %100 : vector<28x1xf32> to vector<28x8xf32>
    %103 = arith.mulf %101, %102 : vector<28x8xf32>
    %104 = vector.extract_strided_slice %74 {offsets = [0, 8], sizes = [28, 8], strides = [1, 1]} : vector<28x32xf32> to vector<28x8xf32>
    %cst_59 = arith.constant dense<0.000000e+00> : vector<28xf32>
    %105 = vector.multi_reduction <add>, %104, %cst_59 [1] : vector<28x8xf32> to vector<28xf32>
    %106 = vector.shape_cast %105 : vector<28xf32> to vector<28x1xf32>
    %107 = vector.broadcast %106 : vector<28x1xf32> to vector<28x16xf32>
    %108 = arith.mulf %1, %107 : vector<28x16xf32>
    %109 = arith.subf %108, %7 : vector<28x16xf32>
    %cst_60 = arith.constant dense<0xFF800000> : vector<16xf32>
    %110 = vector.multi_reduction <maximumf>, %109, %cst_60 [0] : vector<28x16xf32> to vector<16xf32>
    %111 = vector.shape_cast %110 : vector<16xf32> to vector<1x16xf32>
    %112 = vector.broadcast %111 : vector<1x16xf32> to vector<28x16xf32>
    %113 = arith.mulf %1, %112 : vector<28x16xf32>
    %114 = arith.subf %113, %7 : vector<28x16xf32>
    %cst_61 = arith.constant dense<0xFF800000> : vector<28xf32>
    %115 = vector.multi_reduction <maximumf>, %114, %cst_61 [1] : vector<28x16xf32> to vector<28xf32>
    %116 = vector.shape_cast %115 : vector<28xf32> to vector<28x1xf32>
    %117 = arith.subf %106, %116 : vector<28x1xf32>
    %118 = math.exp %117 : vector<28x1xf32>
    %119 = vector.broadcast %118 : vector<28x1xf32> to vector<28x16xf32>
    %120 = arith.mulf %1, %119 : vector<28x16xf32>
    %cst_62 = arith.constant dense<0.000000e+00> : vector<16xf32>
    %121 = vector.multi_reduction <add>, %120, %cst_62 [0] : vector<28x16xf32> to vector<16xf32>
    %122 = vector.shape_cast %121 : vector<16xf32> to vector<1x16xf32>
    %123 = vector.broadcast %122 : vector<1x16xf32> to vector<28x16xf32>
    %124 = arith.mulf %1, %123 : vector<28x16xf32>
    %cst_63 = arith.constant dense<0.000000e+00> : vector<28xf32>
    %125 = vector.multi_reduction <add>, %124, %cst_63 [1] : vector<28x16xf32> to vector<28xf32>
    %126 = vector.shape_cast %125 : vector<28xf32> to vector<28x1xf32>
    %cst_64 = arith.constant 1.000000e-16 : f32
    %127 = vector.broadcast %cst_64 : f32 to vector<28x1xf32>
    %128 = arith.addf %126, %127 : vector<28x1xf32>
    %129 = arith.divf %118, %128 : vector<28x1xf32>
    %130 = vector.extract_strided_slice %72 {offsets = [0, 8], sizes = [28, 8], strides = [1, 1]} : vector<28x32xf32> to vector<28x8xf32>
    %131 = vector.broadcast %129 : vector<28x1xf32> to vector<28x8xf32>
    %132 = arith.mulf %130, %131 : vector<28x8xf32>
    %133 = vector.extract_strided_slice %74 {offsets = [0, 16], sizes = [28, 8], strides = [1, 1]} : vector<28x32xf32> to vector<28x8xf32>
    %cst_65 = arith.constant dense<0.000000e+00> : vector<28xf32>
    %134 = vector.multi_reduction <add>, %133, %cst_65 [1] : vector<28x8xf32> to vector<28xf32>
    %135 = vector.shape_cast %134 : vector<28xf32> to vector<28x1xf32>
    %136 = vector.broadcast %135 : vector<28x1xf32> to vector<28x16xf32>
    %137 = arith.mulf %1, %136 : vector<28x16xf32>
    %138 = arith.subf %137, %7 : vector<28x16xf32>
    %cst_66 = arith.constant dense<0xFF800000> : vector<16xf32>
    %139 = vector.multi_reduction <maximumf>, %138, %cst_66 [0] : vector<28x16xf32> to vector<16xf32>
    %140 = vector.shape_cast %139 : vector<16xf32> to vector<1x16xf32>
    %141 = vector.broadcast %140 : vector<1x16xf32> to vector<28x16xf32>
    %142 = arith.mulf %1, %141 : vector<28x16xf32>
    %143 = arith.subf %142, %7 : vector<28x16xf32>
    %cst_67 = arith.constant dense<0xFF800000> : vector<28xf32>
    %144 = vector.multi_reduction <maximumf>, %143, %cst_67 [1] : vector<28x16xf32> to vector<28xf32>
    %145 = vector.shape_cast %144 : vector<28xf32> to vector<28x1xf32>
    %146 = arith.subf %135, %145 : vector<28x1xf32>
    %147 = math.exp %146 : vector<28x1xf32>
    %148 = vector.broadcast %147 : vector<28x1xf32> to vector<28x16xf32>
    %149 = arith.mulf %1, %148 : vector<28x16xf32>
    %cst_68 = arith.constant dense<0.000000e+00> : vector<16xf32>
    %150 = vector.multi_reduction <add>, %149, %cst_68 [0] : vector<28x16xf32> to vector<16xf32>
    %151 = vector.shape_cast %150 : vector<16xf32> to vector<1x16xf32>
    %152 = vector.broadcast %151 : vector<1x16xf32> to vector<28x16xf32>
    %153 = arith.mulf %1, %152 : vector<28x16xf32>
    %cst_69 = arith.constant dense<0.000000e+00> : vector<28xf32>
    %154 = vector.multi_reduction <add>, %153, %cst_69 [1] : vector<28x16xf32> to vector<28xf32>
    %155 = vector.shape_cast %154 : vector<28xf32> to vector<28x1xf32>
    %cst_70 = arith.constant 1.000000e-16 : f32
    %156 = vector.broadcast %cst_70 : f32 to vector<28x1xf32>
    %157 = arith.addf %155, %156 : vector<28x1xf32>
    %158 = arith.divf %147, %157 : vector<28x1xf32>
    %159 = vector.extract_strided_slice %72 {offsets = [0, 16], sizes = [28, 8], strides = [1, 1]} : vector<28x32xf32> to vector<28x8xf32>
    %160 = vector.broadcast %158 : vector<28x1xf32> to vector<28x8xf32>
    %161 = arith.mulf %159, %160 : vector<28x8xf32>
    %162 = vector.extract_strided_slice %74 {offsets = [0, 24], sizes = [28, 8], strides = [1, 1]} : vector<28x32xf32> to vector<28x8xf32>
    %cst_71 = arith.constant dense<0.000000e+00> : vector<28xf32>
    %163 = vector.multi_reduction <add>, %162, %cst_71 [1] : vector<28x8xf32> to vector<28xf32>
    %164 = vector.shape_cast %163 : vector<28xf32> to vector<28x1xf32>
    %165 = vector.broadcast %164 : vector<28x1xf32> to vector<28x16xf32>
    %166 = arith.mulf %1, %165 : vector<28x16xf32>
    %167 = arith.subf %166, %7 : vector<28x16xf32>
    %cst_72 = arith.constant dense<0xFF800000> : vector<16xf32>
    %168 = vector.multi_reduction <maximumf>, %167, %cst_72 [0] : vector<28x16xf32> to vector<16xf32>
    %169 = vector.shape_cast %168 : vector<16xf32> to vector<1x16xf32>
    %170 = vector.broadcast %169 : vector<1x16xf32> to vector<28x16xf32>
    %171 = arith.mulf %1, %170 : vector<28x16xf32>
    %172 = arith.subf %171, %7 : vector<28x16xf32>
    %cst_73 = arith.constant dense<0xFF800000> : vector<28xf32>
    %173 = vector.multi_reduction <maximumf>, %172, %cst_73 [1] : vector<28x16xf32> to vector<28xf32>
    %174 = vector.shape_cast %173 : vector<28xf32> to vector<28x1xf32>
    %175 = arith.subf %164, %174 : vector<28x1xf32>
    %176 = math.exp %175 : vector<28x1xf32>
    %177 = vector.broadcast %176 : vector<28x1xf32> to vector<28x16xf32>
    %178 = arith.mulf %1, %177 : vector<28x16xf32>
    %cst_74 = arith.constant dense<0.000000e+00> : vector<16xf32>
    %179 = vector.multi_reduction <add>, %178, %cst_74 [0] : vector<28x16xf32> to vector<16xf32>
    %180 = vector.shape_cast %179 : vector<16xf32> to vector<1x16xf32>
    %181 = vector.broadcast %180 : vector<1x16xf32> to vector<28x16xf32>
    %182 = arith.mulf %1, %181 : vector<28x16xf32>
    %cst_75 = arith.constant dense<0.000000e+00> : vector<28xf32>
    %183 = vector.multi_reduction <add>, %182, %cst_75 [1] : vector<28x16xf32> to vector<28xf32>
    %184 = vector.shape_cast %183 : vector<28xf32> to vector<28x1xf32>
    %cst_76 = arith.constant 1.000000e-16 : f32
    %185 = vector.broadcast %cst_76 : f32 to vector<28x1xf32>
    %186 = arith.addf %184, %185 : vector<28x1xf32>
    %187 = arith.divf %176, %186 : vector<28x1xf32>
    %188 = vector.extract_strided_slice %72 {offsets = [0, 24], sizes = [28, 8], strides = [1, 1]} : vector<28x32xf32> to vector<28x8xf32>
    %189 = vector.broadcast %187 : vector<28x1xf32> to vector<28x8xf32>
    %190 = arith.mulf %188, %189 : vector<28x8xf32>
    %191 = tpu.concatenate %103, %132, %161, %190 in 1 : vector<28x8xf32>, vector<28x8xf32>, vector<28x8xf32>, vector<28x8xf32> -> vector<28x32xf32>
    %cst_77 = arith.constant dense<0.000000e+00> : vector<16x32xf32>
    %192 = tpu.matmul %3, %191, %cst_77 {dimension_numbers = #tpu.dot_dimension_numbers<[1], [0], [0], [1], [0, 0, 1, 1], [], []>} : vector<16x28xf32>, vector<28x32xf32>, vector<16x32xf32> -> vector<16x32xf32>
    %c0_78 = arith.constant 0 : index
    %c0_79 = arith.constant 0 : index
    %193 = vector.load %arg20[%c0_78, %c0_79] : memref<32x32xf32, #tpu.memory_space<vmem>>, vector<32x32xf32>
    %cst_80 = arith.constant dense<0.000000e+00> : vector<16x32xf32>
    %194 = tpu.matmul %192, %193, %cst_80 {dimension_numbers = #tpu.dot_dimension_numbers<[1], [0], [0], [1], [0, 0, 1, 1], [], []>} : vector<16x32xf32>, vector<32x32xf32>, vector<16x32xf32> -> vector<16x32xf32>
    %c0_81 = arith.constant 0 : index
    %c0_82 = arith.constant 0 : index
    %195 = vector.load %arg21[%c0_81, %c0_82] : memref<1x32xf32, #tpu.memory_space<vmem>>, vector<1x32xf32>
    %196 = vector.broadcast %195 : vector<1x32xf32> to vector<16x32xf32>
    %197 = arith.addf %194, %196 : vector<16x32xf32>
    %cst_83 = arith.constant 0.000000e+00 : f32
    %198 = vector.broadcast %cst_83 : f32 to vector<16x32xf32>
    %199 = arith.maximumf %197, %198 : vector<16x32xf32>
    %c0_84 = arith.constant 0 : index
    %c0_85 = arith.constant 0 : index
    %200 = vector.load %arg22[%c0_84, %c0_85] : memref<32x32xf32, #tpu.memory_space<vmem>>, vector<32x32xf32>
    %cst_86 = arith.constant dense<0.000000e+00> : vector<16x32xf32>
    %201 = tpu.matmul %199, %200, %cst_86 {dimension_numbers = #tpu.dot_dimension_numbers<[1], [0], [0], [1], [0, 0, 1, 1], [], []>} : vector<16x32xf32>, vector<32x32xf32>, vector<16x32xf32> -> vector<16x32xf32>
    %c0_87 = arith.constant 0 : index
    %c0_88 = arith.constant 0 : index
    %202 = vector.load %arg23[%c0_87, %c0_88] : memref<1x32xf32, #tpu.memory_space<vmem>>, vector<1x32xf32>
    %203 = vector.broadcast %202 : vector<1x32xf32> to vector<16x32xf32>
    %204 = arith.addf %201, %203 : vector<16x32xf32>
    %cst_89 = arith.constant 5.000000e-01 : f32
    %205 = vector.broadcast %cst_89 : f32 to vector<16x32xf32>
    %206 = arith.mulf %205, %204 : vector<16x32xf32>
    %207 = arith.mulf %204, %204 : vector<16x32xf32>
    %208 = arith.mulf %204, %207 : vector<16x32xf32>
    %cst_90 = arith.constant 4.471500e-02 : f32
    %209 = vector.broadcast %cst_90 : f32 to vector<16x32xf32>
    %210 = arith.mulf %209, %208 : vector<16x32xf32>
    %211 = arith.addf %204, %210 : vector<16x32xf32>
    %cst_91 = arith.constant 0.797884583 : f32
    %212 = vector.broadcast %cst_91 : f32 to vector<16x32xf32>
    %213 = arith.mulf %212, %211 : vector<16x32xf32>
    %214 = math.tanh %213 : vector<16x32xf32>
    %cst_92 = arith.constant 1.000000e+00 : f32
    %215 = vector.broadcast %cst_92 : f32 to vector<16x32xf32>
    %216 = arith.addf %215, %214 : vector<16x32xf32>
    %217 = arith.mulf %206, %216 : vector<16x32xf32>
    %218 = tpu.concatenate %217, %48 in 1 : vector<16x32xf32>, vector<16x32xf32> -> vector<16x64xf32>
    %cst_93 = arith.constant dense<0.000000e+00> : vector<28x64xf32>
    %219 = tpu.matmul %2, %218, %cst_93 {dimension_numbers = #tpu.dot_dimension_numbers<[1], [0], [0], [1], [0, 0, 1, 1], [], []>} : vector<28x16xf32>, vector<16x64xf32>, vector<28x64xf32> -> vector<28x64xf32>
    %cst_94 = arith.constant dense<0.000000e+00> : vector<28x64xf32>
    %220 = tpu.matmul %1, %218, %cst_94 {dimension_numbers = #tpu.dot_dimension_numbers<[1], [0], [0], [1], [0, 0, 1, 1], [], []>} : vector<28x16xf32>, vector<16x64xf32>, vector<28x64xf32> -> vector<28x64xf32>
    %221 = tpu.concatenate %219, %220, %61 in 1 : vector<28x64xf32>, vector<28x64xf32>, vector<28x32xf32> -> vector<28x160xf32>
    %c0_95 = arith.constant 0 : index
    %c0_96 = arith.constant 0 : index
    %222 = vector.load %arg24[%c0_95, %c0_96] : memref<160x96xf32, #tpu.memory_space<vmem>>, vector<160x96xf32>
    %cst_97 = arith.constant dense<0.000000e+00> : vector<28x96xf32>
    %223 = tpu.matmul %221, %222, %cst_97 {dimension_numbers = #tpu.dot_dimension_numbers<[1], [0], [0], [1], [0, 0, 1, 1], [], []>} : vector<28x160xf32>, vector<160x96xf32>, vector<28x96xf32> -> vector<28x96xf32>
    %c0_98 = arith.constant 0 : index
    %c0_99 = arith.constant 0 : index
    %224 = vector.load %arg25[%c0_98, %c0_99] : memref<1x96xf32, #tpu.memory_space<vmem>>, vector<1x96xf32>
    %225 = vector.broadcast %224 : vector<1x96xf32> to vector<28x96xf32>
    %226 = arith.addf %223, %225 : vector<28x96xf32>
    %227 = vector.extract_strided_slice %226 {offsets = [0, 0], sizes = [28, 32], strides = [1, 1]} : vector<28x96xf32> to vector<28x32xf32>
    %228 = vector.extract_strided_slice %226 {offsets = [0, 32], sizes = [28, 32], strides = [1, 1]} : vector<28x96xf32> to vector<28x32xf32>
    %229 = vector.extract_strided_slice %226 {offsets = [0, 64], sizes = [28, 32], strides = [1, 1]} : vector<28x96xf32> to vector<28x32xf32>
    %230 = arith.mulf %227, %229 : vector<28x32xf32>
    %231 = vector.extract_strided_slice %230 {offsets = [0, 0], sizes = [28, 8], strides = [1, 1]} : vector<28x32xf32> to vector<28x8xf32>
    %cst_100 = arith.constant dense<0.000000e+00> : vector<28xf32>
    %232 = vector.multi_reduction <add>, %231, %cst_100 [1] : vector<28x8xf32> to vector<28xf32>
    %233 = vector.shape_cast %232 : vector<28xf32> to vector<28x1xf32>
    %234 = vector.broadcast %233 : vector<28x1xf32> to vector<28x16xf32>
    %235 = arith.mulf %1, %234 : vector<28x16xf32>
    %236 = arith.subf %235, %7 : vector<28x16xf32>
    %cst_101 = arith.constant dense<0xFF800000> : vector<16xf32>
    %237 = vector.multi_reduction <maximumf>, %236, %cst_101 [0] : vector<28x16xf32> to vector<16xf32>
    %238 = vector.shape_cast %237 : vector<16xf32> to vector<1x16xf32>
    %239 = vector.broadcast %238 : vector<1x16xf32> to vector<28x16xf32>
    %240 = arith.mulf %1, %239 : vector<28x16xf32>
    %241 = arith.subf %240, %7 : vector<28x16xf32>
    %cst_102 = arith.constant dense<0xFF800000> : vector<28xf32>
    %242 = vector.multi_reduction <maximumf>, %241, %cst_102 [1] : vector<28x16xf32> to vector<28xf32>
    %243 = vector.shape_cast %242 : vector<28xf32> to vector<28x1xf32>
    %244 = arith.subf %233, %243 : vector<28x1xf32>
    %245 = math.exp %244 : vector<28x1xf32>
    %246 = vector.broadcast %245 : vector<28x1xf32> to vector<28x16xf32>
    %247 = arith.mulf %1, %246 : vector<28x16xf32>
    %cst_103 = arith.constant dense<0.000000e+00> : vector<16xf32>
    %248 = vector.multi_reduction <add>, %247, %cst_103 [0] : vector<28x16xf32> to vector<16xf32>
    %249 = vector.shape_cast %248 : vector<16xf32> to vector<1x16xf32>
    %250 = vector.broadcast %249 : vector<1x16xf32> to vector<28x16xf32>
    %251 = arith.mulf %1, %250 : vector<28x16xf32>
    %cst_104 = arith.constant dense<0.000000e+00> : vector<28xf32>
    %252 = vector.multi_reduction <add>, %251, %cst_104 [1] : vector<28x16xf32> to vector<28xf32>
    %253 = vector.shape_cast %252 : vector<28xf32> to vector<28x1xf32>
    %cst_105 = arith.constant 1.000000e-16 : f32
    %254 = vector.broadcast %cst_105 : f32 to vector<28x1xf32>
    %255 = arith.addf %253, %254 : vector<28x1xf32>
    %256 = arith.divf %245, %255 : vector<28x1xf32>
    %257 = vector.extract_strided_slice %228 {offsets = [0, 0], sizes = [28, 8], strides = [1, 1]} : vector<28x32xf32> to vector<28x8xf32>
    %258 = vector.broadcast %256 : vector<28x1xf32> to vector<28x8xf32>
    %259 = arith.mulf %257, %258 : vector<28x8xf32>
    %260 = vector.extract_strided_slice %230 {offsets = [0, 8], sizes = [28, 8], strides = [1, 1]} : vector<28x32xf32> to vector<28x8xf32>
    %cst_106 = arith.constant dense<0.000000e+00> : vector<28xf32>
    %261 = vector.multi_reduction <add>, %260, %cst_106 [1] : vector<28x8xf32> to vector<28xf32>
    %262 = vector.shape_cast %261 : vector<28xf32> to vector<28x1xf32>
    %263 = vector.broadcast %262 : vector<28x1xf32> to vector<28x16xf32>
    %264 = arith.mulf %1, %263 : vector<28x16xf32>
    %265 = arith.subf %264, %7 : vector<28x16xf32>
    %cst_107 = arith.constant dense<0xFF800000> : vector<16xf32>
    %266 = vector.multi_reduction <maximumf>, %265, %cst_107 [0] : vector<28x16xf32> to vector<16xf32>
    %267 = vector.shape_cast %266 : vector<16xf32> to vector<1x16xf32>
    %268 = vector.broadcast %267 : vector<1x16xf32> to vector<28x16xf32>
    %269 = arith.mulf %1, %268 : vector<28x16xf32>
    %270 = arith.subf %269, %7 : vector<28x16xf32>
    %cst_108 = arith.constant dense<0xFF800000> : vector<28xf32>
    %271 = vector.multi_reduction <maximumf>, %270, %cst_108 [1] : vector<28x16xf32> to vector<28xf32>
    %272 = vector.shape_cast %271 : vector<28xf32> to vector<28x1xf32>
    %273 = arith.subf %262, %272 : vector<28x1xf32>
    %274 = math.exp %273 : vector<28x1xf32>
    %275 = vector.broadcast %274 : vector<28x1xf32> to vector<28x16xf32>
    %276 = arith.mulf %1, %275 : vector<28x16xf32>
    %cst_109 = arith.constant dense<0.000000e+00> : vector<16xf32>
    %277 = vector.multi_reduction <add>, %276, %cst_109 [0] : vector<28x16xf32> to vector<16xf32>
    %278 = vector.shape_cast %277 : vector<16xf32> to vector<1x16xf32>
    %279 = vector.broadcast %278 : vector<1x16xf32> to vector<28x16xf32>
    %280 = arith.mulf %1, %279 : vector<28x16xf32>
    %cst_110 = arith.constant dense<0.000000e+00> : vector<28xf32>
    %281 = vector.multi_reduction <add>, %280, %cst_110 [1] : vector<28x16xf32> to vector<28xf32>
    %282 = vector.shape_cast %281 : vector<28xf32> to vector<28x1xf32>
    %cst_111 = arith.constant 1.000000e-16 : f32
    %283 = vector.broadcast %cst_111 : f32 to vector<28x1xf32>
    %284 = arith.addf %282, %283 : vector<28x1xf32>
    %285 = arith.divf %274, %284 : vector<28x1xf32>
    %286 = vector.extract_strided_slice %228 {offsets = [0, 8], sizes = [28, 8], strides = [1, 1]} : vector<28x32xf32> to vector<28x8xf32>
    %287 = vector.broadcast %285 : vector<28x1xf32> to vector<28x8xf32>
    %288 = arith.mulf %286, %287 : vector<28x8xf32>
    %289 = vector.extract_strided_slice %230 {offsets = [0, 16], sizes = [28, 8], strides = [1, 1]} : vector<28x32xf32> to vector<28x8xf32>
    %cst_112 = arith.constant dense<0.000000e+00> : vector<28xf32>
    %290 = vector.multi_reduction <add>, %289, %cst_112 [1] : vector<28x8xf32> to vector<28xf32>
    %291 = vector.shape_cast %290 : vector<28xf32> to vector<28x1xf32>
    %292 = vector.broadcast %291 : vector<28x1xf32> to vector<28x16xf32>
    %293 = arith.mulf %1, %292 : vector<28x16xf32>
    %294 = arith.subf %293, %7 : vector<28x16xf32>
    %cst_113 = arith.constant dense<0xFF800000> : vector<16xf32>
    %295 = vector.multi_reduction <maximumf>, %294, %cst_113 [0] : vector<28x16xf32> to vector<16xf32>
    %296 = vector.shape_cast %295 : vector<16xf32> to vector<1x16xf32>
    %297 = vector.broadcast %296 : vector<1x16xf32> to vector<28x16xf32>
    %298 = arith.mulf %1, %297 : vector<28x16xf32>
    %299 = arith.subf %298, %7 : vector<28x16xf32>
    %cst_114 = arith.constant dense<0xFF800000> : vector<28xf32>
    %300 = vector.multi_reduction <maximumf>, %299, %cst_114 [1] : vector<28x16xf32> to vector<28xf32>
    %301 = vector.shape_cast %300 : vector<28xf32> to vector<28x1xf32>
    %302 = arith.subf %291, %301 : vector<28x1xf32>
    %303 = math.exp %302 : vector<28x1xf32>
    %304 = vector.broadcast %303 : vector<28x1xf32> to vector<28x16xf32>
    %305 = arith.mulf %1, %304 : vector<28x16xf32>
    %cst_115 = arith.constant dense<0.000000e+00> : vector<16xf32>
    %306 = vector.multi_reduction <add>, %305, %cst_115 [0] : vector<28x16xf32> to vector<16xf32>
    %307 = vector.shape_cast %306 : vector<16xf32> to vector<1x16xf32>
    %308 = vector.broadcast %307 : vector<1x16xf32> to vector<28x16xf32>
    %309 = arith.mulf %1, %308 : vector<28x16xf32>
    %cst_116 = arith.constant dense<0.000000e+00> : vector<28xf32>
    %310 = vector.multi_reduction <add>, %309, %cst_116 [1] : vector<28x16xf32> to vector<28xf32>
    %311 = vector.shape_cast %310 : vector<28xf32> to vector<28x1xf32>
    %cst_117 = arith.constant 1.000000e-16 : f32
    %312 = vector.broadcast %cst_117 : f32 to vector<28x1xf32>
    %313 = arith.addf %311, %312 : vector<28x1xf32>
    %314 = arith.divf %303, %313 : vector<28x1xf32>
    %315 = vector.extract_strided_slice %228 {offsets = [0, 16], sizes = [28, 8], strides = [1, 1]} : vector<28x32xf32> to vector<28x8xf32>
    %316 = vector.broadcast %314 : vector<28x1xf32> to vector<28x8xf32>
    %317 = arith.mulf %315, %316 : vector<28x8xf32>
    %318 = vector.extract_strided_slice %230 {offsets = [0, 24], sizes = [28, 8], strides = [1, 1]} : vector<28x32xf32> to vector<28x8xf32>
    %cst_118 = arith.constant dense<0.000000e+00> : vector<28xf32>
    %319 = vector.multi_reduction <add>, %318, %cst_118 [1] : vector<28x8xf32> to vector<28xf32>
    %320 = vector.shape_cast %319 : vector<28xf32> to vector<28x1xf32>
    %321 = vector.broadcast %320 : vector<28x1xf32> to vector<28x16xf32>
    %322 = arith.mulf %1, %321 : vector<28x16xf32>
    %323 = arith.subf %322, %7 : vector<28x16xf32>
    %cst_119 = arith.constant dense<0xFF800000> : vector<16xf32>
    %324 = vector.multi_reduction <maximumf>, %323, %cst_119 [0] : vector<28x16xf32> to vector<16xf32>
    %325 = vector.shape_cast %324 : vector<16xf32> to vector<1x16xf32>
    %326 = vector.broadcast %325 : vector<1x16xf32> to vector<28x16xf32>
    %327 = arith.mulf %1, %326 : vector<28x16xf32>
    %328 = arith.subf %327, %7 : vector<28x16xf32>
    %cst_120 = arith.constant dense<0xFF800000> : vector<28xf32>
    %329 = vector.multi_reduction <maximumf>, %328, %cst_120 [1] : vector<28x16xf32> to vector<28xf32>
    %330 = vector.shape_cast %329 : vector<28xf32> to vector<28x1xf32>
    %331 = arith.subf %320, %330 : vector<28x1xf32>
    %332 = math.exp %331 : vector<28x1xf32>
    %333 = vector.broadcast %332 : vector<28x1xf32> to vector<28x16xf32>
    %334 = arith.mulf %1, %333 : vector<28x16xf32>
    %cst_121 = arith.constant dense<0.000000e+00> : vector<16xf32>
    %335 = vector.multi_reduction <add>, %334, %cst_121 [0] : vector<28x16xf32> to vector<16xf32>
    %336 = vector.shape_cast %335 : vector<16xf32> to vector<1x16xf32>
    %337 = vector.broadcast %336 : vector<1x16xf32> to vector<28x16xf32>
    %338 = arith.mulf %1, %337 : vector<28x16xf32>
    %cst_122 = arith.constant dense<0.000000e+00> : vector<28xf32>
    %339 = vector.multi_reduction <add>, %338, %cst_122 [1] : vector<28x16xf32> to vector<28xf32>
    %340 = vector.shape_cast %339 : vector<28xf32> to vector<28x1xf32>
    %cst_123 = arith.constant 1.000000e-16 : f32
    %341 = vector.broadcast %cst_123 : f32 to vector<28x1xf32>
    %342 = arith.addf %340, %341 : vector<28x1xf32>
    %343 = arith.divf %332, %342 : vector<28x1xf32>
    %344 = vector.extract_strided_slice %228 {offsets = [0, 24], sizes = [28, 8], strides = [1, 1]} : vector<28x32xf32> to vector<28x8xf32>
    %345 = vector.broadcast %343 : vector<28x1xf32> to vector<28x8xf32>
    %346 = arith.mulf %344, %345 : vector<28x8xf32>
    %347 = tpu.concatenate %259, %288, %317, %346 in 1 : vector<28x8xf32>, vector<28x8xf32>, vector<28x8xf32>, vector<28x8xf32> -> vector<28x32xf32>
    %cst_124 = arith.constant dense<0.000000e+00> : vector<16x32xf32>
    %348 = tpu.matmul %3, %347, %cst_124 {dimension_numbers = #tpu.dot_dimension_numbers<[1], [0], [0], [1], [0, 0, 1, 1], [], []>} : vector<16x28xf32>, vector<28x32xf32>, vector<16x32xf32> -> vector<16x32xf32>
    %c0_125 = arith.constant 0 : index
    %c0_126 = arith.constant 0 : index
    %349 = vector.load %arg26[%c0_125, %c0_126] : memref<32x32xf32, #tpu.memory_space<vmem>>, vector<32x32xf32>
    %cst_127 = arith.constant dense<0.000000e+00> : vector<16x32xf32>
    %350 = tpu.matmul %348, %349, %cst_127 {dimension_numbers = #tpu.dot_dimension_numbers<[1], [0], [0], [1], [0, 0, 1, 1], [], []>} : vector<16x32xf32>, vector<32x32xf32>, vector<16x32xf32> -> vector<16x32xf32>
    %c0_128 = arith.constant 0 : index
    %c0_129 = arith.constant 0 : index
    %351 = vector.load %arg27[%c0_128, %c0_129] : memref<1x32xf32, #tpu.memory_space<vmem>>, vector<1x32xf32>
    %352 = vector.broadcast %351 : vector<1x32xf32> to vector<16x32xf32>
    %353 = arith.addf %350, %352 : vector<16x32xf32>
    %cst_130 = arith.constant 0.000000e+00 : f32
    %354 = vector.broadcast %cst_130 : f32 to vector<16x32xf32>
    %355 = arith.maximumf %353, %354 : vector<16x32xf32>
    %c0_131 = arith.constant 0 : index
    %c0_132 = arith.constant 0 : index
    %356 = vector.load %arg28[%c0_131, %c0_132] : memref<32x32xf32, #tpu.memory_space<vmem>>, vector<32x32xf32>
    %cst_133 = arith.constant dense<0.000000e+00> : vector<16x32xf32>
    %357 = tpu.matmul %355, %356, %cst_133 {dimension_numbers = #tpu.dot_dimension_numbers<[1], [0], [0], [1], [0, 0, 1, 1], [], []>} : vector<16x32xf32>, vector<32x32xf32>, vector<16x32xf32> -> vector<16x32xf32>
    %c0_134 = arith.constant 0 : index
    %c0_135 = arith.constant 0 : index
    %358 = vector.load %arg29[%c0_134, %c0_135] : memref<1x32xf32, #tpu.memory_space<vmem>>, vector<1x32xf32>
    %359 = vector.broadcast %358 : vector<1x32xf32> to vector<16x32xf32>
    %360 = arith.addf %357, %359 : vector<16x32xf32>
    %cst_136 = arith.constant 5.000000e-01 : f32
    %361 = vector.broadcast %cst_136 : f32 to vector<16x32xf32>
    %362 = arith.mulf %361, %360 : vector<16x32xf32>
    %363 = arith.mulf %360, %360 : vector<16x32xf32>
    %364 = arith.mulf %360, %363 : vector<16x32xf32>
    %cst_137 = arith.constant 4.471500e-02 : f32
    %365 = vector.broadcast %cst_137 : f32 to vector<16x32xf32>
    %366 = arith.mulf %365, %364 : vector<16x32xf32>
    %367 = arith.addf %360, %366 : vector<16x32xf32>
    %cst_138 = arith.constant 0.797884583 : f32
    %368 = vector.broadcast %cst_138 : f32 to vector<16x32xf32>
    %369 = arith.mulf %368, %367 : vector<16x32xf32>
    %370 = math.tanh %369 : vector<16x32xf32>
    %cst_139 = arith.constant 1.000000e+00 : f32
    %371 = vector.broadcast %cst_139 : f32 to vector<16x32xf32>
    %372 = arith.addf %371, %370 : vector<16x32xf32>
    %373 = arith.mulf %362, %372 : vector<16x32xf32>
    %374 = tpu.concatenate %29, %373 in 1 : vector<16x32xf32>, vector<16x32xf32> -> vector<16x64xf32>
    %c0_140 = arith.constant 0 : index
    %c0_141 = arith.constant 0 : index
    %375 = vector.load %arg30[%c0_140, %c0_141] : memref<64x32xf32, #tpu.memory_space<vmem>>, vector<64x32xf32>
    %cst_142 = arith.constant dense<0.000000e+00> : vector<16x32xf32>
    %376 = tpu.matmul %374, %375, %cst_142 {dimension_numbers = #tpu.dot_dimension_numbers<[1], [0], [0], [1], [0, 0, 1, 1], [], []>} : vector<16x64xf32>, vector<64x32xf32>, vector<16x32xf32> -> vector<16x32xf32>
    %c0_143 = arith.constant 0 : index
    %c0_144 = arith.constant 0 : index
    %377 = vector.load %arg31[%c0_143, %c0_144] : memref<1x32xf32, #tpu.memory_space<vmem>>, vector<1x32xf32>
    %378 = vector.broadcast %377 : vector<1x32xf32> to vector<16x32xf32>
    %379 = arith.addf %376, %378 : vector<16x32xf32>
    %cst_145 = arith.constant 5.000000e-01 : f32
    %380 = vector.broadcast %cst_145 : f32 to vector<16x32xf32>
    %381 = arith.mulf %380, %379 : vector<16x32xf32>
    %382 = arith.mulf %379, %379 : vector<16x32xf32>
    %383 = arith.mulf %379, %382 : vector<16x32xf32>
    %cst_146 = arith.constant 4.471500e-02 : f32
    %384 = vector.broadcast %cst_146 : f32 to vector<16x32xf32>
    %385 = arith.mulf %384, %383 : vector<16x32xf32>
    %386 = arith.addf %379, %385 : vector<16x32xf32>
    %cst_147 = arith.constant 0.797884583 : f32
    %387 = vector.broadcast %cst_147 : f32 to vector<16x32xf32>
    %388 = arith.mulf %387, %386 : vector<16x32xf32>
    %389 = math.tanh %388 : vector<16x32xf32>
    %cst_148 = arith.constant 1.000000e+00 : f32
    %390 = vector.broadcast %cst_148 : f32 to vector<16x32xf32>
    %391 = arith.addf %390, %389 : vector<16x32xf32>
    %392 = arith.mulf %381, %391 : vector<16x32xf32>
    %c0_149 = arith.constant 0 : index
    %c0_150 = arith.constant 0 : index
    %393 = vector.load %arg32[%c0_149, %c0_150] : memref<32x32xf32, #tpu.memory_space<vmem>>, vector<32x32xf32>
    %cst_151 = arith.constant dense<0.000000e+00> : vector<2x32xf32>
    %394 = tpu.matmul %0, %393, %cst_151 {dimension_numbers = #tpu.dot_dimension_numbers<[1], [0], [0], [1], [0, 0, 1, 1], [], []>} : vector<2x32xf32>, vector<32x32xf32>, vector<2x32xf32> -> vector<2x32xf32>
    %c0_152 = arith.constant 0 : index
    %c0_153 = arith.constant 0 : index
    %395 = vector.load %arg33[%c0_152, %c0_153] : memref<1x32xf32, #tpu.memory_space<vmem>>, vector<1x32xf32>
    %396 = vector.broadcast %395 : vector<1x32xf32> to vector<2x32xf32>
    %397 = arith.addf %394, %396 : vector<2x32xf32>
    %c0_154 = arith.constant 0 : index
    %c0_155 = arith.constant 0 : index
    %398 = vector.load %arg34[%c0_154, %c0_155] : memref<32x64xf32, #tpu.memory_space<vmem>>, vector<32x64xf32>
    %cst_156 = arith.constant dense<0.000000e+00> : vector<16x64xf32>
    %399 = tpu.matmul %392, %398, %cst_156 {dimension_numbers = #tpu.dot_dimension_numbers<[1], [0], [0], [1], [0, 0, 1, 1], [], []>} : vector<16x32xf32>, vector<32x64xf32>, vector<16x64xf32> -> vector<16x64xf32>
    %c0_157 = arith.constant 0 : index
    %c0_158 = arith.constant 0 : index
    %400 = vector.load %arg35[%c0_157, %c0_158] : memref<1x64xf32, #tpu.memory_space<vmem>>, vector<1x64xf32>
    %401 = vector.broadcast %400 : vector<1x64xf32> to vector<16x64xf32>
    %402 = arith.addf %399, %401 : vector<16x64xf32>
    %c0_159 = arith.constant 0 : index
    %c0_160 = arith.constant 0 : index
    %403 = vector.load %arg9[%c0_159, %c0_160] : memref<8x2xf32, #tpu.memory_space<vmem>>, vector<8x2xf32>
    %404 = vector.extract_strided_slice %402 {offsets = [0, 0], sizes = [8, 32], strides = [1, 1]} : vector<16x64xf32> to vector<8x32xf32>
    %405 = vector.extract_strided_slice %402 {offsets = [0, 32], sizes = [8, 32], strides = [1, 1]} : vector<16x64xf32> to vector<8x32xf32>
    %406 = vector.extract_strided_slice %397 {offsets = [0, 0], sizes = [1, 32], strides = [1, 1]} : vector<2x32xf32> to vector<1x32xf32>
    %407 = vector.extract_strided_slice %403 {offsets = [0, 0], sizes = [8, 1], strides = [1, 1]} : vector<8x2xf32> to vector<8x1xf32>
    %408 = vector.extract_strided_slice %404 {offsets = [0, 0], sizes = [8, 16], strides = [1, 1]} : vector<8x32xf32> to vector<8x16xf32>
    %409 = vector.extract_strided_slice %406 {offsets = [0, 0], sizes = [1, 16], strides = [1, 1]} : vector<1x32xf32> to vector<1x16xf32>
    %410 = vector.broadcast %409 : vector<1x16xf32> to vector<8x16xf32>
    %411 = arith.mulf %408, %410 : vector<8x16xf32>
    %cst_161 = arith.constant dense<0.000000e+00> : vector<8xf32>
    %412 = vector.multi_reduction <add>, %411, %cst_161 [1] : vector<8x16xf32> to vector<8xf32>
    %413 = vector.shape_cast %412 : vector<8xf32> to vector<8x1xf32>
    %cst_162 = arith.constant 2.500000e-01 : f32
    %414 = vector.broadcast %cst_162 : f32 to vector<8x1xf32>
    %415 = arith.mulf %413, %414 : vector<8x1xf32>
    %416 = arith.addf %415, %407 : vector<8x1xf32>
    %cst_163 = arith.constant dense<0xFF800000> : vector<1xf32>
    %417 = vector.multi_reduction <maximumf>, %416, %cst_163 [0] : vector<8x1xf32> to vector<1xf32>
    %418 = vector.shape_cast %417 : vector<1xf32> to vector<1x1xf32>
    %419 = vector.broadcast %418 : vector<1x1xf32> to vector<8x1xf32>
    %420 = arith.subf %416, %419 : vector<8x1xf32>
    %421 = math.exp %420 : vector<8x1xf32>
    %cst_164 = arith.constant dense<0.000000e+00> : vector<1xf32>
    %422 = vector.multi_reduction <add>, %421, %cst_164 [0] : vector<8x1xf32> to vector<1xf32>
    %423 = vector.shape_cast %422 : vector<1xf32> to vector<1x1xf32>
    %424 = vector.broadcast %423 : vector<1x1xf32> to vector<8x1xf32>
    %425 = arith.divf %421, %424 : vector<8x1xf32>
    %426 = vector.extract_strided_slice %405 {offsets = [0, 0], sizes = [8, 16], strides = [1, 1]} : vector<8x32xf32> to vector<8x16xf32>
    %427 = vector.broadcast %425 : vector<8x1xf32> to vector<8x16xf32>
    %428 = arith.mulf %426, %427 : vector<8x16xf32>
    %cst_165 = arith.constant dense<0.000000e+00> : vector<16xf32>
    %429 = vector.multi_reduction <add>, %428, %cst_165 [0] : vector<8x16xf32> to vector<16xf32>
    %430 = vector.shape_cast %429 : vector<16xf32> to vector<1x16xf32>
    %431 = vector.extract_strided_slice %404 {offsets = [0, 16], sizes = [8, 16], strides = [1, 1]} : vector<8x32xf32> to vector<8x16xf32>
    %432 = vector.extract_strided_slice %406 {offsets = [0, 16], sizes = [1, 16], strides = [1, 1]} : vector<1x32xf32> to vector<1x16xf32>
    %433 = vector.broadcast %432 : vector<1x16xf32> to vector<8x16xf32>
    %434 = arith.mulf %431, %433 : vector<8x16xf32>
    %cst_166 = arith.constant dense<0.000000e+00> : vector<8xf32>
    %435 = vector.multi_reduction <add>, %434, %cst_166 [1] : vector<8x16xf32> to vector<8xf32>
    %436 = vector.shape_cast %435 : vector<8xf32> to vector<8x1xf32>
    %cst_167 = arith.constant 2.500000e-01 : f32
    %437 = vector.broadcast %cst_167 : f32 to vector<8x1xf32>
    %438 = arith.mulf %436, %437 : vector<8x1xf32>
    %439 = arith.addf %438, %407 : vector<8x1xf32>
    %cst_168 = arith.constant dense<0xFF800000> : vector<1xf32>
    %440 = vector.multi_reduction <maximumf>, %439, %cst_168 [0] : vector<8x1xf32> to vector<1xf32>
    %441 = vector.shape_cast %440 : vector<1xf32> to vector<1x1xf32>
    %442 = vector.broadcast %441 : vector<1x1xf32> to vector<8x1xf32>
    %443 = arith.subf %439, %442 : vector<8x1xf32>
    %444 = math.exp %443 : vector<8x1xf32>
    %cst_169 = arith.constant dense<0.000000e+00> : vector<1xf32>
    %445 = vector.multi_reduction <add>, %444, %cst_169 [0] : vector<8x1xf32> to vector<1xf32>
    %446 = vector.shape_cast %445 : vector<1xf32> to vector<1x1xf32>
    %447 = vector.broadcast %446 : vector<1x1xf32> to vector<8x1xf32>
    %448 = arith.divf %444, %447 : vector<8x1xf32>
    %449 = vector.extract_strided_slice %405 {offsets = [0, 16], sizes = [8, 16], strides = [1, 1]} : vector<8x32xf32> to vector<8x16xf32>
    %450 = vector.broadcast %448 : vector<8x1xf32> to vector<8x16xf32>
    %451 = arith.mulf %449, %450 : vector<8x16xf32>
    %cst_170 = arith.constant dense<0.000000e+00> : vector<16xf32>
    %452 = vector.multi_reduction <add>, %451, %cst_170 [0] : vector<8x16xf32> to vector<16xf32>
    %453 = vector.shape_cast %452 : vector<16xf32> to vector<1x16xf32>
    %454 = vector.extract_strided_slice %392 {offsets = [0, 0], sizes = [1, 32], strides = [1, 1]} : vector<16x32xf32> to vector<1x32xf32>
    %455 = tpu.concatenate %430, %453, %454 in 1 : vector<1x16xf32>, vector<1x16xf32>, vector<1x32xf32> -> vector<1x64xf32>
    %456 = vector.extract_strided_slice %402 {offsets = [8, 0], sizes = [8, 32], strides = [1, 1]} : vector<16x64xf32> to vector<8x32xf32>
    %457 = vector.extract_strided_slice %402 {offsets = [8, 32], sizes = [8, 32], strides = [1, 1]} : vector<16x64xf32> to vector<8x32xf32>
    %458 = vector.extract_strided_slice %397 {offsets = [1, 0], sizes = [1, 32], strides = [1, 1]} : vector<2x32xf32> to vector<1x32xf32>
    %459 = vector.extract_strided_slice %403 {offsets = [0, 1], sizes = [8, 1], strides = [1, 1]} : vector<8x2xf32> to vector<8x1xf32>
    %460 = vector.extract_strided_slice %456 {offsets = [0, 0], sizes = [8, 16], strides = [1, 1]} : vector<8x32xf32> to vector<8x16xf32>
    %461 = vector.extract_strided_slice %458 {offsets = [0, 0], sizes = [1, 16], strides = [1, 1]} : vector<1x32xf32> to vector<1x16xf32>
    %462 = vector.broadcast %461 : vector<1x16xf32> to vector<8x16xf32>
    %463 = arith.mulf %460, %462 : vector<8x16xf32>
    %cst_171 = arith.constant dense<0.000000e+00> : vector<8xf32>
    %464 = vector.multi_reduction <add>, %463, %cst_171 [1] : vector<8x16xf32> to vector<8xf32>
    %465 = vector.shape_cast %464 : vector<8xf32> to vector<8x1xf32>
    %cst_172 = arith.constant 2.500000e-01 : f32
    %466 = vector.broadcast %cst_172 : f32 to vector<8x1xf32>
    %467 = arith.mulf %465, %466 : vector<8x1xf32>
    %468 = arith.addf %467, %459 : vector<8x1xf32>
    %cst_173 = arith.constant dense<0xFF800000> : vector<1xf32>
    %469 = vector.multi_reduction <maximumf>, %468, %cst_173 [0] : vector<8x1xf32> to vector<1xf32>
    %470 = vector.shape_cast %469 : vector<1xf32> to vector<1x1xf32>
    %471 = vector.broadcast %470 : vector<1x1xf32> to vector<8x1xf32>
    %472 = arith.subf %468, %471 : vector<8x1xf32>
    %473 = math.exp %472 : vector<8x1xf32>
    %cst_174 = arith.constant dense<0.000000e+00> : vector<1xf32>
    %474 = vector.multi_reduction <add>, %473, %cst_174 [0] : vector<8x1xf32> to vector<1xf32>
    %475 = vector.shape_cast %474 : vector<1xf32> to vector<1x1xf32>
    %476 = vector.broadcast %475 : vector<1x1xf32> to vector<8x1xf32>
    %477 = arith.divf %473, %476 : vector<8x1xf32>
    %478 = vector.extract_strided_slice %457 {offsets = [0, 0], sizes = [8, 16], strides = [1, 1]} : vector<8x32xf32> to vector<8x16xf32>
    %479 = vector.broadcast %477 : vector<8x1xf32> to vector<8x16xf32>
    %480 = arith.mulf %478, %479 : vector<8x16xf32>
    %cst_175 = arith.constant dense<0.000000e+00> : vector<16xf32>
    %481 = vector.multi_reduction <add>, %480, %cst_175 [0] : vector<8x16xf32> to vector<16xf32>
    %482 = vector.shape_cast %481 : vector<16xf32> to vector<1x16xf32>
    %483 = vector.extract_strided_slice %456 {offsets = [0, 16], sizes = [8, 16], strides = [1, 1]} : vector<8x32xf32> to vector<8x16xf32>
    %484 = vector.extract_strided_slice %458 {offsets = [0, 16], sizes = [1, 16], strides = [1, 1]} : vector<1x32xf32> to vector<1x16xf32>
    %485 = vector.broadcast %484 : vector<1x16xf32> to vector<8x16xf32>
    %486 = arith.mulf %483, %485 : vector<8x16xf32>
    %cst_176 = arith.constant dense<0.000000e+00> : vector<8xf32>
    %487 = vector.multi_reduction <add>, %486, %cst_176 [1] : vector<8x16xf32> to vector<8xf32>
    %488 = vector.shape_cast %487 : vector<8xf32> to vector<8x1xf32>
    %cst_177 = arith.constant 2.500000e-01 : f32
    %489 = vector.broadcast %cst_177 : f32 to vector<8x1xf32>
    %490 = arith.mulf %488, %489 : vector<8x1xf32>
    %491 = arith.addf %490, %459 : vector<8x1xf32>
    %cst_178 = arith.constant dense<0xFF800000> : vector<1xf32>
    %492 = vector.multi_reduction <maximumf>, %491, %cst_178 [0] : vector<8x1xf32> to vector<1xf32>
    %493 = vector.shape_cast %492 : vector<1xf32> to vector<1x1xf32>
    %494 = vector.broadcast %493 : vector<1x1xf32> to vector<8x1xf32>
    %495 = arith.subf %491, %494 : vector<8x1xf32>
    %496 = math.exp %495 : vector<8x1xf32>
    %cst_179 = arith.constant dense<0.000000e+00> : vector<1xf32>
    %497 = vector.multi_reduction <add>, %496, %cst_179 [0] : vector<8x1xf32> to vector<1xf32>
    %498 = vector.shape_cast %497 : vector<1xf32> to vector<1x1xf32>
    %499 = vector.broadcast %498 : vector<1x1xf32> to vector<8x1xf32>
    %500 = arith.divf %496, %499 : vector<8x1xf32>
    %501 = vector.extract_strided_slice %457 {offsets = [0, 16], sizes = [8, 16], strides = [1, 1]} : vector<8x32xf32> to vector<8x16xf32>
    %502 = vector.broadcast %500 : vector<8x1xf32> to vector<8x16xf32>
    %503 = arith.mulf %501, %502 : vector<8x16xf32>
    %cst_180 = arith.constant dense<0.000000e+00> : vector<16xf32>
    %504 = vector.multi_reduction <add>, %503, %cst_180 [0] : vector<8x16xf32> to vector<16xf32>
    %505 = vector.shape_cast %504 : vector<16xf32> to vector<1x16xf32>
    %506 = vector.extract_strided_slice %392 {offsets = [8, 0], sizes = [1, 32], strides = [1, 1]} : vector<16x32xf32> to vector<1x32xf32>
    %507 = tpu.concatenate %482, %505, %506 in 1 : vector<1x16xf32>, vector<1x16xf32>, vector<1x32xf32> -> vector<1x64xf32>
    %508 = tpu.concatenate %455, %507 in 0 : vector<1x64xf32>, vector<1x64xf32> -> vector<2x64xf32>
    %c0_181 = arith.constant 0 : index
    %c0_182 = arith.constant 0 : index
    %509 = vector.load %arg36[%c0_181, %c0_182] : memref<32x1xf32, #tpu.memory_space<vmem>>, vector<32x1xf32>
    %cst_183 = arith.constant dense<0.000000e+00> : vector<2x1xf32>
    %510 = tpu.matmul %0, %509, %cst_183 {dimension_numbers = #tpu.dot_dimension_numbers<[1], [0], [0], [1], [0, 0, 1, 1], [], []>} : vector<2x32xf32>, vector<32x1xf32>, vector<2x1xf32> -> vector<2x1xf32>
    %c0_184 = arith.constant 0 : index
    %c0_185 = arith.constant 0 : index
    %511 = vector.load %arg37[%c0_184, %c0_185] : memref<1x1xf32, #tpu.memory_space<vmem>>, vector<1x1xf32>
    %512 = vector.broadcast %511 : vector<1x1xf32> to vector<2x1xf32>
    %513 = arith.addf %510, %512 : vector<2x1xf32>
    %c0_186 = arith.constant 0 : index
    %c0_187 = arith.constant 0 : index
    %514 = vector.load %arg38[%c0_186, %c0_187] : memref<64x1xf32, #tpu.memory_space<vmem>>, vector<64x1xf32>
    %cst_188 = arith.constant dense<0.000000e+00> : vector<2x1xf32>
    %515 = tpu.matmul %508, %514, %cst_188 {dimension_numbers = #tpu.dot_dimension_numbers<[1], [0], [0], [1], [0, 0, 1, 1], [], []>} : vector<2x64xf32>, vector<64x1xf32>, vector<2x1xf32> -> vector<2x1xf32>
    %c0_189 = arith.constant 0 : index
    %c0_190 = arith.constant 0 : index
    %516 = vector.load %arg39[%c0_189, %c0_190] : memref<1x1xf32, #tpu.memory_space<vmem>>, vector<1x1xf32>
    %517 = vector.broadcast %516 : vector<1x1xf32> to vector<2x1xf32>
    %518 = arith.addf %515, %517 : vector<2x1xf32>
    %c0_191 = arith.constant 0 : index
    %c0_192 = arith.constant 0 : index
    %519 = vector.load %arg41[%c0_191, %c0_192] : memref<2x1xf32, #tpu.memory_space<vmem>>, vector<2x1xf32>
    tpu.vector_store %arg41[%c0_191, %c0_192], %513 {strides = array<i32>} : memref<2x1xf32, #tpu.memory_space<vmem>>, vector<2x1xf32>,
    %c0_193 = arith.constant 0 : index
    %c0_194 = arith.constant 0 : index
    %520 = vector.load %arg42[%c0_193, %c0_194] : memref<2x1xf32, #tpu.memory_space<vmem>>, vector<2x1xf32>
    tpu.vector_store %arg42[%c0_193, %c0_194], %518 {strides = array<i32>} : memref<2x1xf32, #tpu.memory_space<vmem>>, vector<2x1xf32>,
    %521 = arith.addf %513, %518 : vector<2x1xf32>
    %c0_195 = arith.constant 0 : index
    %c0_196 = arith.constant 0 : index
    %522 = vector.load %arg40[%c0_195, %c0_196] : memref<2x1xf32, #tpu.memory_space<vmem>>, vector<2x1xf32>
    tpu.vector_store %arg40[%c0_195, %c0_196], %521 {strides = array<i32>} : memref<2x1xf32, #tpu.memory_space<vmem>>, vector<2x1xf32>,
    return
  }
  func.func @transform_0(%arg0: i32) -> (i32, i32) {
    %c0_i32 = arith.constant 0 : i32
    %c0_i32_0 = arith.constant 0 : i32
    %c0_i32_1 = arith.constant 0 : i32
    return %c0_i32, %c0_i32_0 : i32, i32
  }
  func.func @transform_1(%arg0: i32) -> (i32, i32) {
    %c0_i32 = arith.constant 0 : i32
    %c0_i32_0 = arith.constant 0 : i32
    %c0_i32_1 = arith.constant 0 : i32
    return %c0_i32, %c0_i32_0 : i32, i32
  }
  func.func @transform_2(%arg0: i32) -> (i32, i32) {
    %c0_i32 = arith.constant 0 : i32
    %c0_i32_0 = arith.constant 0 : i32
    %c0_i32_1 = arith.constant 0 : i32
    return %c0_i32, %c0_i32_0 : i32, i32
  }
  func.func @transform_3(%arg0: i32) -> (i32, i32) {
    %c0_i32 = arith.constant 0 : i32
    %c0_i32_0 = arith.constant 0 : i32
    %c0_i32_1 = arith.constant 0 : i32
    return %c0_i32, %c0_i32_0 : i32, i32
  }
  func.func @transform_4(%arg0: i32) -> (i32, i32) {
    %c0_i32 = arith.constant 0 : i32
    %c0_i32_0 = arith.constant 0 : i32
    %c0_i32_1 = arith.constant 0 : i32
    return %c0_i32, %c0_i32_0 : i32, i32
  }
  func.func @transform_5(%arg0: i32) -> (i32, i32) {
    %c0_i32 = arith.constant 0 : i32
    %c0_i32_0 = arith.constant 0 : i32
    %c0_i32_1 = arith.constant 0 : i32
    return %c0_i32, %c0_i32_0 : i32, i32
  }
  func.func @transform_6(%arg0: i32) -> (i32, i32) {
    %c0_i32 = arith.constant 0 : i32
    %c0_i32_0 = arith.constant 0 : i32
    %c0_i32_1 = arith.constant 0 : i32
    return %c0_i32, %c0_i32_0 : i32, i32
  }
  func.func @transform_7(%arg0: i32) -> (i32, i32) {
    %c0_i32 = arith.constant 0 : i32
    %c0_i32_0 = arith.constant 0 : i32
    %c0_i32_1 = arith.constant 0 : i32
    return %c0_i32, %c0_i32_0 : i32, i32
  }
  func.func @transform_8(%arg0: i32) -> (i32, i32) {
    %c0_i32 = arith.constant 0 : i32
    %c0_i32_0 = arith.constant 0 : i32
    %c0_i32_1 = arith.constant 0 : i32
    return %c0_i32, %c0_i32_0 : i32, i32
  }
  func.func @transform_9(%arg0: i32) -> (i32, i32) {
    %c0_i32 = arith.constant 0 : i32
    %c0_i32_0 = arith.constant 0 : i32
    %c0_i32_1 = arith.constant 0 : i32
    return %c0_i32, %c0_i32_0 : i32, i32
  }
  func.func @transform_10(%arg0: i32) -> (i32, i32) {
    %c0_i32 = arith.constant 0 : i32
    %c0_i32_0 = arith.constant 0 : i32
    %c0_i32_1 = arith.constant 0 : i32
    return %c0_i32, %c0_i32_0 : i32, i32
  }
  func.func @transform_11(%arg0: i32) -> (i32, i32) {
    %c0_i32 = arith.constant 0 : i32
    %c0_i32_0 = arith.constant 0 : i32
    %c0_i32_1 = arith.constant 0 : i32
    return %c0_i32, %c0_i32_0 : i32, i32
  }
  func.func @transform_12(%arg0: i32) -> (i32, i32) {
    %c0_i32 = arith.constant 0 : i32
    %c0_i32_0 = arith.constant 0 : i32
    %c0_i32_1 = arith.constant 0 : i32
    return %c0_i32, %c0_i32_0 : i32, i32
  }
  func.func @transform_13(%arg0: i32) -> (i32, i32) {
    %c0_i32 = arith.constant 0 : i32
    %c0_i32_0 = arith.constant 0 : i32
    %c0_i32_1 = arith.constant 0 : i32
    return %c0_i32, %c0_i32_0 : i32, i32
  }
  func.func @transform_14(%arg0: i32) -> (i32, i32) {
    %c0_i32 = arith.constant 0 : i32
    %c0_i32_0 = arith.constant 0 : i32
    %c0_i32_1 = arith.constant 0 : i32
    return %c0_i32, %c0_i32_0 : i32, i32
  }
  func.func @transform_15(%arg0: i32) -> (i32, i32) {
    %c0_i32 = arith.constant 0 : i32
    %c0_i32_0 = arith.constant 0 : i32
    %c0_i32_1 = arith.constant 0 : i32
    return %c0_i32, %c0_i32_0 : i32, i32
  }
  func.func @transform_16(%arg0: i32) -> (i32, i32) {
    %c0_i32 = arith.constant 0 : i32
    %c0_i32_0 = arith.constant 0 : i32
    %c0_i32_1 = arith.constant 0 : i32
    return %c0_i32, %c0_i32_0 : i32, i32
  }
  func.func @transform_17(%arg0: i32) -> (i32, i32) {
    %c0_i32 = arith.constant 0 : i32
    %c0_i32_0 = arith.constant 0 : i32
    %c0_i32_1 = arith.constant 0 : i32
    return %c0_i32, %c0_i32_0 : i32, i32
  }
  func.func @transform_18(%arg0: i32) -> (i32, i32) {
    %c0_i32 = arith.constant 0 : i32
    %c0_i32_0 = arith.constant 0 : i32
    %c0_i32_1 = arith.constant 0 : i32
    return %c0_i32, %c0_i32_0 : i32, i32
  }
  func.func @transform_19(%arg0: i32) -> (i32, i32) {
    %c0_i32 = arith.constant 0 : i32
    %c0_i32_0 = arith.constant 0 : i32
    %c0_i32_1 = arith.constant 0 : i32
    return %c0_i32, %c0_i32_0 : i32, i32
  }
  func.func @transform_20(%arg0: i32) -> (i32, i32) {
    %c0_i32 = arith.constant 0 : i32
    %c0_i32_0 = arith.constant 0 : i32
    %c0_i32_1 = arith.constant 0 : i32
    return %c0_i32, %c0_i32_0 : i32, i32
  }
  func.func @transform_21(%arg0: i32) -> (i32, i32) {
    %c0_i32 = arith.constant 0 : i32
    %c0_i32_0 = arith.constant 0 : i32
    %c0_i32_1 = arith.constant 0 : i32
    return %c0_i32, %c0_i32_0 : i32, i32
  }
  func.func @transform_22(%arg0: i32) -> (i32, i32) {
    %c0_i32 = arith.constant 0 : i32
    %c0_i32_0 = arith.constant 0 : i32
    %c0_i32_1 = arith.constant 0 : i32
    return %c0_i32, %c0_i32_0 : i32, i32
  }
  func.func @transform_23(%arg0: i32) -> (i32, i32) {
    %c0_i32 = arith.constant 0 : i32
    %c0_i32_0 = arith.constant 0 : i32
    %c0_i32_1 = arith.constant 0 : i32
    return %c0_i32, %c0_i32_0 : i32, i32
  }
  func.func @transform_24(%arg0: i32) -> (i32, i32) {
    %c0_i32 = arith.constant 0 : i32
    %c0_i32_0 = arith.constant 0 : i32
    %c0_i32_1 = arith.constant 0 : i32
    return %c0_i32, %c0_i32_0 : i32, i32
  }
  func.func @transform_25(%arg0: i32) -> (i32, i32) {
    %c0_i32 = arith.constant 0 : i32
    %c0_i32_0 = arith.constant 0 : i32
    %c0_i32_1 = arith.constant 0 : i32
    return %c0_i32, %c0_i32_0 : i32, i32
  }
  func.func @transform_26(%arg0: i32) -> (i32, i32) {
    %c0_i32 = arith.constant 0 : i32
    %c0_i32_0 = arith.constant 0 : i32
    %c0_i32_1 = arith.constant 0 : i32
    return %c0_i32, %c0_i32_0 : i32, i32
  }
  func.func @transform_27(%arg0: i32) -> (i32, i32) {
    %c0_i32 = arith.constant 0 : i32
    %c0_i32_0 = arith.constant 0 : i32
    %c0_i32_1 = arith.constant 0 : i32
    return %c0_i32, %c0_i32_0 : i32, i32
  }
  func.func @transform_28(%arg0: i32) -> (i32, i32) {
    %c0_i32 = arith.constant 0 : i32
    %c0_i32_0 = arith.constant 0 : i32
    %c0_i32_1 = arith.constant 0 : i32
    return %c0_i32, %c0_i32_0 : i32, i32
  }
  func.func @transform_29(%arg0: i32) -> (i32, i32) {
    %c0_i32 = arith.constant 0 : i32
    %c0_i32_0 = arith.constant 0 : i32
    %c0_i32_1 = arith.constant 0 : i32
    return %c0_i32, %c0_i32_0 : i32, i32
  }
  func.func @transform_30(%arg0: i32) -> (i32, i32) {
    %c0_i32 = arith.constant 0 : i32
    %c0_i32_0 = arith.constant 0 : i32
    %c0_i32_1 = arith.constant 0 : i32
    return %c0_i32, %c0_i32_0 : i32, i32
  }
  func.func @transform_31(%arg0: i32) -> (i32, i32) {
    %c0_i32 = arith.constant 0 : i32
    %c0_i32_0 = arith.constant 0 : i32
    %c0_i32_1 = arith.constant 0 : i32
    return %c0_i32, %c0_i32_0 : i32, i32
  }
  func.func @transform_32(%arg0: i32) -> (i32, i32) {
    %c0_i32 = arith.constant 0 : i32
    %c0_i32_0 = arith.constant 0 : i32
    %c0_i32_1 = arith.constant 0 : i32
    return %c0_i32, %c0_i32_0 : i32, i32
  }
  func.func @transform_33(%arg0: i32) -> (i32, i32) {
    %c0_i32 = arith.constant 0 : i32
    %c0_i32_0 = arith.constant 0 : i32
    %c0_i32_1 = arith.constant 0 : i32
    return %c0_i32, %c0_i32_0 : i32, i32
  }
  func.func @transform_34(%arg0: i32) -> (i32, i32) {
    %c0_i32 = arith.constant 0 : i32
    %c0_i32_0 = arith.constant 0 : i32
    %c0_i32_1 = arith.constant 0 : i32
    return %c0_i32, %c0_i32_0 : i32, i32
  }
  func.func @transform_35(%arg0: i32) -> (i32, i32) {
    %c0_i32 = arith.constant 0 : i32
    %c0_i32_0 = arith.constant 0 : i32
    %c0_i32_1 = arith.constant 0 : i32
    return %c0_i32, %c0_i32_0 : i32, i32
  }
  func.func @transform_36(%arg0: i32) -> (i32, i32) {
    %c0_i32 = arith.constant 0 : i32
    %c0_i32_0 = arith.constant 0 : i32
    %c0_i32_1 = arith.constant 0 : i32
    return %c0_i32, %c0_i32_0 : i32, i32
  }
  func.func @transform_37(%arg0: i32) -> (i32, i32) {
    %c0_i32 = arith.constant 0 : i32
    %c0_i32_0 = arith.constant 0 : i32
    %c0_i32_1 = arith.constant 0 : i32
    return %c0_i32, %c0_i32_0 : i32, i32
  }
  func.func @transform_38(%arg0: i32) -> (i32, i32) {
    %c0_i32 = arith.constant 0 : i32
    %c0_i32_0 = arith.constant 0 : i32
    %c0_i32_1 = arith.constant 0 : i32
    return %c0_i32, %c0_i32_0 : i32, i32
  }
  func.func @transform_39(%arg0: i32) -> (i32, i32) {
    %c0_i32 = arith.constant 0 : i32
    %c0_i32_0 = arith.constant 0 : i32
    %c0_i32_1 = arith.constant 0 : i32
    return %c0_i32, %c0_i32_0 : i32, i32
  }
  func.func @transform_40(%arg0: i32) -> (i32, i32) {
    %c0_i32 = arith.constant 0 : i32
    %c0_i32_0 = arith.constant 0 : i32
    %c0_i32_1 = arith.constant 0 : i32
    return %c0_i32, %c0_i32_0 : i32, i32
  }
  func.func @transform_41(%arg0: i32) -> (i32, i32) {
    %c0_i32 = arith.constant 0 : i32
    %c0_i32_0 = arith.constant 0 : i32
    %c0_i32_1 = arith.constant 0 : i32
    return %c0_i32, %c0_i32_0 : i32, i32
  }
}

</mosaic_0001>

<bundles_post_ra>
// kernel: eq.1
= control target key start
LH: loop header
LB: loop body
LE: loop exit
PB: predicated region body
PF: predicated region fallthrough
CT: control target
= control target key end

     0   :  { %vm7_vm0 = vcmask 64512   ;;  %vm13_vm1 = vcmask 130112   ;;  %s39_s0 = inlined_call_operand.vmem [shape: s32[2,8], index: 0, kind: input, shape index: {}]   ;;  %s40_s1 = inlined_call_operand.vmem [shape: s32[16], index: 1, kind: output, shape index: {}]  }
   0x1   :  { %v4_v0 = vld [vmem:[%s39_s0] sm:$0x3]  ;;  %s22_s0 = smov 8  }
   0x2   :  { %5 = vst [vmem:[#allocation1] sm:$0x3] %v4_v0 }
   0x9   :  { %v10_v1 = vld [vmem:[#allocation1 + $0x1] sm:$0x1]   ;;  %v6_v2 = vld [vmem:[#allocation1] sm:$0x1]  }
   0xa   :  { %11 = vrot.lane.b32.xlu0 %v10_v1, %s22_s0  ;;  %8 = vst.msk [vmem:[#allocation0] sm:$0x1] %vm7_vm0, %v6_v2  }
  0x7c   :  { %v12_v3 = vpop.permute.xlu0 %11  }
  0x7d   :  { %14 = vst.msk [vmem:[#allocation0] sm:$0x1] %vm13_vm1, %v12_v3  }
  0x84   :  { %v18_v4 = vld [vmem:[#allocation0] sm:$0x1] }
  0x85   :  { %20 = vst [vmem:[%s40_s1] sm:$0x1] %v18_v4 }

// kernel: neg.1
= control target key start
LH: loop header
LB: loop body
LE: loop exit
PB: predicated region body
PF: predicated region fallthrough
CT: control target
= control target key end

     0   :  { %s40_s0 = inlined_call_operand.vmem [shape: f32[2,8,1], index: 0, kind: input, shape index: {}]   ;;  %s41_s1 = inlined_call_operand.vmem [shape: f32[2,8,1], index: 1, kind: output, shape index: {}]  }
   0x1   :  { %v2_v0 = vld [vmem:[%s40_s0] sm:$0x1]  ;;  %v16_v1 = vld [vmem:[%s40_s0 + $0x1] sm:$0x1] }
   0x2   :  { %v5_v2 = vxor.u32 2147483648, %v2_v0  ;;  %v12_v3 = vxor.u32 2147483648, %v16_v1 }
   0x4   :  { %7 = vst [vmem:[%s41_s1] sm:$0x1] %v5_v2  ;;  %17 = vst [vmem:[%s41_s1 + $0x1] sm:$0x1] %v12_v3 }

// kernel: qagnn_forward.1
= control target key start
LH: loop header
LB: loop body
LE: loop exit
PB: predicated region body
PF: predicated region fallthrough
CT: control target
= control target key end

     0   :  { %v4799_v0 = vmov 0.0|0.0   ;;  %s4800_s3 = smov 9   ;;  %vm4801_vm0 = vmmov 0   ;;  %v4802_v1 = vmov 0.0   ;;  %vm201_vm1 = vcmask 261120   ;;  %s4803_s10 = smov 2   ;;  %s6097_s0 = inlined_call_operand.smem [shape: u32[42], index: -1, kind: input, shape index: {}] }
   0x1   :  { %4282 = vmatprep.subr.bf16.mxu0 %v4799_v0  ;;  %s3825_s6 = sld [smem:[%s6097_s0 + %s4800_s3]]   ;;  %4064 = vmatprep.mubr.msk.f32.mxu0 %vm4801_vm0, %v4802_v1  ;;  %vm288_vm2 = vcmask 15360   ;;  %s4804_s14 = smov 10   ;;  %vm295_vm3 = vcmask 1041408   ;;  %vm388_vm4 = vcmask 162816   ;;  %vm395_vm5 = vcmask 1043456  }
   0x2   :  { %s4865_s9 = sld [smem:[%s6097_s0]]   ;;  %s4805_s18 = smov 11   ;;  %vm518_vm6 = vcmask 1046528   ;;  %vm4809_vm7 = vmmov 1   ;;  %vm505_vm9 = vcmask 121856   ;;  %vm729_vm10 = vcmask 130048  }
   0x3   :  { %s4873_s13 = sld [smem:[%s6097_s0 + %s4803_s10]]   ;;  %s4806_s22 = smov 3   ;;  %vm4293_vm8 = vmpackc.low %vm518_vm6, %vm4809_vm7  ;;  %vm940_vm11 = vcmask 523264   ;;  %vm1089_vm12 = vcmask 64512   ;;  %vm1099_vm13 = vcmask 60416   ;;  %vm1114_vm14 = vcmask 125952  }
   0x4   :  { %s3826_s17 = sld [smem:[%s6097_s0 + %s4804_s14]]   ;;  %s4807_s26 = smov 13   ;;  %vm1665_vm15 = vcmask 228352   ;;  %vm3508_vm6 = vcmask 523648  }
   0x5   :  { %s3827_s21 = sld [smem:[%s6097_s0 + %s4805_s18]]   ;;  %s4808_s30 = smov 4  }
   0x6   :  { %s3819_s25 = sld [smem:[%s6097_s0 + %s4806_s22]]   ;;  %s4810_s4 = smov 15  }
   0x7   :  { %v190_v2 = vld [vmem:[%s3825_s6] sm:$0xff]  ;;  %v191_v3 = vld [vmem:[%s3825_s6 + $0x8] sm:$0xff]  ;;  %v192_v4 = vld [vmem:[%s3825_s6 + $0x10] sm:$0xff]  ;;  %s3829_s29 = sld [smem:[%s6097_s0 + %s4807_s26]]   ;;  %s4811_s8 = smov 12  }
   0x8   :  { %v4283_v5 = vpack.c.bf16 %v191_v3, %v190_v2  ;;  %v193_v6 = vld [vmem:[%s3825_s6 + $0x18] sm:$0xff]  ;;  %v171_v8 = vld [vmem:[%s4865_s9] sm:$0x3]  ;;  %s4892_s3 = sld [smem:[%s6097_s0 + %s4808_s30]]   ;;  %s4815_s22 = smov 6  }
   0x9   :  { %v4286_v7 = vpack.c.bf16 %v193_v6, %v192_v4  ;;  %v286_v9 = vld [vmem:[%s4873_s13] sm:$0xff]  ;;  %v287_v26 = vld [vmem:[%s4873_s13 + $0x8] sm:$0xff]  ;;  %s3831_s7 = sld [smem:[%s6097_s0 + %s4810_s4]]   ;;  %s4812_s13 = smov 14  }
   0xa   :  { %4284 = vmatpush3.bf16.msra.mxu0 %v4283_v5  ;;  %4069 = vmatprep.mubr.msk.f32.mxu1 %vm288_vm2, %v286_v9  ;;  %v3858_v10 = vld [vmem:[%s3826_s17] ss:$0 sm:$0xff]  ;;  %s3828_s12 = sld [smem:[%s6097_s0 + %s4811_s8]]   ;;  %s4813_s17 = smov 5  }
   0xb   :  { %4285 = vmatprep.subr.bf16.mxu0 %v4799_v0  ;;  %v378_v20 = vld [vmem:[%s3827_s21] sm:$0xff]  ;;  %v379_v21 = vld [vmem:[%s3827_s21 + $0x8] sm:$0xff]  ;;  %v380_v28 = vld [vmem:[%s3827_s21 + $0x10] sm:$0xf]  ;;  %s3830_s16 = sld [smem:[%s6097_s0 + %s4812_s13]]   ;;  %s4814_s21 = smov 32  }
   0xc   :  { %v4288_v25 = vpack.c.bf16 %v379_v21, %v378_v20  ;;  %v376_v27 = vld [vmem:[%s3819_s25] sm:$0xff]  ;;  %v377_v32 = vld [vmem:[%s3819_s25 + $0x8] sm:$0xff]  ;;  %s4923_s20 = sld [smem:[%s6097_s0 + %s4813_s17]]   ;;  %s4816_s26 = smov 1  }
   0xd   :  { %v496_v29 = vld [vmem:[%s3829_s29] sm:$0xff]  ;;  %v497_v30 = vld [vmem:[%s3829_s29 + $0x8] sm:$0x7f]  ;;  %s4934_s25 = sld [smem:[%s6097_s0 + %s4815_s22]]   ;;  %s4817_s30 = smov 16  }
   0xe   :  { %4287 = vmatpush3.bf16.msra.mxu0 %v4286_v7  ;;  %v4292_v31 = vpack.c.bf16 %v497_v30, %v496_v29  ;;  %v492_v33 = vld [vmem:[%s4892_s3] sm:$0xff]  ;;  %v493_v34 = vld [vmem:[%s4892_s3 + $0x8] sm:$0xff]  ;;  %v494_v35 = vld [vmem:[%s4892_s3 + $0x10] sm:$0xff]  ;;  %s3817_s29 = sld [smem:[%s6097_s0 + %s4816_s26]]   ;;  %s4818_s4 = smov 17  }
   0xf   :  { %v495_v36 = vld [vmem:[%s4892_s3 + $0x18] sm:$0xf]  ;;  %v611_v37 = vld [vmem:[%s3831_s7] sm:$0xff]  ;;  %v612_v38 = vld [vmem:[%s3831_s7 + $0x8] sm:$0xff]  ;;  %s3832_s3 = sld [smem:[%s6097_s0 + %s4817_s30]]   ;;  %s4819_s8 = smov 64  }
  0x10   :  { %v4298_v39 = vpack.c.bf16 %v612_v38, %v611_v37  ;;  %v613_v40 = vld [vmem:[%s3831_s7 + $0x10] sm:$0xff]  ;;  %v614_v41 = vld [vmem:[%s3831_s7 + $0x18] sm:$0xff]  ;;  %v3863_v45 = vld [vmem:[%s3828_s12] ss:$0 sm:$0xff]  ;;  %s4996_s7 = sld [smem:[%s6097_s0 + %s4818_s4]]   ;;  %s4820_s10 = smov 18  }
  0x11   :  { %4065 = vmatmul.mubr.msk.f32.vlgmr.msra.gmra.mrb[0].mxu0 %vm201_vm1, %v171_v8  ;;  %v4302_v42 = vpack.c.bf16 %v614_v41, %v613_v40  ;;  %v3867_v50 = vld [vmem:[%s3830_s16] ss:$0 sm:$0xff]  ;;  %s3834_s13 = sld [smem:[%s6097_s0 + %s4820_s10]]   ;;  %s4821_s14 = smov 120  }
  0x12   :  { %s4822_s15 = smov 112   ;;  %s4823_s16 = smov 104  }
  0x13   :  { %v176_v21 = vld [vmem:[%s4934_s25] sm:$0xff]  ;;  %v179_v37 = vld [vmem:[%s4934_s25 + $0x18] sm:$0xf]  ;;  %s4824_s17 = smov 96   ;;  %s4825_s18 = smov 7  }
  0x14   :  { %4109 = vmatprep.mubr.msk.f32.mxu0 %vm729_vm10, %v176_v21  ;;  %s5423_s23 = sld [smem:[%s6097_s0 + %s4825_s18]]   ;;  %s4826_s24 = smov 19  }
  0x15   :  { %v3873_v38 = vld [vmem:[%s3832_s3] ss:$0 sm:$0xff]  ;;  %s3835_s28 = sld [smem:[%s6097_s0 + %s4826_s24]]   ;;  %s4828_s3 = smov 20  }
  0x16   :  { %s3836_s6 = sld [smem:[%s6097_s0 + %s4828_s3]]   ;;  %s4831_s22 = smov 24  }
  0x17   :  { %s3840_s27 = sld [smem:[%s6097_s0 + %s4831_s22]]   ;;  %s4835_s5 = smov 29  }
  0x18   :  { %s3845_s10 = sld [smem:[%s6097_s0 + %s4835_s5]]   ;;  %s4836_s11 = smov 28  }
  0x19   :  { %s3844_s18 = sld [smem:[%s6097_s0 + %s4836_s11]]   ;;  %s4838_s26 = smov 33  }
  0x1a   :  { %s4842_s5 = smov 8   ;;  %s4846_s22 = smov 36  }
  0x1b   :  { %s4849_s30 = smov 41   ;;  %s4850_s3 = smov 39  }
  0xe4   :  { %v271_v11 = vpop.f32.mrb[0].mxu0 }
  0xe5   :  { %v272_v12 = vadd.f32 %v3858_v10, %v271_v11  ;;  %v4066_v13 = vpop.f32.mrb[1].mxu0 }
  0xe7   :  { %v276_v14 = vmul.f32 %v272_v12, %v272_v12  ;;  %v275_v22 = vmul.f32 0.5, %v272_v12 }
  0xe9   :  { %v277_v15 = vmul.f32 %v276_v14, %v272_v12 }
  0xeb   :  { %v278_v16 = vmul.f32 0.044715, %v277_v15 }
  0xed   :  { %v279_v17 = vadd.f32 %v278_v16, %v272_v12 }
  0xef   :  { %v280_v18 = vmul.f32 0.7978846, %v279_v17  ;;  %v4926_v17 = vld [vmem:[%s4923_s20] sm:$0xff] }
  0xf1   :  { %4623 = vtanh.f32 %v280_v18 }
  0xfb   :  { %v4624_v19 = vpop.eup %4623 }
  0xfc   :  { %v282_v23 = vadd.f32 1.0, %v4624_v19 }
  0xfe   :  { %v283_v24 = vmul.f32 %v282_v23, %v275_v22  ;;  %v285_v22 = vld [vmem:[%s3817_s29 + $0x8] sm:$0xff]  ;;  %v284_v23 = vld [vmem:[%s3817_s29] sm:$0xff]  ;;  %s4827_s29 = smov 21  }
  0xff   :  { %s3837_s2 = sld [smem:[%s6097_s0 + %s4827_s29]]  }
 0x100   :  { %4067 = vmatprep.subr.msk.mxu1 %vm295_vm3, %v283_v24 }
 0x101   :  { %4068 = vmatpush3.msk.msra.mxu1 %vm295_vm3, %v283_v24  ;;  %vm5458_vm3 = vmpackc.low %vm395_vm5, %vm4809_vm7  ;;  %vm3629_vm7 = vcmask 1040384  }
 0x102   :  { %4070 = vmatmul.mubr.msk.f32.vlgmr.msra.gmra.mrb[0].mxu1 %vm288_vm2, %v287_v26  ;;  %4289 = vmatprep.subr.bf16.mxu1 %v4288_v25  ;;  %vm1660_vm2 = vcmask 195584  }
 0x103   :  { %4291 = vmatpush3.bf16.msra.mxu1 %v4288_v25  ;;  %4078 = vmatprep.mubr.msk.f32.mxu1 %vm388_vm4, %v376_v27 }
 0x104   :  { %4076 = vmatprep.subr.msk.mxu1 %vm395_vm5, %v380_v28 }
 0x107   :  { %4077 = vmatpush3.msk.msra.mxu1 %vm395_vm5, %v380_v28  ;;  %vm3466_vm5 = vcmask 392448  }
 0x108   :  { %4079 = vmatmul.mubr.msk.f32.vlgmr.msra.gmra.mrb[2].mxu1 %vm388_vm4, %v377_v32  ;;  %4294 = vmatprep.subr.msk.bf16.mxu1 %vm4293_vm8, %v4292_v31  ;;  %v4959_v32 = vld [vmem:[%s4923_s20 + $0x8] sm:$0xff]  ;;  %vm3440_vm4 = vcmask 7168  }
 0x109   :  { %4297 = vmatpush3.bf16.msk.msra.mxu1 %vm4293_vm8, %v4292_v31  ;;  %4085 = vmatprep.mubr.msk.f32.mxu1 %vm505_vm9, %v492_v33  ;;  %v177_v33 = vld [vmem:[%s4934_s25 + $0x8] sm:$0xff]  ;;  %vm3800_vm8 = vcmask 1024  }
 0x10a   :  { %4299 = vmatprep.subr.bf16.mxu1 %v4298_v39 }
 0x10c   :  { %4086 = vmatmul.mubr.msk.f32.vlgmr.msra.gmra.mrb[4].mxu1 %vm505_vm9, %v493_v34  ;;  %v4963_v34 = vld [vmem:[%s4923_s20 + $0x10] sm:$0xff] }
 0x10d   :  { %4088 = vmatprep.mubr.msk.f32.mxu1 %vm505_vm9, %v494_v35  ;;  %4301 = vmatpush3.bf16.msra.mxu1 %v4298_v39  ;;  %v178_v35 = vld [vmem:[%s4934_s25 + $0x10] sm:$0xff] }
 0x10e   :  { %4303 = vmatprep.subr.bf16.mxu1 %v4302_v42 }
 0x110   :  { %4089 = vmatmul.mubr.msk.f32.gmra.mrb[6].mxu1 %vm505_vm9, %v495_v36  ;;  %v4973_v36 = vld [vmem:[%s4923_s20 + $0x18] sm:$0xf] }
 0x111   :  { %4305 = vmatpush3.bf16.msra.mxu1 %v4302_v42 }
 0x1d5   :  { %v4911_v43 = vpop.f32.mrb[0].mxu1 }
 0x1d6   :  { %v365_v44 = vpop.f32.mrb[1].mxu1  ;;  %v4944_v25 = vadd.f32 %v4911_v43, %v285_v22 }
 0x1d7   :  { %v4946_v26 = vadd.f32 %v365_v44, %v284_v23 }
 0x1db   :  { %v4080_v46 = vpop.f32.mrb[2].mxu1 }
 0x1dc   :  { %v471_v47 = vadd.f32 %v4080_v46, %v3863_v45  ;;  %v465_v48 = vpop.f32.mrb[3].mxu1 }
 0x1dd   :  { %v466_v49 = vadd.f32 %v3863_v45, %v465_v48  ;;  %v946_v48 = vld [vmem:[%s4996_s7 + $0x8] sm:$0xff] }
 0x1de   :  { %v477_v51 = vmul.f32 %v471_v47, %v471_v47  ;;  %v475_v13 = vmul.f32 0.5, %v471_v47 }
 0x1df   :  { %v476_v52 = vmul.f32 %v466_v49, %v466_v49  ;;  %v4087_v53 = vpop.f32.mrb[4].mxu1  ;;  %v474_v15 = vmul.f32 0.5, %v466_v49 }
 0x1e0   :  { %v479_v54 = vmul.f32 %v477_v51, %v471_v47  ;;  %v594_v55 = vadd.f32 %v4087_v53, %v3867_v50  ;;  %v588_v56 = vpop.f32.mrb[5].mxu1  ;;  %v948_v51 = vld [vmem:[%s4996_s7 + $0x18] sm:$0xff]  ;;  %v949_v53 = vld [vmem:[%s4996_s7 + $0x20] sm:$0xff] }
 0x1e1   :  { %v478_v57 = vmul.f32 %v476_v52, %v466_v49  ;;  %v589_v58 = vadd.f32 %v3867_v50, %v588_v56  ;;  %v951_v56 = vld [vmem:[%s4996_s7 + $0x30] sm:$0xff] }
 0x1e2   :  { %v481_v59 = vmul.f32 0.044715, %v479_v54  ;;  %v608_v60 = vmax.f32 %v594_v55, 0.0  ;;  %v950_v54 = vld [vmem:[%s4996_s7 + $0x28] sm:$0xff] }
 0x1e3   :  { %v480_v61 = vmul.f32 0.044715, %v478_v57  ;;  %v607_v62 = vmax.f32 %v589_v58, 0.0  ;;  %v4090_v63 = vpop.f32.mrb[6].mxu1  ;;  %v4321_v55 = vpack.c.bf16 %v950_v54, %v949_v53  ;;  %v952_v57 = vld [vmem:[%s4996_s7 + $0x38] sm:$0xff] }
 0x1e4   :  { %v483_v2 = vadd.f32 %v481_v59, %v471_v47  ;;  %v604_v3 = vadd.f32 %v4090_v63, %v3867_v50  ;;  %v598_v4 = vpop.f32.mrb[7].mxu1  ;;  %v945_v47 = vld [vmem:[%s4996_s7] sm:$0xff]  ;;  %v4324_v58 = vpack.c.bf16 %v952_v57, %v951_v56  ;;  %v956_v63 = vld [vmem:[%s4996_s7 + $0x58] sm:$0xff] }
 0x1e5   :  { %v482_v5 = vadd.f32 %v480_v61, %v466_v49  ;;  %v599_v6 = vadd.f32 %v3867_v50, %v598_v4  ;;  %4099 = vmatprep.mubr.msk.f32.mxu1 %vm201_vm1, %v607_v62  ;;  %v947_v49 = vld [vmem:[%s4996_s7 + $0x10] sm:$0xff]  ;;  %v4315_v50 = vpack.c.bf16 %v946_v48, %v945_v47  ;;  %v953_v59 = vld [vmem:[%s4996_s7 + $0x40] sm:$0xff]  ;;  %v958_v4 = vld [vmem:[%s4996_s7 + $0x68] sm:$0xff] }
 0x1e6   :  { %v485_v7 = vmul.f32 0.7978846, %v483_v2  ;;  %v610_v8 = vmax.f32 %v604_v3, 0.0  ;;  %4100 = vmatmul.mubr.msk.f32.vlgmr.msra.gmra.mrb[8].mxu1 %vm201_vm1, %v608_v60  ;;  %v4318_v52 = vpack.c.bf16 %v948_v51, %v947_v49  ;;  %v954_v60 = vld [vmem:[%s4996_s7 + $0x48] sm:$0xff]  ;;  %v955_v62 = vld [vmem:[%s4996_s7 + $0x50] sm:$0xff]  ;;  %v957_v3 = vld [vmem:[%s4996_s7 + $0x60] sm:$0xff] }
 0x1e7   :  { %v484_v9 = vmul.f32 0.7978846, %v482_v5  ;;  %v609_v10 = vmax.f32 %v599_v6, 0.0  ;;  %v4327_v61 = vpack.c.bf16 %v954_v60, %v953_v59  ;;  %v4330_v2 = vpack.c.bf16 %v956_v63, %v955_v62  ;;  %v959_v6 = vld [vmem:[%s4996_s7 + $0x70] sm:$0xff] }
 0x1e8   :  { %4625 = vtanh.f32 %v485_v7  ;;  %v4333_v5 = vpack.c.bf16 %v958_v4, %v957_v3  ;;  %v960_v7 = vld [vmem:[%s4996_s7 + $0x78] sm:$0xff] }
 0x1e9   :  { %4627 = vtanh.f32 %v484_v9  ;;  %4102 = vmatprep.mubr.msk.f32.mxu1 %vm201_vm1, %v609_v10  ;;  %v961_v9 = vld [vmem:[%s4996_s7 + $0x80] sm:$0xff]  ;;  %v962_v10 = vld [vmem:[%s4996_s7 + $0x88] sm:$0xff] }
 0x1ea   :  { %4103 = vmatmul.mubr.msk.f32.gmra.mrb[10].mxu1 %vm201_vm1, %v610_v8  ;;  %v4336_v8 = vpack.c.bf16 %v960_v7, %v959_v6 }
 0x1eb   :  { %4119 = vmatprep.mubr.msk.f32.mxu1 %vm729_vm10, %v4926_v17 }
 0x1f2   :  { %v4626_v11 = vpop.eup %4625 }
 0x1f3   :  { %v4628_v12 = vpop.eup %4627  ;;  %v489_v14 = vadd.f32 1.0, %v4626_v11  ;;  %v4339_v11 = vpack.c.bf16 %v962_v10, %v961_v9 }
 0x1f4   :  { %v488_v16 = vadd.f32 1.0, %v4628_v12  ;;  %v963_v12 = vld [vmem:[%s4996_s7 + $0x90] sm:$0xff] }
 0x1f5   :  { %v491_v18 = vmul.f32 %v489_v14, %v475_v13  ;;  %v964_v13 = vld [vmem:[%s4996_s7 + $0x98] sm:$0xff]  ;;  %s4829_s7 = smov 22  }
 0x1f6   :  { %v490_v19 = vmul.f32 %v488_v16, %v474_v15  ;;  %v4342_v14 = vpack.c.bf16 %v964_v13, %v963_v12  ;;  %s3838_s12 = sld [smem:[%s6097_s0 + %s4829_s7]]  }
 0x1f7   :  { %s3824_s7 = sld [smem:[%s6097_s0 + %s4842_s5]]  }
 0x1f8   :  { %v4534_v20 = vpack.i.bf16 %v491_v18, %v490_v19 }
 0x1fa   :  { %4535 = vrot.lane.b32.xlu0 %v4534_v20, %s4814_s21 }
 0x26c   :  { %v4941_v24 = vpop.permute.xlu0 %4535 }
 0x26d   :  { %v4538_v27 = vunpack.i.h.bf16 %v4941_v24  ;;  %v4537_v28 = vunpack.i.l.bf16 %v4941_v24 }
 0x26f   :  { %v728_v29 = vsel %vm201_vm1, %v4944_v25, %v4538_v27  ;;  %v727_v30 = vsel %vm201_vm1, %v4946_v26, %v4537_v28 }
 0x270   :  { %v4306_v31 = vpack.c.bf16 %v728_v29, %v727_v30 }
 0x272   :  { %4307 = vmatprep.subr.bf16.mxu0 %v4306_v31  ;;  %4311 = vmatprep.subr.bf16.mxu1 %v4306_v31 }
 0x273   :  { %4309 = vmatpush3.bf16.msra.mxu0 %v4306_v31  ;;  %4313 = vmatpush3.bf16.msra.mxu1 %v4306_v31 }
 0x274   :  { %4314 = vmatprep.subr.bf16.mxu0 %v4799_v0 }
 0x276   :  { %4120 = vmatmul.mubr.msk.f32.vlgmr.msra.gmra.mrb[12].mxu1 %vm729_vm10, %v4959_v32  ;;  %4110 = vmatmul.mubr.msk.f32.vlgmr.msra.gmra.mrb[2].mxu0 %vm729_vm10, %v177_v33 }
 0x277   :  { %4122 = vmatprep.mubr.msk.f32.mxu1 %vm729_vm10, %v4963_v34  ;;  %4112 = vmatprep.mubr.msk.f32.mxu0 %vm729_vm10, %v178_v35 }
 0x278   :  { %4316 = vmatpush1.bf16.msra.mxu0 %v4315_v50 }
 0x279   :  { %4317 = vmatprep.subr.bf16.mxu0 %v4799_v0 }
 0x27a   :  { %4123 = vmatmul.mubr.msk.f32.gmra.mrb[14].mxu1 %vm729_vm10, %v4973_v36  ;;  %4113 = vmatmul.mubr.msk.f32.gmra.mrb[4].mxu0 %vm729_vm10, %v179_v37 }
 0x27c   :  { %4319 = vmatpush1.bf16.msra.mxu0 %v4318_v52 }
 0x27d   :  { %4320 = vmatprep.subr.bf16.mxu0 %v4799_v0 }
 0x280   :  { %4322 = vmatpush1.bf16.msra.mxu0 %v4321_v55 }
 0x281   :  { %4323 = vmatprep.subr.bf16.mxu0 %v4799_v0 }
 0x284   :  { %4325 = vmatpush1.bf16.msra.mxu0 %v4324_v58 }
 0x285   :  { %4326 = vmatprep.subr.bf16.mxu0 %v4799_v0 }
 0x288   :  { %4328 = vmatpush1.bf16.msra.mxu0 %v4327_v61 }
 0x289   :  { %4329 = vmatprep.subr.bf16.mxu0 %v4799_v0 }
 0x28c   :  { %4331 = vmatpush1.bf16.msra.mxu0 %v4330_v2 }
 0x28d   :  { %4332 = vmatprep.subr.bf16.mxu0 %v4799_v0 }
 0x290   :  { %4334 = vmatpush1.bf16.msra.mxu0 %v4333_v5 }
 0x291   :  { %4335 = vmatprep.subr.bf16.mxu0 %v4799_v0 }
 0x294   :  { %4337 = vmatpush1.bf16.msra.mxu0 %v4336_v8 }
 0x295   :  { %4338 = vmatprep.subr.bf16.mxu0 %v4799_v0 }
 0x298   :  { %4340 = vmatpush1.bf16.msra.mxu0 %v4339_v11 }
 0x299   :  { %4341 = vmatprep.subr.bf16.mxu0 %v4799_v0 }
 0x29c   :  { %4343 = vmatpush1.bf16.msra.mxu0 %v4342_v14 }
 0x29d   :  { %4378 = vmatprep.subr.bf16.mxu0 %v4799_v0 }
 0x2b9   :  { %v4101_v39 = vpop.f32.mrb[8].mxu1 }
 0x2ba   :  { %v4983_v40 = vadd.f32 %v4101_v39, %v3873_v38  ;;  %v700_v41 = vpop.f32.mrb[9].mxu1 }
 0x2bb   :  { %v4985_v42 = vadd.f32 %v3873_v38, %v700_v41  ;;  %v3886_v41 = vld [vmem:[%s3834_s13] ss:$0 sm:$0xff]  ;;  %s4830_s13 = smov 23  }
 0x2bc   :  { %s5508_s19 = sld [smem:[%s6097_s0 + %s4830_s13]]  }
 0x2bd   :  { %v4104_v43 = vpop.f32.mrb[10].mxu1  ;;  %3887 = vmatprep.mubr.msk.f32.mxu0 %vm201_vm1, %v4985_v42 }
 0x2be   :  { %v4989_v44 = vadd.f32 %v4104_v43, %v3873_v38  ;;  %v710_v45 = vpop.f32.mrb[11].mxu1 }
 0x2bf   :  { %v4991_v46 = vadd.f32 %v3873_v38, %v710_v45 }
 0x2c2   :  { %v2146_v24 = vld [vmem:[%s5508_s19] sm:$0xff] }
 0x349   :  { %v4121_v15 = vpop.f32.mrb[12].mxu1  ;;  %v4111_v16 = vpop.f32.mrb[2].mxu0 }
 0x34a   :  { %v905_v18 = vpop.f32.mrb[13].mxu1  ;;  %930 = vrot.lane.b32.xlu1 %v4121_v15, %s4819_s8  ;;  %v808_v19 = vpop.f32.mrb[3].mxu0 }
 0x34b   :  { %928 = vrot.lane.b32.xlu0 %v905_v18, %s4819_s8 }
 0x34d   :  { %v4124_v20 = vpop.f32.mrb[14].mxu1  ;;  %v4114_v21 = vpop.f32.mrb[4].mxu0 }
 0x34e   :  { %v915_v22 = vpop.f32.mrb[15].mxu1  ;;  %v818_v23 = vpop.f32.mrb[5].mxu0 }
 0x34f   :  { %932 = vrot.lane.b32.xlu1 %v915_v22, %s4819_s8  ;;  %934 = vrot.lane.b32.xlu0 %v4124_v20, %s4819_s8 }
 0x3bc   :  { %v931_v30 = vpop.permute.xlu1 %930 }
 0x3bd   :  { %v929_v29 = vpop.permute.xlu0 %928  ;;  %v942_v35 = vsel %vm940_vm11, %v4111_v16, %v931_v30 }
 0x3be   :  { %v941_v31 = vsel %vm940_vm11, %v808_v19, %v929_v29 }
 0x3bf   :  { %1049 = vmatmul.mubr.f32.vlgmr.msra.gmra.mrb[6].mxu0 %v941_v31 }
 0x3c0   :  { %3888 = vmatprep.mubr.msk.f32.mxu0 %vm201_vm1, %v4983_v40 }
 0x3c1   :  { %v933_v33 = vpop.permute.xlu1 %932  ;;  %v935_v38 = vpop.permute.xlu0 %934 }
 0x3c2   :  { %v943_v37 = vsel %vm940_vm11, %v818_v23, %v933_v33  ;;  %v944_v39 = vsel %vm940_vm11, %v4114_v21, %v935_v38 }
 0x3c3   :  { %1054 = vmatmul.mubr.f32.gmra.mrb[8].mxu0 %v942_v35 }
 0x3c4   :  { %3889 = vmatprep.mubr.msk.f32.mxu0 %vm201_vm1, %v4991_v46 }
 0x3c7   :  { %1059 = vmatmul.mubr.f32.gmra.mrb[10].mxu0 %v943_v37 }
 0x3c8   :  { %3890 = vmatprep.mubr.msk.f32.mxu0 %vm201_vm1, %v4989_v44 }
 0x3cb   :  { %1064 = vmatmul.mubr.f32.gmra.mrb[12].mxu0 %v944_v39  ;;  %v183_v39 = vsub.f32 1.0, %v4959_v32 }
 0x3cc   :  { %3909 = vmatprep.mubr.msk.f32.mxu0 %vm201_vm1, %v4985_v42 }
 0x492   :  { %v1050_v43 = vpop.f32.mrb[6].mxu0 }
 0x493   :  { %v5047_v45 = vadd.f32 %v3886_v41, %v1050_v43  ;;  %v1052_v47 = vpop.f32.mrb[7].mxu0  ;;  %v184_v43 = vsub.f32 1.0, %v4963_v34 }
 0x494   :  { %v5098_v47 = vmul.f32 1e+30, %v183_v39 }
 0x495   :  { %1073 = vrot.lane.b32.xlu1 %v5047_v45, %s4819_s8 }
 0x496   :  { %v1055_v48 = vpop.f32.mrb[8].mxu0 }
 0x497   :  { %v5051_v49 = vadd.f32 %v3886_v41, %v1055_v48  ;;  %v1057_v50 = vpop.f32.mrb[9].mxu0 }
 0x499   :  { %1075 = vrot.lane.b32.xlu0 %v5051_v49, %s4819_s8 }
 0x49a   :  { %v1060_v42 = vpop.f32.mrb[10].mxu0 }
 0x49b   :  { %v5055_v51 = vadd.f32 %v3886_v41, %v1060_v42  ;;  %v1062_v52 = vpop.f32.mrb[11].mxu0  ;;  %v185_v42 = vsub.f32 1.0, %v4973_v36 }
 0x49d   :  { %1077 = vrot.lane.b32.xlu1 %v5055_v51, %s4819_s8 }
 0x49e   :  { %v1065_v53 = vpop.f32.mrb[12].mxu0 }
 0x49f   :  { %v5059_v54 = vadd.f32 %v3886_v41, %v1065_v53  ;;  %v1067_v55 = vpop.f32.mrb[13].mxu0  ;;  %v182_v41 = vsub.f32 1.0, %v4926_v17 }
 0x4a1   :  { %1079 = vrot.lane.b32.xlu0 %v5059_v54, %s4819_s8  ;;  %v5102_v50 = vmul.f32 1e+30, %v182_v41 }
 0x507   :  { %v1074_v56 = vpop.permute.xlu1 %1073 }
 0x508   :  { %v1085_v57 = vmul.f32 %v1074_v56, %v5047_v45  ;;  %v5111_v56 = vmul.f32 1e+30, %v184_v43 }
 0x50a   :  { %1210 = vrot.lane.b32.xlu1 %v1085_v57, %s4821_s14  ;;  %v1090_v3 = vsel %vm1089_vm12, %v1085_v57, 0.0 }
 0x50b   :  { %v1076_v58 = vpop.permute.xlu0 %1075 }
 0x50c   :  { %v1086_v59 = vmul.f32 %v1076_v58, %v5051_v49 }
 0x50e   :  { %1212 = vrot.lane.b32.xlu0 %v1086_v59, %s4821_s14  ;;  %1336 = vrot.lane.b32.xlu1 %v1085_v57, %s4822_s15  ;;  %v1093_v2 = vsel %vm1089_vm12, %v1086_v59, 0.0 }
 0x50f   :  { %v1078_v60 = vpop.permute.xlu1 %1077 }
 0x510   :  { %v1087_v61 = vmul.f32 %v1078_v60, %v5055_v51  ;;  %v5117_v60 = vmul.f32 1e+30, %v185_v42 }
 0x512   :  { %1338 = vrot.lane.b32.xlu0 %v1086_v59, %s4822_s15  ;;  %1462 = vrot.lane.b32.xlu1 %v1085_v57, %s4823_s16  ;;  %v1096_v4 = vsel %vm1089_vm12, %v1087_v61, 0.0 }
 0x513   :  { %v1080_v62 = vpop.permute.xlu0 %1079 }
 0x514   :  { %v1088_v63 = vmul.f32 %v1080_v62, %v5059_v54 }
 0x516   :  { %1464 = vrot.lane.b32.xlu0 %v1086_v59, %s4823_s16  ;;  %1214 = vrot.lane.b32.xlu1 %v1087_v61, %s4821_s14  ;;  %v1100_v5 = vsel %vm1099_vm13, %v1088_v63, 0.0 }
 0x51a   :  { %1216 = vrot.lane.b32.xlu0 %v1088_v63, %s4821_s14  ;;  %1340 = vrot.lane.b32.xlu1 %v1087_v61, %s4822_s15 }
 0x51e   :  { %1342 = vrot.lane.b32.xlu0 %v1088_v63, %s4822_s15  ;;  %1466 = vrot.lane.b32.xlu1 %v1087_v61, %s4823_s16 }
 0x522   :  { %1468 = vrot.lane.b32.xlu0 %v1088_v63, %s4823_s16 }
 0x541   :  { %1094 = vadd.xlane.f32.xlu0 %v1093_v2 }
 0x542   :  { %1091 = vadd.xlane.f32.xlu1 %v1090_v3 }
 0x545   :  { %1097 = vadd.xlane.f32.xlu0 %v1096_v4 }
 0x546   :  { %1101 = vadd.xlane.f32.xlu1 %v1100_v5 }
 0x57c   :  { %v1211_v6 = vpop.permute.xlu1 %1210 }
 0x57d   :  { %v1222_v7 = vsel %vm1089_vm12, %v1211_v6, 0.0 }
 0x57e   :  { %1223 = vadd.xlane.f32.xlu0 %v1222_v7 }
 0x580   :  { %v1213_v8 = vpop.permute.xlu0 %1212  ;;  %v1337_v9 = vpop.permute.xlu1 %1336 }
 0x581   :  { %v1225_v10 = vsel %vm1089_vm12, %v1213_v8, 0.0  ;;  %v1348_v11 = vsel %vm1089_vm12, %v1337_v9, 0.0 }
 0x582   :  { %1226 = vadd.xlane.f32.xlu1 %v1225_v10  ;;  %1349 = vadd.xlane.f32.xlu0 %v1348_v11 }
 0x584   :  { %v1339_v12 = vpop.permute.xlu0 %1338  ;;  %v1463_v13 = vpop.permute.xlu1 %1462 }
 0x585   :  { %v1351_v14 = vsel %vm1089_vm12, %v1339_v12, 0.0  ;;  %v1474_v15 = vsel %vm1089_vm12, %v1463_v13, 0.0 }
 0x586   :  { %1352 = vadd.xlane.f32.xlu1 %v1351_v14  ;;  %1475 = vadd.xlane.f32.xlu0 %v1474_v15 }
 0x588   :  { %v1465_v16 = vpop.permute.xlu0 %1464  ;;  %v1215_v18 = vpop.permute.xlu1 %1214 }
 0x589   :  { %v1477_v19 = vsel %vm1089_vm12, %v1465_v16, 0.0  ;;  %v1228_v20 = vsel %vm1089_vm12, %v1215_v18, 0.0 }
 0x58a   :  { %1478 = vadd.xlane.f32.xlu1 %v1477_v19  ;;  %1229 = vadd.xlane.f32.xlu0 %v1228_v20 }
 0x58c   :  { %v1217_v21 = vpop.permute.xlu0 %1216  ;;  %v1341_v22 = vpop.permute.xlu1 %1340 }
 0x58d   :  { %v1231_v23 = vsel %vm1099_vm13, %v1217_v21, 0.0  ;;  %v1354_v29 = vsel %vm1089_vm12, %v1341_v22, 0.0 }
 0x58e   :  { %1232 = vadd.xlane.f32.xlu1 %v1231_v23  ;;  %1355 = vadd.xlane.f32.xlu0 %v1354_v29 }
 0x590   :  { %v1343_v30 = vpop.permute.xlu0 %1342  ;;  %v1467_v31 = vpop.permute.xlu1 %1466 }
 0x591   :  { %v1357_v33 = vsel %vm1099_vm13, %v1343_v30, 0.0  ;;  %v1480_v35 = vsel %vm1089_vm12, %v1467_v31, 0.0 }
 0x592   :  { %1358 = vadd.xlane.f32.xlu1 %v1357_v33  ;;  %1481 = vadd.xlane.f32.xlu0 %v1480_v35 }
 0x594   :  { %v1469_v37 = vpop.permute.xlu0 %1468 }
 0x595   :  { %v1483_v38 = vsel %vm1099_vm13, %v1469_v37, 0.0 }
 0x596   :  { %1484 = vadd.xlane.f32.xlu1 %v1483_v38 }
 0x5ce   :  { %v5100_v48 = vpop.xlane.xlu0 %1094 }
 0x5cf   :  { %v1104_v52 = vmul.f32 %v5100_v48, %v4959_v32  ;;  %v5107_v53 = vpop.xlane.xlu1 %1091 }
 0x5d0   :  { %v1103_v55 = vmul.f32 %v5107_v53, %v4926_v17 }
 0x5d1   :  { %v1108_v57 = vsub.f32 %v1104_v52, %v5098_v47 }
 0x5d2   :  { %v1107_v58 = vsub.f32 %v1103_v55, %v5102_v50  ;;  %v5115_v59 = vpop.xlane.xlu0 %1097 }
 0x5d3   :  { %v1105_v61 = vmul.f32 %v5115_v59, %v4963_v34  ;;  %v5121_v62 = vpop.xlane.xlu1 %1101  ;;  %v1112_v3 = vsel %vm729_vm10, %v1108_v57, -inf }
 0x5d4   :  { %v1106_v63 = vmul.f32 %v5121_v62, %v4973_v36  ;;  %v1111_v4 = vsel %vm729_vm10, %v1107_v58, -inf }
 0x5d5   :  { %v1109_v2 = vsub.f32 %v1105_v61, %v5111_v56  ;;  %v1116_v8 = vmax.f32 %v1111_v4, %v1112_v3 }
 0x5d6   :  { %v1110_v5 = vsub.f32 %v1106_v63, %v5117_v60 }
 0x5d7   :  { %v1113_v6 = vsel %vm729_vm10, %v1109_v2, -inf }
 0x5d8   :  { %v1115_v7 = vsel %vm1114_vm14, %v1110_v5, -inf }
 0x5d9   :  { %v1117_v9 = vmax.f32 %v1113_v6, %v1115_v7 }
 0x5db   :  { %v1118_v10 = vmax.f32 %v1116_v8, %v1117_v9 }
 0x5dd   :  { %v1119_v11 = vrot.slane %v1118_v10, 4 }
 0x5df   :  { %v1120_v12 = vmax.f32 %v1118_v10, %v1119_v11 }
 0x5e1   :  { %v1121_v13 = vrot.slane %v1120_v12, 2 }
 0x5e3   :  { %v1122_v14 = vmax.f32 %v1120_v12, %v1121_v13 }
 0x5e5   :  { %v1123_v15 = vrot.slane %v1122_v14, 1 }
 0x5e7   :  { %v1124_v16 = vmax.f32 %v1122_v14, %v1123_v15 }
 0x5e9   :  { %v1126_v18 = vmul.f32 %v1124_v16, %v4959_v32  ;;  %v1125_v19 = vmul.f32 %v1124_v16, %v4926_v17  ;;  %v1128_v20 = vmul.f32 %v1124_v16, %v4973_v36  ;;  %v1127_v21 = vmul.f32 %v1124_v16, %v4963_v34 }
 0x5eb   :  { %v1130_v22 = vsub.f32 %v1126_v18, %v5098_v47  ;;  %v1129_v23 = vsub.f32 %v1125_v19, %v5102_v50  ;;  %v1132_v31 = vsub.f32 %v1128_v20, %v5117_v60  ;;  %v1131_v33 = vsub.f32 %v1127_v21, %v5111_v56 }
 0x5ed   :  { %v1136_v29 = vsel %vm729_vm10, %v1130_v22, -inf  ;;  %v1133_v30 = vsel %vm729_vm10, %v1129_v23, -inf  ;;  %v1142_v35 = vsel %vm1114_vm14, %v1132_v31, -inf  ;;  %v1139_v37 = vsel %vm729_vm10, %v1131_v33, -inf }
 0x5ee   :  { %1137 = vmax.xlane.f32.xlu1 %v1136_v29  ;;  %1134 = vmax.xlane.f32.xlu0 %v1133_v30 }
 0x5f2   :  { %1143 = vmax.xlane.f32.xlu1 %v1142_v35  ;;  %1140 = vmax.xlane.f32.xlu0 %v1139_v37 }
 0x60b   :  { %v5143_v38 = vpop.xlane.xlu0 %1223 }
 0x60c   :  { %v1234_v55 = vmul.f32 %v5143_v38, %v4926_v17 }
 0x60e   :  { %v1238_v3 = vsub.f32 %v1234_v55, %v5102_v50 }
 0x60f   :  { %v5145_v39 = vpop.xlane.xlu0 %1349  ;;  %v5147_v41 = vpop.xlane.xlu1 %1226 }
 0x610   :  { %v1235_v52 = vmul.f32 %v5147_v41, %v4959_v32  ;;  %v1360_v4 = vmul.f32 %v5145_v39, %v4926_v17  ;;  %v1242_v14 = vsel %vm729_vm10, %v1238_v3, -inf }
 0x612   :  { %v1239_v63 = vsub.f32 %v1235_v52, %v5098_v47  ;;  %v1364_v15 = vsub.f32 %v1360_v4, %v5102_v50 }
 0x613   :  { %v5149_v43 = vpop.xlane.xlu0 %1475  ;;  %v5151_v42 = vpop.xlane.xlu1 %1352 }
 0x614   :  { %v1361_v2 = vmul.f32 %v5151_v42, %v4959_v32  ;;  %v1243_v10 = vsel %vm729_vm10, %v1239_v63, -inf  ;;  %v1486_v16 = vmul.f32 %v5149_v43, %v4926_v17  ;;  %v1368_v52 = vsel %vm729_vm10, %v1364_v15, -inf }
 0x615   :  { %v1246_v30 = vmax.f32 %v1242_v14, %v1243_v10 }
 0x616   :  { %v1365_v11 = vsub.f32 %v1361_v2, %v5098_v47  ;;  %v1490_v55 = vsub.f32 %v1486_v16, %v5102_v50 }
 0x617   :  { %v5157_v57 = vpop.xlane.xlu0 %1229  ;;  %v5159_v58 = vpop.xlane.xlu1 %1478 }
 0x618   :  { %v1236_v61 = vmul.f32 %v5157_v57, %v4963_v34  ;;  %v1487_v12 = vmul.f32 %v5159_v58, %v4959_v32  ;;  %v1369_v33 = vsel %vm729_vm10, %v1365_v11, -inf  ;;  %v1494_v15 = vsel %vm729_vm10, %v1490_v55, -inf }
 0x61a   :  { %v1240_v5 = vsub.f32 %v1236_v61, %v5111_v56  ;;  %v1491_v35 = vsub.f32 %v1487_v12, %v5098_v47 }
 0x61b   :  { %v5170_v6 = vpop.xlane.xlu0 %1355  ;;  %v5172_v7 = vpop.xlane.xlu1 %1232 }
 0x61c   :  { %v1362_v8 = vmul.f32 %v5170_v6, %v4963_v34  ;;  %v1237_v9 = vmul.f32 %v5172_v7, %v4973_v36  ;;  %v1244_v18 = vsel %vm729_vm10, %v1240_v5, -inf  ;;  %v1495_v11 = vsel %vm729_vm10, %v1491_v35, -inf }
 0x61e   :  { %v1241_v13 = vsub.f32 %v1237_v9, %v5117_v60  ;;  %v1366_v21 = vsub.f32 %v1362_v8, %v5111_v56  ;;  %v1372_v8 = vmax.f32 %v1368_v52, %v1369_v33 }
 0x61f   :  { %v5188_v19 = vpop.xlane.xlu0 %1481  ;;  %v5190_v20 = vpop.xlane.xlu1 %1358 }
 0x620   :  { %v1245_v22 = vsel %vm1114_vm14, %v1241_v13, -inf  ;;  %v1488_v23 = vmul.f32 %v5188_v19, %v4963_v34  ;;  %v1363_v29 = vmul.f32 %v5190_v20, %v4973_v36  ;;  %v1370_v2 = vsel %vm729_vm10, %v1366_v21, -inf }
 0x621   :  { %v1247_v31 = vmax.f32 %v1244_v18, %v1245_v22  ;;  %v1498_v21 = vmax.f32 %v1494_v15, %v1495_v11 }
 0x622   :  { %v1367_v37 = vsub.f32 %v1363_v29, %v5117_v60  ;;  %v1492_v3 = vsub.f32 %v1488_v23, %v5111_v56 }
 0x623   :  { %v1248_v61 = vmax.f32 %v1246_v30, %v1247_v31  ;;  %v5203_v63 = vpop.xlane.xlu1 %1484 }
 0x624   :  { %v1371_v4 = vsel %vm1114_vm14, %v1367_v37, -inf  ;;  %v1489_v5 = vmul.f32 %v5203_v63, %v4973_v36  ;;  %v1496_v16 = vsel %vm729_vm10, %v1492_v3, -inf }
 0x625   :  { %v1249_v9 = vrot.slane %v1248_v61, 4  ;;  %v1373_v10 = vmax.f32 %v1370_v2, %v1371_v4 }
 0x626   :  { %v1493_v12 = vsub.f32 %v1489_v5, %v5117_v60 }
 0x627   :  { %v1250_v13 = vmax.f32 %v1248_v61, %v1249_v9  ;;  %v1374_v14 = vmax.f32 %v1372_v8, %v1373_v10 }
 0x628   :  { %v1497_v18 = vsel %vm1114_vm14, %v1493_v12, -inf }
 0x629   :  { %v1251_v22 = vrot.slane %v1250_v13, 2  ;;  %v1375_v23 = vrot.slane %v1374_v14, 4  ;;  %v1499_v29 = vmax.f32 %v1496_v16, %v1497_v18 }
 0x62b   :  { %v1376_v30 = vmax.f32 %v1374_v14, %v1375_v23  ;;  %v1500_v31 = vmax.f32 %v1498_v21, %v1499_v29  ;;  %v1252_v33 = vmax.f32 %v1250_v13, %v1251_v22 }
 0x62d   :  { %v1377_v37 = vrot.slane %v1376_v30, 2  ;;  %v1501_v52 = vrot.slane %v1500_v31, 4  ;;  %v1253_v35 = vrot.slane %v1252_v33, 1 }
 0x62f   :  { %v1502_v2 = vmax.f32 %v1500_v31, %v1501_v52  ;;  %v1254_v4 = vmax.f32 %v1252_v33, %v1253_v35  ;;  %v1378_v61 = vmax.f32 %v1376_v30, %v1377_v37 }
 0x631   :  { %v1503_v5 = vrot.slane %v1502_v2, 2  ;;  %v1256_v55 = vmul.f32 %v1254_v4, %v4959_v32  ;;  %v1255_v3 = vmul.f32 %v1254_v4, %v4926_v17  ;;  %v1379_v8 = vrot.slane %v1378_v61, 1 }
 0x632   :  { %v1257_v13 = vmul.f32 %v1254_v4, %v4963_v34 }
 0x633   :  { %v1260_v9 = vsub.f32 %v1256_v55, %v5098_v47  ;;  %v1259_v10 = vsub.f32 %v1255_v3, %v5102_v50  ;;  %v1380_v11 = vmax.f32 %v1378_v61, %v1379_v8  ;;  %v1504_v12 = vmax.f32 %v1502_v2, %v1503_v5 }
 0x634   :  { %v1261_v33 = vsub.f32 %v1257_v13, %v5111_v56 }
 0x635   :  { %v1266_v14 = vsel %vm729_vm10, %v1260_v9, -inf  ;;  %v1263_v15 = vsel %vm729_vm10, %v1259_v10, -inf  ;;  %v1382_v16 = vmul.f32 %v1380_v11, %v4959_v32  ;;  %v1381_v18 = vmul.f32 %v1380_v11, %v4926_v17 }
 0x636   :  { %1267 = vmax.xlane.f32.xlu1 %v1266_v14  ;;  %1264 = vmax.xlane.f32.xlu0 %v1263_v15  ;;  %v1505_v21 = vrot.slane %v1504_v12, 1  ;;  %v1383_v35 = vmul.f32 %v1380_v11, %v4963_v34  ;;  %v1269_v61 = vsel %vm729_vm10, %v1261_v33, -inf  ;;  %v1258_v9 = vmul.f32 %v1254_v4, %v4973_v36 }
 0x637   :  { %v1386_v22 = vsub.f32 %v1382_v16, %v5098_v47  ;;  %v1385_v23 = vsub.f32 %v1381_v18, %v5102_v50  ;;  %v1384_v16 = vmul.f32 %v1380_v11, %v4973_v36 }
 0x638   :  { %v1506_v29 = vmax.f32 %v1504_v12, %v1505_v21  ;;  %v1387_v8 = vsub.f32 %v1383_v35, %v5111_v56  ;;  %v1262_v15 = vsub.f32 %v1258_v9, %v5117_v60 }
 0x639   :  { %v1392_v30 = vsel %vm729_vm10, %v1386_v22, -inf  ;;  %v1389_v31 = vsel %vm729_vm10, %v1385_v23, -inf  ;;  %v1388_v22 = vsub.f32 %v1384_v16, %v5117_v60 }
 0x63a   :  { %1393 = vmax.xlane.f32.xlu1 %v1392_v30  ;;  %1390 = vmax.xlane.f32.xlu0 %v1389_v31  ;;  %v1507_v37 = vmul.f32 %v1506_v29, %v4926_v17  ;;  %v1508_v52 = vmul.f32 %v1506_v29, %v4959_v32  ;;  %v1509_v55 = vmul.f32 %v1506_v29, %v4963_v34  ;;  %v1395_v14 = vsel %vm729_vm10, %v1387_v8, -inf }
 0x63b   :  { %v1510_v13 = vmul.f32 %v1506_v29, %v4973_v36  ;;  %v1272_v4 = vsel %vm1114_vm14, %v1262_v15, -inf  ;;  %v1398_v29 = vsel %vm1114_vm14, %v1388_v22, -inf }
 0x63c   :  { %v1511_v2 = vsub.f32 %v1507_v37, %v5102_v50  ;;  %v1512_v5 = vsub.f32 %v1508_v52, %v5098_v47  ;;  %v1513_v12 = vsub.f32 %v1509_v55, %v5111_v56 }
 0x63d   :  { %v1514_v21 = vsub.f32 %v1510_v13, %v5117_v60 }
 0x63e   :  { %1270 = vmax.xlane.f32.xlu1 %v1269_v61  ;;  %v1515_v3 = vsel %vm729_vm10, %v1511_v2, -inf  ;;  %v1518_v10 = vsel %vm729_vm10, %v1512_v5, -inf  ;;  %v1521_v18 = vsel %vm729_vm10, %v1513_v12, -inf }
 0x63f   :  { %1516 = vmax.xlane.f32.xlu0 %v1515_v3  ;;  %v1524_v23 = vsel %vm1114_vm14, %v1514_v21, -inf }
 0x642   :  { %1519 = vmax.xlane.f32.xlu1 %v1518_v10 }
 0x643   :  { %1396 = vmax.xlane.f32.xlu0 %v1395_v14 }
 0x646   :  { %1522 = vmax.xlane.f32.xlu1 %v1521_v18 }
 0x647   :  { %1273 = vmax.xlane.f32.xlu0 %v1272_v4 }
 0x64a   :  { %1525 = vmax.xlane.f32.xlu1 %v1524_v23 }
 0x64b   :  { %1399 = vmax.xlane.f32.xlu0 %v1398_v29 }
 0x67b   :  { %v1135_v30 = vpop.xlane.xlu0 %1134  ;;  %v1138_v31 = vpop.xlane.xlu1 %1137 }
 0x67c   :  { %v1145_v11 = vsub.f32 %v5107_v53, %v1135_v30  ;;  %v1146_v33 = vsub.f32 %v5100_v48, %v1138_v31 }
 0x67e   :  { %v1149_v37 = vmul.f32 1.442695, %v1145_v11  ;;  %v1151_v52 = vmul.f32 1.442695, %v1146_v33 }
 0x67f   :  { %v1141_v35 = vpop.xlane.xlu0 %1140  ;;  %v1144_v2 = vpop.xlane.xlu1 %1143 }
 0x680   :  { %4629 = vpow2.f32 %v1149_v37  ;;  %v1147_v61 = vsub.f32 %v5115_v59, %v1141_v35  ;;  %v1148_v5 = vsub.f32 %v5121_v62, %v1144_v2 }
 0x681   :  { %4631 = vpow2.f32 %v1151_v52 }
 0x682   :  { %v1153_v55 = vmul.f32 1.442695, %v1147_v61  ;;  %v1155_v3 = vmul.f32 1.442695, %v1148_v5 }
 0x684   :  { %4633 = vpow2.f32 %v1153_v55 }
 0x685   :  { %4635 = vpow2.f32 %v1155_v3 }
 0x68a   :  { %v5255_v8 = vpop.eup %4629 }
 0x68b   :  { %v5257_v9 = vpop.eup %4631  ;;  %v1157_v48 = vmul.f32 %v5255_v8, %v4926_v17 }
 0x68c   :  { %v1158_v53 = vmul.f32 %v5257_v9, %v4959_v32 }
 0x68d   :  { %v1161_v10 = vsel %vm729_vm10, %v1157_v48, 0.0 }
 0x68e   :  { %v5264_v59 = vpop.eup %4633  ;;  %v1162_v62 = vsel %vm729_vm10, %v1158_v53, 0.0 }
 0x68f   :  { %v5267_v12 = vpop.eup %4635  ;;  %v1159_v13 = vmul.f32 %v5264_v59, %v4963_v34  ;;  %v1163_v14 = vadd.f32 %v1162_v62, %v1161_v10 }
 0x690   :  { %v1160_v15 = vmul.f32 %v5267_v12, %v4973_v36 }
 0x691   :  { %v1164_v16 = vsel %vm729_vm10, %v1159_v13, 0.0 }
 0x692   :  { %v1165_v18 = vadd.f32 %v1164_v16, %v1163_v14  ;;  %v1166_v21 = vsel %vm1114_vm14, %v1160_v15, 0.0 }
 0x694   :  { %v1167_v4 = vadd.f32 %v1166_v21, %v1165_v18 }
 0x696   :  { %v1168_v22 = vrot.slane %v1167_v4, 4 }
 0x698   :  { %v1169_v23 = vadd.f32 %v1168_v22, %v1167_v4 }
 0x69a   :  { %v1170_v29 = vrot.slane %v1169_v23, 2 }
 0x69c   :  { %v1171_v30 = vadd.f32 %v1170_v29, %v1169_v23 }
 0x69e   :  { %v1172_v31 = vrot.slane %v1171_v30, 1 }
 0x6a0   :  { %v1173_v11 = vadd.f32 %v1172_v31, %v1171_v30 }
 0x6a2   :  { %v1175_v33 = vmul.f32 %v1173_v11, %v4959_v32  ;;  %v1174_v37 = vmul.f32 %v1173_v11, %v4926_v17  ;;  %v1177_v2 = vmul.f32 %v1173_v11, %v4973_v36  ;;  %v1176_v61 = vmul.f32 %v1173_v11, %v4963_v34 }
 0x6a4   :  { %v1181_v52 = vsel %vm729_vm10, %v1175_v33, 0.0  ;;  %v1178_v35 = vsel %vm729_vm10, %v1174_v37, 0.0  ;;  %v1187_v5 = vsel %vm1114_vm14, %v1177_v2, 0.0  ;;  %v1184_v55 = vsel %vm729_vm10, %v1176_v61, 0.0 }
 0x6a5   :  { %1182 = vadd.xlane.f32.xlu1 %v1181_v52  ;;  %1179 = vadd.xlane.f32.xlu0 %v1178_v35 }
 0x6a9   :  { %1188 = vadd.xlane.f32.xlu1 %v1187_v5  ;;  %1185 = vadd.xlane.f32.xlu0 %v1184_v55 }
 0x6c3   :  { %v1265_v3 = vpop.xlane.xlu0 %1264  ;;  %v1268_v48 = vpop.xlane.xlu1 %1267 }
 0x6c4   :  { %v1275_v53 = vsub.f32 %v5143_v38, %v1265_v3  ;;  %v1276_v10 = vsub.f32 %v5147_v41, %v1268_v48 }
 0x6c6   :  { %v1279_v15 = vmul.f32 1.442695, %v1275_v53  ;;  %v1281_v18 = vmul.f32 1.442695, %v1276_v10 }
 0x6c7   :  { %v1391_v62 = vpop.xlane.xlu0 %1390  ;;  %v1394_v13 = vpop.xlane.xlu1 %1393 }
 0x6c8   :  { %v1401_v14 = vsub.f32 %v5145_v39, %v1391_v62  ;;  %v1402_v16 = vsub.f32 %v5151_v42, %v1394_v13  ;;  %4637 = vpow2.f32 %v1279_v15 }
 0x6c9   :  { %4639 = vpow2.f32 %v1281_v18 }
 0x6ca   :  { %v1405_v4 = vmul.f32 1.442695, %v1401_v14  ;;  %v1407_v30 = vmul.f32 1.442695, %v1402_v16 }
 0x6cb   :  { %v1271_v21 = vpop.xlane.xlu1 %1270 }
 0x6cc   :  { %v1517_v22 = vpop.xlane.xlu0 %1516  ;;  %v1277_v23 = vsub.f32 %v5157_v57, %v1271_v21  ;;  %4641 = vpow2.f32 %v1405_v4 }
 0x6cd   :  { %v1527_v29 = vsub.f32 %v5149_v43, %v1517_v22 }
 0x6ce   :  { %v1283_v38 = vmul.f32 1.442695, %v1277_v23 }
 0x6cf   :  { %v1531_v41 = vmul.f32 1.442695, %v1527_v29  ;;  %v1520_v31 = vpop.xlane.xlu1 %1519 }
 0x6d0   :  { %v1397_v11 = vpop.xlane.xlu0 %1396  ;;  %v1528_v39 = vsub.f32 %v5159_v58, %v1520_v31  ;;  %4643 = vpow2.f32 %v1283_v38 }
 0x6d1   :  { %v1403_v42 = vsub.f32 %v5170_v6, %v1397_v11  ;;  %4645 = vpow2.f32 %v1407_v30 }
 0x6d2   :  { %v1533_v33 = vmul.f32 1.442695, %v1528_v39  ;;  %4647 = vpow2.f32 %v1531_v41  ;;  %v5293_v55 = vpop.eup %4637 }
 0x6d3   :  { %v1409_v37 = vmul.f32 1.442695, %v1403_v42  ;;  %v1523_v57 = vpop.xlane.xlu1 %1522  ;;  %v5296_v3 = vpop.eup %4639  ;;  %v1287_v13 = vmul.f32 %v5293_v55, %v4926_v17 }
 0x6d4   :  { %4649 = vpow2.f32 %v1533_v33  ;;  %v1274_v43 = vpop.xlane.xlu0 %1273  ;;  %v1529_v52 = vsub.f32 %v5188_v19, %v1523_v57  ;;  %v1288_v14 = vmul.f32 %v5296_v3, %v4959_v32 }
 0x6d5   :  { %4651 = vpow2.f32 %v1409_v37  ;;  %v1278_v35 = vsub.f32 %v5172_v7, %v1274_v43  ;;  %v1291_v21 = vsel %vm729_vm10, %v1287_v13, 0.0 }
 0x6d6   :  { %v1535_v2 = vmul.f32 1.442695, %v1529_v52  ;;  %v5299_v53 = vpop.eup %4641  ;;  %v1292_v4 = vsel %vm729_vm10, %v1288_v14, 0.0 }
 0x6d7   :  { %v1285_v61 = vmul.f32 1.442695, %v1278_v35  ;;  %v1526_v5 = vpop.xlane.xlu1 %1525  ;;  %v1413_v22 = vmul.f32 %v5299_v53, %v4926_v17  ;;  %v1293_v11 = vadd.f32 %v1292_v4, %v1291_v21 }
 0x6d8   :  { %4653 = vpow2.f32 %v1535_v2  ;;  %v1400_v58 = vpop.xlane.xlu0 %1399  ;;  %v1530_v6 = vsub.f32 %v5203_v63, %v1526_v5 }
 0x6d9   :  { %4655 = vpow2.f32 %v1285_v61  ;;  %v1404_v48 = vsub.f32 %v5190_v20, %v1400_v58 }
 0x6da   :  { %v1537_v19 = vmul.f32 1.442695, %v1530_v6  ;;  %v5301_v10 = vpop.eup %4643 }
 0x6db   :  { %v1411_v7 = vmul.f32 1.442695, %v1404_v48  ;;  %v5303_v62 = vpop.eup %4645  ;;  %v1289_v20 = vmul.f32 %v5301_v10, %v4963_v34 }
 0x6dc   :  { %4657 = vpow2.f32 %v1537_v19  ;;  %v5309_v63 = vpop.eup %4647  ;;  %v1414_v23 = vmul.f32 %v5303_v62, %v4959_v32 }
 0x6dd   :  { %4659 = vpow2.f32 %v1411_v7  ;;  %v1539_v29 = vmul.f32 %v5309_v63, %v4926_v17  ;;  %v1294_v38 = vsel %vm729_vm10, %v1289_v20, 0.0 }
 0x6de   :  { %v5311_v15 = vpop.eup %4649  ;;  %v1418_v33 = vsel %vm729_vm10, %v1414_v23, 0.0  ;;  %v1295_v57 = vadd.f32 %v1294_v38, %v1293_v11 }
 0x6df   :  { %v5315_v16 = vpop.eup %4651  ;;  %v1540_v18 = vmul.f32 %v5311_v15, %v4959_v32  ;;  %v1417_v32 = vsel %vm729_vm10, %v1413_v22, 0.0  ;;  %v1543_v37 = vsel %vm729_vm10, %v1539_v29, 0.0 }
 0x6e0   :  { %v1415_v41 = vmul.f32 %v5315_v16, %v4963_v34  ;;  %v1419_v5 = vadd.f32 %v1418_v33, %v1417_v32 }
 0x6e1   :  { %v1544_v39 = vsel %vm729_vm10, %v1540_v18, 0.0 }
 0x6e2   :  { %v5327_v30 = vpop.eup %4653  ;;  %v1420_v35 = vsel %vm729_vm10, %v1415_v41, 0.0  ;;  %v1545_v2 = vadd.f32 %v1544_v39, %v1543_v37 }
 0x6e3   :  { %v5332_v31 = vpop.eup %4655  ;;  %v1541_v42 = vmul.f32 %v5327_v30, %v4963_v34  ;;  %v1421_v7 = vadd.f32 %v1420_v35, %v1419_v5  ;;  %v5360_v35 = vld [vmem:[%s4923_s20] sm:$0xff] }
 0x6e4   :  { %v1290_v17 = vmul.f32 %v5332_v31, %v4973_v36 }
 0x6e5   :  { %v1546_v43 = vsel %vm729_vm10, %v1541_v42, 0.0 }
 0x6e6   :  { %v5343_v52 = vpop.eup %4657  ;;  %v1296_v61 = vsel %vm1114_vm14, %v1290_v17, 0.0  ;;  %v1547_v48 = vadd.f32 %v1546_v43, %v1545_v2 }
 0x6e7   :  { %v5347_v34 = vpop.eup %4659  ;;  %v1542_v58 = vmul.f32 %v5343_v52, %v4973_v36  ;;  %v1297_v6 = vadd.f32 %v1296_v61, %v1295_v57  ;;  %v5356_v57 = vld [vmem:[%s4923_s20 + $0x8] sm:$0xff] }
 0x6e8   :  { %v1416_v19 = vmul.f32 %v5347_v34, %v4973_v36 }
 0x6e9   :  { %v1548_v13 = vsel %vm1114_vm14, %v1542_v58, 0.0  ;;  %v1298_v14 = vrot.slane %v1297_v6, 4 }
 0x6ea   :  { %v1422_v20 = vsel %vm1114_vm14, %v1416_v19, 0.0  ;;  %v1549_v18 = vadd.f32 %v1548_v13, %v1547_v48 }
 0x6eb   :  { %v1299_v21 = vadd.f32 %v1298_v14, %v1297_v6  ;;  %v1423_v4 = vadd.f32 %v1422_v20, %v1421_v7 }
 0x6ec   :  { %v1550_v22 = vrot.slane %v1549_v18, 4 }
 0x6ed   :  { %v1300_v23 = vrot.slane %v1299_v21, 2  ;;  %v1424_v29 = vrot.slane %v1423_v4, 4 }
 0x6ee   :  { %v1551_v38 = vadd.f32 %v1550_v22, %v1549_v18  ;;  %v5374_v22 = vld [vmem:[%s4923_s20 + $0x18] sm:$0xf] }
 0x6ef   :  { %v1301_v41 = vadd.f32 %v1300_v23, %v1299_v21  ;;  %v1425_v11 = vadd.f32 %v1424_v29, %v1423_v4  ;;  %v5378_v29 = vld [vmem:[%s4923_s20 + $0x10] sm:$0xff] }
 0x6f0   :  { %v1552_v39 = vrot.slane %v1551_v38, 2 }
 0x6f1   :  { %v1302_v42 = vrot.slane %v1301_v41, 1  ;;  %v1426_v36 = vrot.slane %v1425_v11, 2 }
 0x6f2   :  { %v1553_v32 = vadd.f32 %v1552_v39, %v1551_v38 }
 0x6f3   :  { %v1303_v33 = vadd.f32 %v1302_v42, %v1301_v41  ;;  %v1427_v17 = vadd.f32 %v1426_v36, %v1425_v11 }
 0x6f4   :  { %v1554_v37 = vrot.slane %v1553_v32, 1 }
 0x6f5   :  { %v1305_v43 = vmul.f32 %v5356_v57, %v1303_v33  ;;  %v1304_v2 = vmul.f32 %v5360_v35, %v1303_v33  ;;  %v1428_v61 = vrot.slane %v1427_v17, 1  ;;  %v1307_v23 = vmul.f32 %v5374_v22, %v1303_v33 }
 0x6f6   :  { %v1555_v48 = vadd.f32 %v1554_v37, %v1553_v32  ;;  %v1306_v38 = vmul.f32 %v5378_v29, %v1303_v33 }
 0x6f7   :  { %v1311_v5 = vsel %vm729_vm10, %v1305_v43, 0.0  ;;  %v1308_v58 = vsel %vm729_vm10, %v1304_v2, 0.0  ;;  %v1429_v6 = vadd.f32 %v1428_v61, %v1427_v17  ;;  %v1317_v41 = vsel %vm1114_vm14, %v1307_v23, 0.0 }
 0x6f8   :  { %1312 = vadd.xlane.f32.xlu1 %v1311_v5  ;;  %1309 = vadd.xlane.f32.xlu0 %v1308_v58  ;;  %v1557_v20 = vmul.f32 %v5356_v57, %v1555_v48  ;;  %v1556_v18 = vmul.f32 %v5360_v35, %v1555_v48  ;;  %v1314_v11 = vsel %vm729_vm10, %v1306_v38, 0.0  ;;  %v1559_v17 = vmul.f32 %v5374_v22, %v1555_v48 }
 0x6f9   :  { %v1431_v19 = vmul.f32 %v5356_v57, %v1429_v6  ;;  %v1430_v7 = vmul.f32 %v5360_v35, %v1429_v6  ;;  %v1433_v39 = vmul.f32 %v5374_v22, %v1429_v6  ;;  %v1432_v42 = vmul.f32 %v5378_v29, %v1429_v6 }
 0x6fa   :  { %v1563_v21 = vsel %vm729_vm10, %v1557_v20, 0.0  ;;  %v1560_v4 = vsel %vm729_vm10, %v1556_v18, 0.0  ;;  %v1558_v33 = vmul.f32 %v5378_v29, %v1555_v48  ;;  %v1569_v37 = vsel %vm1114_vm14, %v1559_v17, 0.0 }
 0x6fb   :  { %v1437_v13 = vsel %vm729_vm10, %v1431_v19, 0.0  ;;  %v1434_v14 = vsel %vm729_vm10, %v1430_v7, 0.0  ;;  %v1443_v36 = vsel %vm1114_vm14, %v1433_v39, 0.0  ;;  %v1440_v32 = vsel %vm729_vm10, %v1432_v42, 0.0 }
 0x6fc   :  { %1438 = vadd.xlane.f32.xlu1 %v1437_v13  ;;  %1435 = vadd.xlane.f32.xlu0 %v1434_v14  ;;  %v1566_v43 = vsel %vm729_vm10, %v1558_v33, 0.0 }
 0x700   :  { %1564 = vadd.xlane.f32.xlu1 %v1563_v21  ;;  %1561 = vadd.xlane.f32.xlu0 %v1560_v4 }
 0x704   :  { %1318 = vadd.xlane.f32.xlu1 %v1317_v41  ;;  %1315 = vadd.xlane.f32.xlu0 %v1314_v11 }
 0x708   :  { %1444 = vadd.xlane.f32.xlu1 %v1443_v36  ;;  %1441 = vadd.xlane.f32.xlu0 %v1440_v32 }
 0x70c   :  { %1570 = vadd.xlane.f32.xlu1 %v1569_v37  ;;  %1567 = vadd.xlane.f32.xlu0 %v1566_v43 }
 0x732   :  { %v1180_v2 = vpop.xlane.xlu0 %1179  ;;  %v1183_v61 = vpop.xlane.xlu1 %1182 }
 0x733   :  { %v1190_v5 = vadd.f32 1e-16, %v1180_v2  ;;  %v1191_v58 = vadd.f32 1e-16, %v1183_v61 }
 0x735   :  { %4661 = vrcp.f32 %v1190_v5 }
 0x736   :  { %4663 = vrcp.f32 %v1191_v58  ;;  %v1186_v6 = vpop.xlane.xlu0 %1185  ;;  %v1189_v19 = vpop.xlane.xlu1 %1188 }
 0x737   :  { %v1192_v7 = vadd.f32 1e-16, %v1186_v6  ;;  %v1193_v13 = vadd.f32 1e-16, %v1189_v19 }
 0x739   :  { %4665 = vrcp.f32 %v1192_v7 }
 0x73a   :  { %4667 = vrcp.f32 %v1193_v13 }
 0x73f   :  { %v4662_v48 = vpop.eup %4661 }
 0x740   :  { %v4664_v14 = vpop.eup %4663  ;;  %v1195_v20 = vmul.f32 %v4662_v48, %v5255_v8 }
 0x741   :  { %v1197_v18 = vmul.f32 %v4664_v14, %v5257_v9 }
 0x742   :  { %v1202_v21 = vmul.f32 %v1195_v20, %v5047_v45 }
 0x743   :  { %v4666_v4 = vpop.eup %4665  ;;  %v1203_v23 = vmul.f32 %v1197_v18, %v5051_v49 }
 0x744   :  { %v4668_v38 = vpop.eup %4667  ;;  %v1199_v41 = vmul.f32 %v4666_v4, %v5264_v59 }
 0x745   :  { %v4539_v11 = vpack.i.bf16 %v1203_v23, %v1202_v21  ;;  %v1201_v39 = vmul.f32 %v4668_v38, %v5267_v12 }
 0x746   :  { %v1204_v42 = vmul.f32 %v1199_v41, %v5055_v51 }
 0x747   :  { %4540 = vrot.lane.b32.xlu0 %v4539_v11, %s4824_s17  ;;  %v1205_v8 = vmul.f32 %v1201_v39, %v5059_v54 }
 0x749   :  { %v4544_v36 = vpack.i.bf16 %v1205_v8, %v1204_v42 }
 0x74b   :  { %4545 = vrot.lane.b32.xlu1 %v4544_v36, %s4824_s17 }
 0x785   :  { %v1310_v9 = vpop.xlane.xlu0 %1309  ;;  %v1313_v32 = vpop.xlane.xlu1 %1312 }
 0x786   :  { %v1320_v17 = vadd.f32 1e-16, %v1310_v9  ;;  %v1321_v33 = vadd.f32 1e-16, %v1313_v32 }
 0x788   :  { %4669 = vrcp.f32 %v1320_v17 }
 0x789   :  { %4671 = vrcp.f32 %v1321_v33  ;;  %v1436_v59 = vpop.xlane.xlu0 %1435  ;;  %v1439_v37 = vpop.xlane.xlu1 %1438 }
 0x78a   :  { %v1446_v43 = vadd.f32 1e-16, %v1436_v59  ;;  %v1447_v12 = vadd.f32 1e-16, %v1439_v37 }
 0x78c   :  { %4673 = vrcp.f32 %v1446_v43 }
 0x78d   :  { %4675 = vrcp.f32 %v1447_v12  ;;  %v1562_v2 = vpop.xlane.xlu0 %1561  ;;  %v1565_v61 = vpop.xlane.xlu1 %1564 }
 0x78e   :  { %v1572_v5 = vadd.f32 1e-16, %v1562_v2  ;;  %v1573_v58 = vadd.f32 1e-16, %v1565_v61 }
 0x790   :  { %4677 = vrcp.f32 %v1572_v5 }
 0x791   :  { %4679 = vrcp.f32 %v1573_v58  ;;  %v1316_v6 = vpop.xlane.xlu0 %1315  ;;  %v1319_v19 = vpop.xlane.xlu1 %1318 }
 0x792   :  { %v4670_v7 = vpop.eup %4669  ;;  %v1322_v13 = vadd.f32 1e-16, %v1316_v6  ;;  %v1323_v48 = vadd.f32 1e-16, %v1319_v19 }
 0x793   :  { %v4672_v14 = vpop.eup %4671  ;;  %v1325_v20 = vmul.f32 %v4670_v7, %v5293_v55 }
 0x794   :  { %4681 = vrcp.f32 %v1322_v13  ;;  %v1327_v18 = vmul.f32 %v4672_v14, %v5296_v3 }
 0x795   :  { %4683 = vrcp.f32 %v1323_v48  ;;  %v1442_v21 = vpop.xlane.xlu0 %1441  ;;  %v1445_v4 = vpop.xlane.xlu1 %1444  ;;  %v1332_v23 = vmul.f32 %v1325_v20, %v5047_v45 }
 0x796   :  { %v4674_v38 = vpop.eup %4673  ;;  %v1448_v41 = vadd.f32 1e-16, %v1442_v21  ;;  %v1449_v11 = vadd.f32 1e-16, %v1445_v4  ;;  %v1333_v39 = vmul.f32 %v1327_v18, %v5051_v49 }
 0x797   :  { %v4676_v42 = vpop.eup %4675  ;;  %v1451_v8 = vmul.f32 %v4674_v38, %v5299_v53  ;;  %v5433_v38 = vld [vmem:[%s5423_s23] sm:$0xff] }
 0x798   :  { %4685 = vrcp.f32 %v1448_v41  ;;  %v4549_v36 = vpack.i.bf16 %v1333_v39, %v1332_v23  ;;  %v1453_v55 = vmul.f32 %v4676_v42, %v5303_v62  ;;  %4133 = vmatprep.mubr.msk.f32.mxu1 %vm1665_vm15, %v5433_v38 }
 0x799   :  { %4687 = vrcp.f32 %v1449_v11  ;;  %v1568_v9 = vpop.xlane.xlu0 %1567  ;;  %v1571_v3 = vpop.xlane.xlu1 %1570  ;;  %v1458_v32 = vmul.f32 %v1451_v8, %v5047_v45 }
 0x79a   :  { %v4678_v17 = vpop.eup %4677  ;;  %v1574_v33 = vadd.f32 1e-16, %v1568_v9  ;;  %4550 = vrot.lane.b32.xlu1 %v4549_v36, %s4824_s17  ;;  %v1575_v59 = vadd.f32 1e-16, %v1571_v3  ;;  %v1459_v37 = vmul.f32 %v1453_v55, %v5051_v49 }
 0x79b   :  { %v4680_v43 = vpop.eup %4679  ;;  %v1577_v12 = vmul.f32 %v4678_v17, %v5309_v63 }
 0x79c   :  { %4689 = vrcp.f32 %v1574_v33  ;;  %v4554_v53 = vpack.i.bf16 %v1459_v37, %v1458_v32  ;;  %v1579_v2 = vmul.f32 %v4680_v43, %v5311_v15 }
 0x79d   :  { %4691 = vrcp.f32 %v1575_v59  ;;  %v1584_v62 = vmul.f32 %v1577_v12, %v5047_v45 }
 0x79e   :  { %v4682_v61 = vpop.eup %4681  ;;  %4555 = vrot.lane.b32.xlu1 %v4554_v53, %s4824_s17  ;;  %v1585_v5 = vmul.f32 %v1579_v2, %v5051_v49 }
 0x79f   :  { %v4684_v58 = vpop.eup %4683  ;;  %v1329_v6 = vmul.f32 %v4682_v61, %v5301_v10 }
 0x7a0   :  { %v4559_v19 = vpack.i.bf16 %v1585_v5, %v1584_v62  ;;  %v1331_v7 = vmul.f32 %v4684_v58, %v5332_v31 }
 0x7a1   :  { %v1334_v63 = vmul.f32 %v1329_v6, %v5055_v51 }
 0x7a2   :  { %v4686_v13 = vpop.eup %4685  ;;  %4560 = vrot.lane.b32.xlu0 %v4559_v19, %s4824_s17  ;;  %v1335_v15 = vmul.f32 %v1331_v7, %v5059_v54 }
 0x7a3   :  { %v4688_v45 = vpop.eup %4687  ;;  %v1455_v49 = vmul.f32 %v4686_v13, %v5315_v16 }
 0x7a4   :  { %v4564_v10 = vpack.i.bf16 %v1335_v15, %v1334_v63  ;;  %v1457_v31 = vmul.f32 %v4688_v45, %v5347_v34 }
 0x7a5   :  { %v1460_v48 = vmul.f32 %v1455_v49, %v5055_v51 }
 0x7a6   :  { %v4690_v14 = vpop.eup %4689  ;;  %4565 = vrot.lane.b32.xlu0 %v4564_v10, %s4824_s17  ;;  %v1461_v20 = vmul.f32 %v1457_v31, %v5059_v54  ;;  %v1750_v10 = vld [vmem:[%s3835_s28] sm:$0xff]  ;;  %v1751_v31 = vld [vmem:[%s3835_s28 + $0x8] sm:$0xff] }
 0x7a7   :  { %v4692_v18 = vpop.eup %4691  ;;  %v1581_v21 = vmul.f32 %v4690_v14, %v5327_v30 }
 0x7a8   :  { %v4569_v4 = vpack.i.bf16 %v1461_v20, %v1460_v48  ;;  %v1583_v23 = vmul.f32 %v4692_v18, %v5343_v52 }
 0x7a9   :  { %v1586_v16 = vmul.f32 %v1581_v21, %v5055_v51 }
 0x7aa   :  { %4570 = vrot.lane.b32.xlu1 %v4569_v4, %s4824_s17  ;;  %v1587_v34 = vmul.f32 %v1583_v23, %v5059_v54  ;;  %v4354_v23 = vpack.c.bf16 %v1751_v31, %v1750_v10 }
 0x7ac   :  { %v4574_v41 = vpack.i.bf16 %v1587_v34, %v1586_v16  ;;  %v1752_v16 = vld [vmem:[%s3835_s28 + $0x10] sm:$0xff]  ;;  %v1753_v34 = vld [vmem:[%s3835_s28 + $0x18] sm:$0xff]  ;;  %s4833_s28 = smov 27  }
 0x7ad   :  { %s3843_s1 = sld [smem:[%s6097_s0 + %s4833_s28]]  }
 0x7ae   :  { %4575 = vrot.lane.b32.xlu0 %v4574_v41, %s4824_s17  ;;  %v181_v41 = vld [vmem:[%s5423_s23 + $0x8] sm:$0xff] }
 0x7b9   :  { %v4541_v39 = vpop.permute.xlu0 %4540 }
 0x7ba   :  { %v4543_v9 = vunpack.i.h.bf16 %v4541_v39  ;;  %v4542_v51 = vunpack.i.l.bf16 %v4541_v39  ;;  %v1845_v39 = vld [vmem:[%s3837_s2 + $0x8] sm:$0xff] }
 0x7bd   :  { %v4546_v11 = vpop.permute.xlu1 %4545 }
 0x7be   :  { %v4548_v19 = vunpack.i.h.bf16 %v4546_v11  ;;  %v4547_v7 = vunpack.i.l.bf16 %v4546_v11  ;;  %v4358_v11 = vpack.c.bf16 %v1753_v34, %v1752_v16 }
 0x80c   :  { %v4551_v30 = vpop.permute.xlu1 %4550 }
 0x80d   :  { %v4553_v8 = vunpack.i.h.bf16 %v4551_v30  ;;  %v4552_v52 = vunpack.i.l.bf16 %v4551_v30  ;;  %v1844_v30 = vld [vmem:[%s3837_s2] sm:$0xff] }
 0x80f   :  { %v1653_v32 = vsel %vm1089_vm12, %v4543_v9, %v4553_v8  ;;  %v1652_v17 = vsel %vm1089_vm12, %v4542_v51, %v4552_v52  ;;  %v3894_v51 = vld [vmem:[%s3836_s6] ss:$0 sm:$0xff]  ;;  %s3855_s6 = sld [smem:[%s6097_s0 + %s4850_s3]]  }
 0x810   :  { %v4556_v42 = vpop.permute.xlu1 %4555 }
 0x811   :  { %v4558_v36 = vunpack.i.h.bf16 %v4556_v42  ;;  %v4557_v55 = vunpack.i.l.bf16 %v4556_v42  ;;  %v4362_v42 = vpack.c.bf16 %v1845_v39, %v1844_v30  ;;  %v4792_v30 = vld [vmem:[%s4934_s25 + $0x18] sm:$0xf] }
 0x813   :  { %v1656_v59 = vsel %vm729_vm10, %v1652_v17, %v4557_v55  ;;  %v1657_v37 = vsel %vm729_vm10, %v1653_v32, %v4558_v36  ;;  %v1846_v36 = vld [vmem:[%s3837_s2 + $0x10] sm:$0xff]  ;;  %v1847_v55 = vld [vmem:[%s3837_s2 + $0x18] sm:$0xff]  ;;  %s3857_s2 = sld [smem:[%s6097_s0 + %s4849_s30]]  }
 0x814   :  { %v4561_v3 = vpop.permute.xlu0 %4560  ;;  %v4366_v9 = vpack.c.bf16 %v1847_v55, %v1846_v36  ;;  %v2152_v55 = vld [vmem:[%s5508_s19 + $0x30] sm:$0xff] }
 0x815   :  { %v4563_v54 = vunpack.i.h.bf16 %v4561_v3  ;;  %v4562_v33 = vunpack.i.l.bf16 %v4561_v3 }
 0x817   :  { %v1661_v43 = vsel %vm1660_vm2, %v1656_v59, %v4562_v33  ;;  %v1662_v12 = vsel %vm1660_vm2, %v1657_v37, %v4563_v54  ;;  %v4789_v37 = vld [vmem:[%s4934_s25] sm:$0xff] }
 0x818   :  { %v4344_v53 = vpack.c.bf16 %v1662_v12, %v1661_v43  ;;  %v4566_v2 = vpop.permute.xlu0 %4565  ;;  %v3897_v43 = vld [vmem:[%s3838_s12] ss:$0 sm:$0xff] }
 0x819   :  { %v4568_v61 = vunpack.i.h.bf16 %v4566_v2  ;;  %v4567_v5 = vunpack.i.l.bf16 %v4566_v2 }
 0x81a   :  { %4345 = vmatprep.subr.bf16.mxu1 %v4344_v53 }
 0x81b   :  { %4347 = vmatpush3.bf16.msra.mxu1 %v4344_v53  ;;  %v1654_v13 = vsel %vm1089_vm12, %v4547_v7, %v4567_v5  ;;  %v1655_v15 = vsel %vm1089_vm12, %v4548_v19, %v4568_v61 }
 0x81c   :  { %v4571_v62 = vpop.permute.xlu1 %4570 }
 0x81d   :  { %v4573_v58 = vunpack.i.h.bf16 %v4571_v62  ;;  %v4572_v6 = vunpack.i.l.bf16 %v4571_v62 }
 0x81f   :  { %v1658_v48 = vsel %vm729_vm10, %v1654_v13, %v4572_v6  ;;  %v1659_v14 = vsel %vm729_vm10, %v1655_v15, %v4573_v58 }
 0x820   :  { %v4576_v63 = vpop.permute.xlu0 %4575 }
 0x821   :  { %v4578_v45 = vunpack.i.h.bf16 %v4576_v63  ;;  %v4577_v49 = vunpack.i.l.bf16 %v4576_v63 }
 0x823   :  { %v1663_v20 = vsel %vm1660_vm2, %v1658_v48, %v4577_v49  ;;  %v1664_v18 = vsel %vm1660_vm2, %v1659_v14, %v4578_v45 }
 0x824   :  { %v4348_v4 = vpack.c.bf16 %v1664_v18, %v1663_v20 }
 0x826   :  { %4350 = vmatprep.subr.msk.bf16.mxu1 %vm5458_vm3, %v4348_v4 }
 0x827   :  { %4353 = vmatpush3.bf16.msk.msra.mxu1 %vm5458_vm3, %v4348_v4 }
 0x828   :  { %4355 = vmatprep.subr.bf16.mxu1 %v4354_v23 }
 0x82a   :  { %4134 = vmatmul.mubr.msk.f32.vlgmr.msra.gmra.mrb[16].mxu1 %vm1665_vm15, %v181_v41  ;;  %v4790_v41 = vld [vmem:[%s4934_s25 + $0x8] sm:$0xff] }
 0x82b   :  { %4357 = vmatpush3.bf16.msra.mxu1 %v4354_v23 }
 0x82c   :  { %4359 = vmatprep.subr.bf16.mxu1 %v4358_v11 }
 0x82f   :  { %4361 = vmatpush3.bf16.msra.mxu1 %v4358_v11  ;;  %v4791_v11 = vld [vmem:[%s4934_s25 + $0x10] sm:$0xff]  ;;  %s4837_s25 = smov 31  }
 0x830   :  { %4363 = vmatprep.subr.bf16.mxu1 %v4362_v42  ;;  %s3847_s24 = sld [smem:[%s6097_s0 + %s4837_s25]]  }
 0x8fd   :  { %v4135_v8 = vpop.f32.mrb[16].mxu1 }
 0x8fe   :  { %v1741_v52 = vpop.f32.mrb[17].mxu1 }
 0x8ff   :  { %4144 = vmatprep.mubr.msk.f32.mxu1 %vm201_vm1, %v1741_v52  ;;  %v2151_v52 = vld [vmem:[%s5508_s19 + $0x28] sm:$0xff] }
 0x900   :  { %4145 = vmatmul.mubr.msk.f32.vlgmr.msra.gmra.mrb[18].mxu1 %vm201_vm1, %v4135_v8  ;;  %v2150_v8 = vld [vmem:[%s5508_s19 + $0x20] sm:$0xff] }
 0x901   :  { %4365 = vmatpush3.bf16.msra.mxu1 %v4362_v42  ;;  %v4385_v36 = vpack.c.bf16 %v2151_v52, %v2150_v8 }
 0x902   :  { %4367 = vmatprep.subr.bf16.mxu1 %v4366_v9 }
 0x905   :  { %4369 = vmatpush3.bf16.msra.mxu1 %v4366_v9  ;;  %v2153_v9 = vld [vmem:[%s5508_s19 + $0x38] sm:$0xff] }
 0x9d3   :  { %v4146_v3 = vpop.f32.mrb[18].mxu1 }
 0x9d4   :  { %v1839_v32 = vadd.f32 %v4146_v3, %v3894_v51  ;;  %v1833_v17 = vpop.f32.mrb[19].mxu1  ;;  %v2154_v3 = vld [vmem:[%s5508_s19 + $0x40] sm:$0xff] }
 0x9d5   :  { %v1834_v54 = vadd.f32 %v3894_v51, %v1833_v17  ;;  %v4388_v51 = vpack.c.bf16 %v2153_v9, %v2152_v55 }
 0x9d6   :  { %v1843_v59 = vmax.f32 %v1839_v32, 0.0  ;;  %v2155_v32 = vld [vmem:[%s5508_s19 + $0x48] sm:$0xff] }
 0x9d7   :  { %v1842_v33 = vmax.f32 %v1834_v54, 0.0  ;;  %v4391_v17 = vpack.c.bf16 %v2155_v32, %v2154_v3  ;;  %v2156_v54 = vld [vmem:[%s5508_s19 + $0x50] sm:$0xff] }
 0x9d9   :  { %4155 = vmatprep.mubr.msk.f32.mxu1 %vm201_vm1, %v1842_v33  ;;  %v2157_v33 = vld [vmem:[%s5508_s19 + $0x58] sm:$0xff] }
 0x9da   :  { %4156 = vmatmul.mubr.msk.f32.vlgmr.msra.gmra.mrb[20].mxu1 %vm201_vm1, %v1843_v59  ;;  %v4394_v59 = vpack.c.bf16 %v2157_v33, %v2156_v54 }
 0x9db   :  { %4162 = vmatprep.mubr.msk.f32.mxu1 %vm729_vm10, %v4789_v37  ;;  %v2158_v37 = vld [vmem:[%s5508_s19 + $0x60] sm:$0xff] }
 0xaad   :  { %v4157_v12 = vpop.f32.mrb[20].mxu1 }
 0xaae   :  { %v1933_v53 = vadd.f32 %v4157_v12, %v3897_v43  ;;  %v1927_v2 = vpop.f32.mrb[21].mxu1 }
 0xaaf   :  { %v1928_v62 = vadd.f32 %v3897_v43, %v1927_v2  ;;  %v2159_v43 = vld [vmem:[%s5508_s19 + $0x68] sm:$0xff]  ;;  %v2161_v2 = vld [vmem:[%s5508_s19 + $0x78] sm:$0xff] }
 0xab0   :  { %v1939_v61 = vmul.f32 %v1933_v53, %v1933_v53  ;;  %v1937_v31 = vmul.f32 0.5, %v1933_v53  ;;  %v4397_v12 = vpack.c.bf16 %v2159_v43, %v2158_v37 }
 0xab1   :  { %v1938_v5 = vmul.f32 %v1928_v62, %v1928_v62  ;;  %v1936_v14 = vmul.f32 0.5, %v1928_v62 }
 0xab2   :  { %v1941_v58 = vmul.f32 %v1939_v61, %v1933_v53  ;;  %v2162_v61 = vld [vmem:[%s5508_s19 + $0x80] sm:$0xff] }
 0xab3   :  { %v1940_v6 = vmul.f32 %v1938_v5, %v1928_v62  ;;  %v2163_v5 = vld [vmem:[%s5508_s19 + $0x88] sm:$0xff] }
 0xab4   :  { %v1943_v19 = vmul.f32 0.044715, %v1941_v58  ;;  %v4403_v58 = vpack.c.bf16 %v2163_v5, %v2162_v61 }
 0xab5   :  { %v1942_v7 = vmul.f32 0.044715, %v1940_v6  ;;  %v2164_v6 = vld [vmem:[%s5508_s19 + $0x90] sm:$0xff] }
 0xab6   :  { %v1945_v63 = vadd.f32 %v1943_v19, %v1933_v53  ;;  %v2160_v53 = vld [vmem:[%s5508_s19 + $0x70] sm:$0xff]  ;;  %v2165_v19 = vld [vmem:[%s5508_s19 + $0x98] sm:$0xff] }
 0xab7   :  { %v1944_v13 = vadd.f32 %v1942_v7, %v1928_v62  ;;  %v4400_v62 = vpack.c.bf16 %v2161_v2, %v2160_v53  ;;  %v4406_v7 = vpack.c.bf16 %v2165_v19, %v2164_v6 }
 0xab8   :  { %v1947_v15 = vmul.f32 0.7978846, %v1945_v63 }
 0xab9   :  { %v1946_v45 = vmul.f32 0.7978846, %v1944_v13 }
 0xaba   :  { %4693 = vtanh.f32 %v1947_v15 }
 0xabb   :  { %4695 = vtanh.f32 %v1946_v45 }
 0xac4   :  { %v4694_v49 = vpop.eup %4693 }
 0xac5   :  { %v4696_v10 = vpop.eup %4695  ;;  %v1951_v48 = vadd.f32 1.0, %v4694_v49 }
 0xac6   :  { %v1950_v20 = vadd.f32 1.0, %v4696_v10 }
 0xac7   :  { %v1953_v18 = vmul.f32 %v1951_v48, %v1937_v31 }
 0xac8   :  { %v1952_v4 = vmul.f32 %v1950_v20, %v1936_v14 }
 0xac9   :  { %v1955_v23 = vsel %vm201_vm1, %v1953_v18, %v4538_v27  ;;  %v2147_v27 = vld [vmem:[%s5508_s19 + $0x8] sm:$0xff] }
 0xaca   :  { %v1954_v16 = vsel %vm201_vm1, %v1952_v4, %v4537_v28  ;;  %v2148_v28 = vld [vmem:[%s5508_s19 + $0x10] sm:$0xff]  ;;  %v4379_v39 = vpack.c.bf16 %v2147_v27, %v2146_v24 }
 0xacb   :  { %v4370_v34 = vpack.c.bf16 %v1955_v23, %v1954_v16 }
 0xacc   :  { %4380 = vmatpush1.bf16.msra.mxu0 %v4379_v39 }
 0xacd   :  { %4371 = vmatprep.subr.bf16.mxu1 %v4370_v34  ;;  %4381 = vmatprep.subr.bf16.mxu0 %v4799_v0 }
 0xace   :  { %4373 = vmatpush3.bf16.msra.mxu1 %v4370_v34 }
 0xacf   :  { %4375 = vmatprep.subr.bf16.mxu1 %v4370_v34 }
 0xad1   :  { %4163 = vmatmul.mubr.msk.f32.vlgmr.msra.gmra.mrb[22].mxu1 %vm729_vm10, %v4790_v41 }
 0xad2   :  { %4377 = vmatpush3.bf16.msra.mxu1 %v4370_v34  ;;  %4165 = vmatprep.mubr.msk.f32.mxu1 %vm729_vm10, %v4791_v11 }
 0xad5   :  { %4166 = vmatmul.mubr.msk.f32.gmra.mrb[24].mxu1 %vm729_vm10, %v4792_v30 }
 0xad6   :  { %4172 = vmatprep.mubr.msk.f32.mxu1 %vm729_vm10, %v5360_v35 }
 0xad9   :  { %4173 = vmatmul.mubr.msk.f32.vlgmr.msra.gmra.mrb[26].mxu1 %vm729_vm10, %v5356_v57 }
 0xada   :  { %4175 = vmatprep.mubr.msk.f32.mxu1 %vm729_vm10, %v5378_v29 }
 0xadd   :  { %4176 = vmatmul.mubr.msk.f32.gmra.mrb[28].mxu1 %vm729_vm10, %v5374_v22 }
 0xade   :  { %4186 = vmatprep.mubr.msk.f32.mxu1 %vm1665_vm15, %v5433_v38  ;;  %v2149_v38 = vld [vmem:[%s5508_s19 + $0x18] sm:$0xff] }
 0xadf   :  { %v4382_v42 = vpack.c.bf16 %v2149_v38, %v2148_v28 }
 0xae1   :  { %4383 = vmatpush1.bf16.msra.mxu0 %v4382_v42 }
 0xae2   :  { %4384 = vmatprep.subr.bf16.mxu0 %v4799_v0 }
 0xae5   :  { %4386 = vmatpush1.bf16.msra.mxu0 %v4385_v36 }
 0xae6   :  { %4387 = vmatprep.subr.bf16.mxu0 %v4799_v0 }
 0xae9   :  { %4389 = vmatpush1.bf16.msra.mxu0 %v4388_v51 }
 0xaea   :  { %4390 = vmatprep.subr.bf16.mxu0 %v4799_v0 }
 0xaed   :  { %4392 = vmatpush1.bf16.msra.mxu0 %v4391_v17 }
 0xaee   :  { %4393 = vmatprep.subr.bf16.mxu0 %v4799_v0 }
 0xaf1   :  { %4395 = vmatpush1.bf16.msra.mxu0 %v4394_v59 }
 0xaf2   :  { %4396 = vmatprep.subr.bf16.mxu0 %v4799_v0 }
 0xaf5   :  { %4398 = vmatpush1.bf16.msra.mxu0 %v4397_v12 }
 0xaf6   :  { %4399 = vmatprep.subr.bf16.mxu0 %v4799_v0 }
 0xaf9   :  { %4401 = vmatpush1.bf16.msra.mxu0 %v4400_v62 }
 0xafa   :  { %4402 = vmatprep.subr.bf16.mxu0 %v4799_v0 }
 0xafd   :  { %4404 = vmatpush1.bf16.msra.mxu0 %v4403_v58 }
 0xafe   :  { %4405 = vmatprep.subr.bf16.mxu0 %v4799_v0 }
 0xb01   :  { %4407 = vmatpush1.bf16.msra.mxu0 %v4406_v7 }
 0xba4   :  { %v4164_v63 = vpop.f32.mrb[22].mxu1 }
 0xba5   :  { %v2022_v13 = vpop.f32.mrb[23].mxu1 }
 0xba8   :  { %v4167_v15 = vpop.f32.mrb[24].mxu1 }
 0xba9   :  { %v2032_v45 = vpop.f32.mrb[25].mxu1 }
 0xbac   :  { %v4174_v49 = vpop.f32.mrb[26].mxu1 }
 0xbad   :  { %2132 = vrot.lane.b32.xlu0 %v4174_v49, %s4819_s8  ;;  %v2107_v10 = vpop.f32.mrb[27].mxu1 }
 0xbae   :  { %2130 = vrot.lane.b32.xlu1 %v2107_v10, %s4819_s8 }
 0xbb0   :  { %v4177_v31 = vpop.f32.mrb[28].mxu1 }
 0xbb1   :  { %2136 = vrot.lane.b32.xlu0 %v4177_v31, %s4819_s8  ;;  %v2117_v48 = vpop.f32.mrb[29].mxu1 }
 0xbb2   :  { %2134 = vrot.lane.b32.xlu1 %v2117_v48, %s4819_s8 }
 0xc1f   :  { %v2133_v18 = vpop.permute.xlu0 %2132 }
 0xc20   :  { %v2131_v14 = vpop.permute.xlu1 %2130  ;;  %v2143_v4 = vsel %vm940_vm11, %v4164_v63, %v2133_v18 }
 0xc21   :  { %v2142_v20 = vsel %vm940_vm11, %v2022_v13, %v2131_v14 }
 0xc22   :  { %2238 = vmatmul.mubr.f32.vlgmr.msra.gmra.mrb[14].mxu0 %v2142_v20 }
 0xc23   :  { %3910 = vmatprep.mubr.msk.f32.mxu0 %vm201_vm1, %v4983_v40  ;;  %v2137_v34 = vpop.permute.xlu0 %2136  ;;  %v3908_v40 = vld [vmem:[%s3840_s27] ss:$0 sm:$0xff]  ;;  %s3852_s27 = sld [smem:[%s6097_s0 + %s4846_s22]]  }
 0xc24   :  { %v2135_v23 = vpop.permute.xlu1 %2134  ;;  %v2145_v41 = vsel %vm940_vm11, %v4167_v15, %v2137_v34 }
 0xc25   :  { %v2144_v16 = vsel %vm940_vm11, %v2032_v45, %v2135_v23 }
 0xc26   :  { %2243 = vmatmul.mubr.f32.gmra.mrb[16].mxu0 %v2143_v4 }
 0xc27   :  { %3911 = vmatprep.mubr.msk.f32.mxu0 %vm201_vm1, %v4991_v46 }
 0xc2a   :  { %2248 = vmatmul.mubr.f32.gmra.mrb[18].mxu0 %v2144_v16 }
 0xc2b   :  { %3912 = vmatprep.mubr.msk.f32.mxu0 %vm201_vm1, %v4989_v44 }
 0xc2e   :  { %2253 = vmatmul.mubr.f32.gmra.mrb[20].mxu0 %v2145_v41 }
 0xcf5   :  { %v2239_v11 = vpop.f32.mrb[14].mxu0 }
 0xcf6   :  { %v5556_v30 = vadd.f32 %v3908_v40, %v2239_v11  ;;  %v2241_v46 = vpop.f32.mrb[15].mxu0 }
 0xcf8   :  { %2262 = vrot.lane.b32.xlu1 %v5556_v30, %s4819_s8 }
 0xcf9   :  { %v2244_v24 = vpop.f32.mrb[16].mxu0 }
 0xcfa   :  { %v5560_v27 = vadd.f32 %v3908_v40, %v2244_v24  ;;  %v2246_v44 = vpop.f32.mrb[17].mxu0 }
 0xcfc   :  { %2264 = vrot.lane.b32.xlu0 %v5560_v27, %s4819_s8 }
 0xcfd   :  { %v2249_v28 = vpop.f32.mrb[18].mxu0 }
 0xcfe   :  { %v5564_v39 = vadd.f32 %v3908_v40, %v2249_v28  ;;  %v2251_v38 = vpop.f32.mrb[19].mxu0 }
 0xd00   :  { %2266 = vrot.lane.b32.xlu1 %v5564_v39, %s4819_s8 }
 0xd01   :  { %v2254_v42 = vpop.f32.mrb[20].mxu0 }
 0xd02   :  { %v5568_v8 = vadd.f32 %v3908_v40, %v2254_v42  ;;  %v2256_v52 = vpop.f32.mrb[21].mxu0 }
 0xd04   :  { %2268 = vrot.lane.b32.xlu0 %v5568_v8, %s4819_s8  ;;  %s3849_s8 = sld [smem:[%s6097_s0 + %s4838_s26]]  }
 0xd6a   :  { %v2263_v36 = vpop.permute.xlu1 %2262 }
 0xd6b   :  { %v2274_v55 = vmul.f32 %v2263_v36, %v5556_v30 }
 0xd6d   :  { %2396 = vrot.lane.b32.xlu1 %v2274_v55, %s4821_s14  ;;  %v2278_v59 = vsel %vm1089_vm12, %v2274_v55, 0.0 }
 0xd6e   :  { %v2265_v9 = vpop.permute.xlu0 %2264 }
 0xd6f   :  { %v2275_v51 = vmul.f32 %v2265_v9, %v5560_v27 }
 0xd71   :  { %2398 = vrot.lane.b32.xlu0 %v2275_v51, %s4821_s14  ;;  %2522 = vrot.lane.b32.xlu1 %v2274_v55, %s4822_s15  ;;  %v2281_v33 = vsel %vm1089_vm12, %v2275_v51, 0.0 }
 0xd72   :  { %v2267_v3 = vpop.permute.xlu1 %2266 }
 0xd73   :  { %v2276_v32 = vmul.f32 %v2267_v3, %v5564_v39 }
 0xd75   :  { %2524 = vrot.lane.b32.xlu0 %v2275_v51, %s4822_s15  ;;  %2648 = vrot.lane.b32.xlu1 %v2274_v55, %s4823_s16  ;;  %v2284_v37 = vsel %vm1089_vm12, %v2276_v32, 0.0 }
 0xd76   :  { %v2269_v17 = vpop.permute.xlu0 %2268 }
 0xd77   :  { %v2277_v54 = vmul.f32 %v2269_v17, %v5568_v8 }
 0xd79   :  { %2650 = vrot.lane.b32.xlu0 %v2275_v51, %s4823_s16  ;;  %2400 = vrot.lane.b32.xlu1 %v2276_v32, %s4821_s14  ;;  %v2287_v43 = vsel %vm1099_vm13, %v2277_v54, 0.0 }
 0xd7d   :  { %2402 = vrot.lane.b32.xlu0 %v2277_v54, %s4821_s14  ;;  %2526 = vrot.lane.b32.xlu1 %v2276_v32, %s4822_s15  ;;  %s4839_s14 = smov 30  }
 0xd7e   :  { %s3846_s29 = sld [smem:[%s6097_s0 + %s4839_s14]]  }
 0xd81   :  { %2528 = vrot.lane.b32.xlu0 %v2277_v54, %s4822_s15  ;;  %2652 = vrot.lane.b32.xlu1 %v2276_v32, %s4823_s16 }
 0xd85   :  { %2654 = vrot.lane.b32.xlu0 %v2277_v54, %s4823_s16 }
 0xda4   :  { %2282 = vadd.xlane.f32.xlu0 %v2281_v33 }
 0xda5   :  { %2279 = vadd.xlane.f32.xlu1 %v2278_v59 }
 0xda8   :  { %2285 = vadd.xlane.f32.xlu0 %v2284_v37 }
 0xda9   :  { %2288 = vadd.xlane.f32.xlu1 %v2287_v43 }
 0xddf   :  { %v2397_v12 = vpop.permute.xlu1 %2396 }
 0xde0   :  { %v2408_v53 = vsel %vm1089_vm12, %v2397_v12, 0.0 }
 0xde1   :  { %2409 = vadd.xlane.f32.xlu0 %v2408_v53 }
 0xde3   :  { %v2399_v2 = vpop.permute.xlu0 %2398  ;;  %v2523_v62 = vpop.permute.xlu1 %2522 }
 0xde4   :  { %v2411_v61 = vsel %vm1089_vm12, %v2399_v2, 0.0  ;;  %v2534_v5 = vsel %vm1089_vm12, %v2523_v62, 0.0 }
 0xde5   :  { %2412 = vadd.xlane.f32.xlu1 %v2411_v61  ;;  %2535 = vadd.xlane.f32.xlu0 %v2534_v5 }
 0xde7   :  { %v2525_v58 = vpop.permute.xlu0 %2524  ;;  %v2649_v6 = vpop.permute.xlu1 %2648 }
 0xde8   :  { %v2537_v19 = vsel %vm1089_vm12, %v2525_v58, 0.0  ;;  %v2660_v7 = vsel %vm1089_vm12, %v2649_v6, 0.0 }
 0xde9   :  { %2538 = vadd.xlane.f32.xlu1 %v2537_v19  ;;  %2661 = vadd.xlane.f32.xlu0 %v2660_v7 }
 0xdeb   :  { %v2651_v63 = vpop.permute.xlu0 %2650  ;;  %v2401_v13 = vpop.permute.xlu1 %2400 }
 0xdec   :  { %v2663_v15 = vsel %vm1089_vm12, %v2651_v63, 0.0  ;;  %v2414_v45 = vsel %vm1089_vm12, %v2401_v13, 0.0 }
 0xded   :  { %2664 = vadd.xlane.f32.xlu1 %v2663_v15  ;;  %2415 = vadd.xlane.f32.xlu0 %v2414_v45 }
 0xdef   :  { %v2403_v49 = vpop.permute.xlu0 %2402  ;;  %v2527_v10 = vpop.permute.xlu1 %2526 }
 0xdf0   :  { %v2417_v31 = vsel %vm1099_vm13, %v2403_v49, 0.0  ;;  %v2540_v48 = vsel %vm1089_vm12, %v2527_v10, 0.0 }
 0xdf1   :  { %2418 = vadd.xlane.f32.xlu1 %v2417_v31  ;;  %2541 = vadd.xlane.f32.xlu0 %v2540_v48 }
 0xdf3   :  { %v2529_v14 = vpop.permute.xlu0 %2528  ;;  %v2653_v20 = vpop.permute.xlu1 %2652 }
 0xdf4   :  { %v2543_v18 = vsel %vm1099_vm13, %v2529_v14, 0.0  ;;  %v2666_v4 = vsel %vm1089_vm12, %v2653_v20, 0.0 }
 0xdf5   :  { %2544 = vadd.xlane.f32.xlu1 %v2543_v18  ;;  %2667 = vadd.xlane.f32.xlu0 %v2666_v4 }
 0xdf7   :  { %v2655_v23 = vpop.permute.xlu0 %2654 }
 0xdf8   :  { %v2669_v16 = vsel %vm1099_vm13, %v2655_v23, 0.0 }
 0xdf9   :  { %2670 = vadd.xlane.f32.xlu1 %v2669_v16 }
 0xe31   :  { %v5604_v34 = vpop.xlane.xlu0 %2282 }
 0xe32   :  { %v2291_v41 = vmul.f32 %v5356_v57, %v5604_v34  ;;  %v5608_v40 = vpop.xlane.xlu1 %2279 }
 0xe33   :  { %v2290_v11 = vmul.f32 %v5360_v35, %v5608_v40 }
 0xe34   :  { %v2295_v46 = vsub.f32 %v2291_v41, %v5098_v47 }
 0xe35   :  { %v2294_v24 = vsub.f32 %v2290_v11, %v5102_v50  ;;  %v5614_v44 = vpop.xlane.xlu0 %2285 }
 0xe36   :  { %v2292_v28 = vmul.f32 %v5378_v29, %v5614_v44  ;;  %v5618_v38 = vpop.xlane.xlu1 %2288  ;;  %v2299_v36 = vsel %vm729_vm10, %v2295_v46, -inf }
 0xe37   :  { %v2293_v42 = vmul.f32 %v5374_v22, %v5618_v38  ;;  %v2298_v55 = vsel %vm729_vm10, %v2294_v24, -inf }
 0xe38   :  { %v2296_v52 = vsub.f32 %v2292_v28, %v5111_v56  ;;  %v2302_v32 = vmax.f32 %v2298_v55, %v2299_v36 }
 0xe39   :  { %v2297_v9 = vsub.f32 %v2293_v42, %v5117_v60 }
 0xe3a   :  { %v2300_v51 = vsel %vm729_vm10, %v2296_v52, -inf }
 0xe3b   :  { %v2301_v3 = vsel %vm1114_vm14, %v2297_v9, -inf }
 0xe3c   :  { %v2303_v17 = vmax.f32 %v2300_v51, %v2301_v3 }
 0xe3e   :  { %v2304_v54 = vmax.f32 %v2302_v32, %v2303_v17 }
 0xe40   :  { %v2305_v33 = vrot.slane %v2304_v54, 4 }
 0xe42   :  { %v2306_v59 = vmax.f32 %v2304_v54, %v2305_v33 }
 0xe44   :  { %v2307_v37 = vrot.slane %v2306_v59, 2 }
 0xe46   :  { %v2308_v43 = vmax.f32 %v2306_v59, %v2307_v37 }
 0xe48   :  { %v2309_v12 = vrot.slane %v2308_v43, 1 }
 0xe4a   :  { %v2310_v53 = vmax.f32 %v2308_v43, %v2309_v12 }
 0xe4c   :  { %v2312_v2 = vmul.f32 %v5356_v57, %v2310_v53  ;;  %v2311_v62 = vmul.f32 %v5360_v35, %v2310_v53  ;;  %v2314_v61 = vmul.f32 %v5374_v22, %v2310_v53  ;;  %v2313_v5 = vmul.f32 %v5378_v29, %v2310_v53 }
 0xe4e   :  { %v2316_v58 = vsub.f32 %v2312_v2, %v5098_v47  ;;  %v2315_v6 = vsub.f32 %v2311_v62, %v5102_v50  ;;  %v2318_v63 = vsub.f32 %v2314_v61, %v5117_v60  ;;  %v2317_v13 = vsub.f32 %v2313_v5, %v5111_v56 }
 0xe50   :  { %v2322_v19 = vsel %vm729_vm10, %v2316_v58, -inf  ;;  %v2319_v7 = vsel %vm729_vm10, %v2315_v6, -inf  ;;  %v2328_v15 = vsel %vm1114_vm14, %v2318_v63, -inf  ;;  %v2325_v45 = vsel %vm729_vm10, %v2317_v13, -inf }
 0xe51   :  { %2323 = vmax.xlane.f32.xlu1 %v2322_v19  ;;  %2320 = vmax.xlane.f32.xlu0 %v2319_v7 }
 0xe55   :  { %2329 = vmax.xlane.f32.xlu1 %v2328_v15  ;;  %2326 = vmax.xlane.f32.xlu0 %v2325_v45  ;;  %v5706_v15 = vld [vmem:[%s4923_s20 + $0x18] sm:$0xf] }
 0xe6e   :  { %v5640_v49 = vpop.xlane.xlu0 %2409 }
 0xe6f   :  { %v2420_v18 = vmul.f32 %v5360_v35, %v5640_v49 }
 0xe71   :  { %v2424_v46 = vsub.f32 %v2420_v18, %v5102_v50 }
 0xe72   :  { %v5642_v10 = vpop.xlane.xlu0 %2535  ;;  %v5644_v31 = vpop.xlane.xlu1 %2412 }
 0xe73   :  { %v2421_v20 = vmul.f32 %v5356_v57, %v5644_v31  ;;  %v2546_v24 = vmul.f32 %v5360_v35, %v5642_v10  ;;  %v2428_v17 = vsel %vm729_vm10, %v2424_v46, -inf }
 0xe75   :  { %v2425_v41 = vsub.f32 %v2421_v20, %v5098_v47  ;;  %v2550_v54 = vsub.f32 %v2546_v24, %v5102_v50 }
 0xe76   :  { %v5646_v48 = vpop.xlane.xlu0 %2661  ;;  %v5648_v14 = vpop.xlane.xlu1 %2538 }
 0xe77   :  { %v2547_v11 = vmul.f32 %v5356_v57, %v5648_v14  ;;  %v2429_v9 = vsel %vm729_vm10, %v2425_v41, -inf  ;;  %v2672_v33 = vmul.f32 %v5360_v35, %v5646_v48  ;;  %v2554_v6 = vsel %vm729_vm10, %v2550_v54, -inf }
 0xe78   :  { %v2432_v62 = vmax.f32 %v2428_v17, %v2429_v9 }
 0xe79   :  { %v2551_v51 = vsub.f32 %v2547_v11, %v5098_v47  ;;  %v2676_v19 = vsub.f32 %v2672_v33, %v5102_v50 }
 0xe7a   :  { %v5654_v4 = vpop.xlane.xlu0 %2415  ;;  %v5656_v23 = vpop.xlane.xlu1 %2664 }
 0xe7b   :  { %v2422_v16 = vmul.f32 %v5378_v29, %v5654_v4  ;;  %v2673_v3 = vmul.f32 %v5356_v57, %v5656_v23  ;;  %v2555_v35 = vsel %vm729_vm10, %v2551_v51, -inf }
 0xe7c   :  { %v2558_v20 = vmax.f32 %v2554_v6, %v2555_v35  ;;  %v5720_v6 = vld [vmem:[%s4923_s20] sm:$0xff] }
 0xe7d   :  { %v2426_v28 = vsub.f32 %v2422_v16, %v5111_v56  ;;  %v2677_v5 = vsub.f32 %v2673_v3, %v5098_v47 }
 0xe7e   :  { %v5667_v42 = vpop.xlane.xlu0 %2541  ;;  %v5669_v52 = vpop.xlane.xlu1 %2418 }
 0xe7f   :  { %v2548_v36 = vmul.f32 %v5378_v29, %v5667_v42  ;;  %v2423_v55 = vmul.f32 %v5374_v22, %v5669_v52  ;;  %v2430_v59 = vsel %vm729_vm10, %v2426_v28, -inf  ;;  %v2681_v41 = vsel %vm729_vm10, %v2677_v5, -inf  ;;  %v5716_v5 = vld [vmem:[%s4923_s20 + $0x8] sm:$0xff] }
 0xe80   :  { %v2680_v28 = vsel %vm729_vm10, %v2676_v19, -inf }
 0xe81   :  { %v2427_v32 = vsub.f32 %v2423_v55, %v5117_v60  ;;  %v2552_v12 = vsub.f32 %v2548_v36, %v5111_v56  ;;  %v2684_v9 = vmax.f32 %v2680_v28, %v2681_v41 }
 0xe82   :  { %v5685_v37 = vpop.xlane.xlu0 %2667  ;;  %v5687_v43 = vpop.xlane.xlu1 %2544 }
 0xe83   :  { %v2431_v57 = vsel %vm1114_vm14, %v2427_v32, -inf  ;;  %v2674_v53 = vmul.f32 %v5378_v29, %v5685_v37  ;;  %v2549_v2 = vmul.f32 %v5374_v22, %v5687_v43  ;;  %v2556_v29 = vsel %vm729_vm10, %v2552_v12, -inf }
 0xe84   :  { %v2433_v61 = vmax.f32 %v2430_v59, %v2431_v57 }
 0xe85   :  { %v2553_v58 = vsub.f32 %v2549_v2, %v5117_v60  ;;  %v2678_v13 = vsub.f32 %v2674_v53, %v5111_v56 }
 0xe86   :  { %v2434_v7 = vmax.f32 %v2432_v62, %v2433_v61  ;;  %v5700_v63 = vpop.xlane.xlu1 %2670 }
 0xe87   :  { %v2557_v22 = vsel %vm1114_vm14, %v2553_v58, -inf  ;;  %v2675_v45 = vmul.f32 %v5706_v15, %v5700_v63  ;;  %v2682_v36 = vsel %vm729_vm10, %v2678_v13, -inf }
 0xe88   :  { %v2435_v18 = vrot.slane %v2434_v7, 4  ;;  %v2559_v16 = vmax.f32 %v2556_v29, %v2557_v22 }
 0xe89   :  { %v2679_v11 = vsub.f32 %v2675_v45, %v5117_v60  ;;  %v5726_v45 = vld [vmem:[%s4923_s20 + $0x10] sm:$0xff]  ;;  %s4832_s20 = smov 25  }
 0xe8a   :  { %v2436_v46 = vmax.f32 %v2434_v7, %v2435_v18  ;;  %v2560_v24 = vmax.f32 %v2558_v20, %v2559_v16  ;;  %s3841_s16 = sld [smem:[%s6097_s0 + %s4832_s20]]   ;;  %s4847_s20 = smov 38  }
 0xe8b   :  { %v2683_v55 = vsel %vm1114_vm14, %v2679_v11, -inf }
 0xe8c   :  { %v2437_v51 = vrot.slane %v2436_v46, 2  ;;  %v2561_v3 = vrot.slane %v2560_v24, 4  ;;  %v2685_v32 = vmax.f32 %v2682_v36, %v2683_v55 }
 0xe8e   :  { %v2438_v17 = vmax.f32 %v2436_v46, %v2437_v51  ;;  %v2562_v54 = vmax.f32 %v2560_v24, %v2561_v3  ;;  %v2686_v33 = vmax.f32 %v2684_v9, %v2685_v32 }
 0xe90   :  { %v2439_v59 = vrot.slane %v2438_v17, 1  ;;  %v2563_v12 = vrot.slane %v2562_v54, 2  ;;  %v2687_v57 = vrot.slane %v2686_v33, 4 }
 0xe92   :  { %v2564_v53 = vmax.f32 %v2562_v54, %v2563_v12  ;;  %v2688_v2 = vmax.f32 %v2686_v33, %v2687_v57  ;;  %v2440_v62 = vmax.f32 %v2438_v17, %v2439_v59 }
 0xe94   :  { %v2565_v61 = vrot.slane %v2564_v53, 1  ;;  %v2689_v35 = vrot.slane %v2688_v2, 2  ;;  %v2442_v58 = vmul.f32 %v5716_v5, %v2440_v62  ;;  %v2441_v19 = vmul.f32 %v5720_v6, %v2440_v62 }
 0xe95   :  { %v2443_v20 = vmul.f32 %v5726_v45, %v2440_v62 }
 0xe96   :  { %v2690_v7 = vmax.f32 %v2688_v2, %v2689_v35  ;;  %v2446_v29 = vsub.f32 %v2442_v58, %v5098_v47  ;;  %v2445_v13 = vsub.f32 %v2441_v19, %v5102_v50  ;;  %v2566_v22 = vmax.f32 %v2564_v53, %v2565_v61 }
 0xe97   :  { %v2447_v9 = vsub.f32 %v2443_v20, %v5111_v56  ;;  %v2444_v2 = vmul.f32 %v5706_v15, %v2440_v62 }
 0xe98   :  { %v2691_v18 = vrot.slane %v2690_v7, 1  ;;  %v2452_v16 = vsel %vm729_vm10, %v2446_v29, -inf  ;;  %v2449_v41 = vsel %vm729_vm10, %v2445_v13, -inf  ;;  %v2568_v11 = vmul.f32 %v5716_v5, %v2566_v22 }
 0xe99   :  { %2453 = vmax.xlane.f32.xlu1 %v2452_v16  ;;  %2450 = vmax.xlane.f32.xlu0 %v2449_v41  ;;  %v2567_v46 = vmul.f32 %v5720_v6, %v2566_v22  ;;  %v2569_v17 = vmul.f32 %v5726_v45, %v2566_v22  ;;  %v2455_v33 = vsel %vm729_vm10, %v2447_v9, -inf  ;;  %v2448_v19 = vsub.f32 %v2444_v2, %v5117_v60 }
 0xe9a   :  { %v2572_v24 = vsub.f32 %v2568_v11, %v5098_v47  ;;  %v2692_v28 = vmax.f32 %v2690_v7, %v2691_v18 }
 0xe9b   :  { %v2571_v36 = vsub.f32 %v2567_v46, %v5102_v50  ;;  %v2573_v53 = vsub.f32 %v2569_v17, %v5111_v56  ;;  %v2458_v62 = vsel %vm1114_vm14, %v2448_v19, -inf }
 0xe9c   :  { %v2578_v55 = vsel %vm729_vm10, %v2572_v24, -inf  ;;  %v2693_v51 = vmul.f32 %v5720_v6, %v2692_v28  ;;  %v2694_v3 = vmul.f32 %v5716_v5, %v2692_v28  ;;  %v2695_v57 = vmul.f32 %v5726_v45, %v2692_v28 }
 0xe9d   :  { %2579 = vmax.xlane.f32.xlu1 %v2578_v55  ;;  %v2575_v32 = vsel %vm729_vm10, %v2571_v36, -inf  ;;  %v2581_v58 = vsel %vm729_vm10, %v2573_v53, -inf }
 0xe9e   :  { %2576 = vmax.xlane.f32.xlu0 %v2575_v32  ;;  %v2697_v54 = vsub.f32 %v2693_v51, %v5102_v50  ;;  %v2698_v12 = vsub.f32 %v2694_v3, %v5098_v47  ;;  %v2699_v35 = vsub.f32 %v2695_v57, %v5111_v56  ;;  %v2696_v50 = vmul.f32 %v5706_v15, %v2692_v28 }
 0xe9f   :  { %v2570_v47 = vmul.f32 %v5706_v15, %v2566_v22 }
 0xea0   :  { %v2701_v59 = vsel %vm729_vm10, %v2697_v54, -inf  ;;  %v2704_v61 = vsel %vm729_vm10, %v2698_v12, -inf  ;;  %v2707_v7 = vsel %vm729_vm10, %v2699_v35, -inf  ;;  %v2700_v29 = vsub.f32 %v2696_v50, %v5117_v60 }
 0xea1   :  { %2456 = vmax.xlane.f32.xlu1 %v2455_v33  ;;  %v2574_v13 = vsub.f32 %v2570_v47, %v5117_v60 }
 0xea2   :  { %2702 = vmax.xlane.f32.xlu0 %v2701_v59  ;;  %v2710_v56 = vsel %vm1114_vm14, %v2700_v29, -inf }
 0xea3   :  { %v2584_v20 = vsel %vm1114_vm14, %v2574_v13, -inf }
 0xea5   :  { %2705 = vmax.xlane.f32.xlu1 %v2704_v61 }
 0xea6   :  { %2582 = vmax.xlane.f32.xlu0 %v2581_v58 }
 0xea9   :  { %2708 = vmax.xlane.f32.xlu1 %v2707_v7 }
 0xeaa   :  { %2459 = vmax.xlane.f32.xlu0 %v2458_v62 }
 0xead   :  { %2711 = vmax.xlane.f32.xlu1 %v2710_v56 }
 0xeae   :  { %2585 = vmax.xlane.f32.xlu0 %v2584_v20 }
 0xede   :  { %v2321_v18 = vpop.xlane.xlu0 %2320  ;;  %v2324_v16 = vpop.xlane.xlu1 %2323 }
 0xedf   :  { %v2331_v22 = vsub.f32 %v5608_v40, %v2321_v18  ;;  %v2332_v41 = vsub.f32 %v5604_v34, %v2324_v16 }
 0xee1   :  { %v2335_v11 = vmul.f32 1.442695, %v2331_v22  ;;  %v2337_v46 = vmul.f32 1.442695, %v2332_v41 }
 0xee2   :  { %v2327_v24 = vpop.xlane.xlu0 %2326  ;;  %v2330_v28 = vpop.xlane.xlu1 %2329 }
 0xee3   :  { %4697 = vpow2.f32 %v2335_v11  ;;  %v2333_v60 = vsub.f32 %v5614_v44, %v2327_v24  ;;  %v2334_v36 = vsub.f32 %v5618_v38, %v2330_v28 }
 0xee4   :  { %4699 = vpow2.f32 %v2337_v46 }
 0xee5   :  { %v2339_v55 = vmul.f32 1.442695, %v2333_v60  ;;  %v2341_v9 = vmul.f32 1.442695, %v2334_v36 }
 0xee7   :  { %4701 = vpow2.f32 %v2339_v55 }
 0xee8   :  { %4703 = vpow2.f32 %v2341_v9 }
 0xeed   :  { %v5764_v51 = vpop.eup %4697 }
 0xeee   :  { %v5766_v3 = vpop.eup %4699  ;;  %v2343_v34 = vmul.f32 %v5720_v6, %v5764_v51 }
 0xeef   :  { %v2344_v40 = vmul.f32 %v5716_v5, %v5766_v3 }
 0xef0   :  { %v2347_v32 = vsel %vm729_vm10, %v2343_v34, 0.0 }
 0xef1   :  { %v5773_v44 = vpop.eup %4701  ;;  %v2348_v38 = vsel %vm729_vm10, %v2344_v40, 0.0 }
 0xef2   :  { %v5776_v17 = vpop.eup %4703  ;;  %v2345_v54 = vmul.f32 %v5726_v45, %v5773_v44  ;;  %v2349_v33 = vadd.f32 %v2348_v38, %v2347_v32 }
 0xef3   :  { %v2346_v59 = vmul.f32 %v5706_v15, %v5776_v17 }
 0xef4   :  { %v2350_v12 = vsel %vm729_vm10, %v2345_v54, 0.0 }
 0xef5   :  { %v2351_v57 = vadd.f32 %v2350_v12, %v2349_v33  ;;  %v2352_v53 = vsel %vm1114_vm14, %v2346_v59, 0.0 }
 0xef7   :  { %v2353_v2 = vadd.f32 %v2352_v53, %v2351_v57 }
 0xef9   :  { %v2354_v61 = vrot.slane %v2353_v2, 4 }
 0xefb   :  { %v2355_v35 = vadd.f32 %v2354_v61, %v2353_v2 }
 0xefd   :  { %v2356_v50 = vrot.slane %v2355_v35, 2 }
 0xeff   :  { %v2357_v58 = vadd.f32 %v2356_v50, %v2355_v35 }
 0xf01   :  { %v2358_v19 = vrot.slane %v2357_v58, 1 }
 0xf03   :  { %v2359_v47 = vadd.f32 %v2358_v19, %v2357_v58 }
 0xf05   :  { %v2361_v7 = vmul.f32 %v5716_v5, %v2359_v47  ;;  %v2360_v29 = vmul.f32 %v5720_v6, %v2359_v47  ;;  %v2363_v56 = vmul.f32 %v5706_v15, %v2359_v47  ;;  %v2362_v20 = vmul.f32 %v5726_v45, %v2359_v47 }
 0xf07   :  { %v2367_v62 = vsel %vm729_vm10, %v2361_v7, 0.0  ;;  %v2364_v13 = vsel %vm729_vm10, %v2360_v29, 0.0  ;;  %v2373_v18 = vsel %vm1114_vm14, %v2363_v56, 0.0  ;;  %v2370_v16 = vsel %vm729_vm10, %v2362_v20, 0.0 }
 0xf08   :  { %2368 = vadd.xlane.f32.xlu1 %v2367_v62  ;;  %2365 = vadd.xlane.f32.xlu0 %v2364_v13 }
 0xf0c   :  { %2374 = vadd.xlane.f32.xlu1 %v2373_v18  ;;  %2371 = vadd.xlane.f32.xlu0 %v2370_v16 }
 0xf26   :  { %v2451_v22 = vpop.xlane.xlu0 %2450  ;;  %v2454_v41 = vpop.xlane.xlu1 %2453 }
 0xf27   :  { %v2461_v11 = vsub.f32 %v5640_v49, %v2451_v22  ;;  %v2462_v46 = vsub.f32 %v5644_v31, %v2454_v41 }
 0xf29   :  { %v2465_v36 = vmul.f32 1.442695, %v2461_v11  ;;  %v2467_v9 = vmul.f32 1.442695, %v2462_v46 }
 0xf2a   :  { %v2580_v24 = vpop.xlane.xlu1 %2579 }
 0xf2b   :  { %v2577_v28 = vpop.xlane.xlu0 %2576  ;;  %v2588_v60 = vsub.f32 %v5648_v14, %v2580_v24  ;;  %4705 = vpow2.f32 %v2465_v36 }
 0xf2c   :  { %v2587_v55 = vsub.f32 %v5642_v10, %v2577_v28  ;;  %4707 = vpow2.f32 %v2467_v9 }
 0xf2d   :  { %v2593_v40 = vmul.f32 1.442695, %v2588_v60 }
 0xf2e   :  { %v2457_v34 = vpop.xlane.xlu1 %2456  ;;  %v2591_v33 = vmul.f32 1.442695, %v2587_v55 }
 0xf2f   :  { %v2703_v32 = vpop.xlane.xlu0 %2702  ;;  %v2463_v38 = vsub.f32 %v5654_v4, %v2457_v34  ;;  %4709 = vpow2.f32 %v2593_v40 }
 0xf30   :  { %v2713_v54 = vsub.f32 %v5646_v48, %v2703_v32 }
 0xf31   :  { %v2469_v49 = vmul.f32 1.442695, %v2463_v38 }
 0xf32   :  { %v2717_v31 = vmul.f32 1.442695, %v2713_v54  ;;  %v2706_v59 = vpop.xlane.xlu1 %2705 }
 0xf33   :  { %v2583_v12 = vpop.xlane.xlu0 %2582  ;;  %v2714_v14 = vsub.f32 %v5656_v23, %v2706_v59  ;;  %4711 = vpow2.f32 %v2469_v49 }
 0xf34   :  { %v2589_v10 = vsub.f32 %v5667_v42, %v2583_v12  ;;  %4713 = vpow2.f32 %v2591_v33 }
 0xf35   :  { %v2719_v57 = vmul.f32 1.442695, %v2714_v14  ;;  %4715 = vpow2.f32 %v2717_v31  ;;  %v5802_v19 = vpop.eup %4705 }
 0xf36   :  { %v2595_v53 = vmul.f32 1.442695, %v2589_v10  ;;  %v2709_v4 = vpop.xlane.xlu1 %2708  ;;  %v5805_v47 = vpop.eup %4707  ;;  %v2473_v56 = vmul.f32 %v5720_v6, %v5802_v19 }
 0xf37   :  { %4717 = vpow2.f32 %v2719_v57  ;;  %v2460_v48 = vpop.xlane.xlu0 %2459  ;;  %v2715_v2 = vsub.f32 %v5685_v37, %v2709_v4  ;;  %v2474_v20 = vmul.f32 %v5716_v5, %v5805_v47 }
 0xf38   :  { %4719 = vpow2.f32 %v2595_v53  ;;  %v2464_v61 = vsub.f32 %v5669_v52, %v2460_v48  ;;  %v2477_v41 = vsel %vm729_vm10, %v2473_v56, 0.0 }
 0xf39   :  { %v2721_v35 = vmul.f32 1.442695, %v2715_v2  ;;  %v5808_v29 = vpop.eup %4709  ;;  %v2478_v11 = vsel %vm729_vm10, %v2474_v20, 0.0 }
 0xf3a   :  { %v2471_v50 = vmul.f32 1.442695, %v2464_v61  ;;  %v2712_v58 = vpop.xlane.xlu1 %2711  ;;  %v2600_v24 = vmul.f32 %v5716_v5, %v5808_v29  ;;  %v2479_v34 = vadd.f32 %v2478_v11, %v2477_v41 }
 0xf3b   :  { %4721 = vpow2.f32 %v2721_v35  ;;  %v2586_v23 = vpop.xlane.xlu0 %2585  ;;  %v2716_v42 = vsub.f32 %v5700_v63, %v2712_v58 }
 0xf3c   :  { %4723 = vpow2.f32 %v2471_v50  ;;  %v2590_v7 = vsub.f32 %v5687_v43, %v2586_v23  ;;  %v2604_v54 = vsel %vm729_vm10, %v2600_v24, 0.0 }
 0xf3d   :  { %v2723_v37 = vmul.f32 1.442695, %v2716_v42  ;;  %v5810_v62 = vpop.eup %4711 }
 0xf3e   :  { %v2597_v52 = vmul.f32 1.442695, %v2590_v7  ;;  %v5812_v13 = vpop.eup %4713  ;;  %v2475_v43 = vmul.f32 %v5726_v45, %v5810_v62 }
 0xf3f   :  { %4725 = vpow2.f32 %v2723_v37  ;;  %v5818_v63 = vpop.eup %4715  ;;  %v2599_v46 = vmul.f32 %v5720_v6, %v5812_v13 }
 0xf40   :  { %4727 = vpow2.f32 %v2597_v52  ;;  %v2725_v28 = vmul.f32 %v5720_v6, %v5818_v63  ;;  %v2480_v36 = vsel %vm729_vm10, %v2475_v43, 0.0 }
 0xf41   :  { %v5820_v18 = vpop.eup %4717  ;;  %v2603_v38 = vsel %vm729_vm10, %v2599_v46, 0.0  ;;  %v2481_v31 = vadd.f32 %v2480_v36, %v2479_v34 }
 0xf42   :  { %v5824_v16 = vpop.eup %4719  ;;  %v2726_v22 = vmul.f32 %v5716_v5, %v5820_v18  ;;  %v2729_v49 = vsel %vm729_vm10, %v2725_v28, 0.0  ;;  %v2605_v4 = vadd.f32 %v2604_v54, %v2603_v38 }
 0xf43   :  { %v2601_v55 = vmul.f32 %v5726_v45, %v5824_v16 }
 0xf44   :  { %v2730_v40 = vsel %vm729_vm10, %v2726_v22, 0.0 }
 0xf45   :  { %v5836_v60 = vpop.eup %4721  ;;  %v2606_v14 = vsel %vm729_vm10, %v2601_v55, 0.0  ;;  %v2731_v10 = vadd.f32 %v2730_v40, %v2729_v49 }
 0xf46   :  { %v5841_v9 = vpop.eup %4723  ;;  %v2727_v32 = vmul.f32 %v5726_v45, %v5836_v60  ;;  %v2607_v50 = vadd.f32 %v2606_v14, %v2605_v4 }
 0xf47   :  { %v2476_v33 = vmul.f32 %v5706_v15, %v5841_v9 }
 0xf48   :  { %v2732_v59 = vsel %vm729_vm10, %v2727_v32, 0.0 }
 0xf49   :  { %v5852_v12 = vpop.eup %4725  ;;  %v2482_v57 = vsel %vm1114_vm14, %v2476_v33, 0.0  ;;  %v2733_v61 = vadd.f32 %v2732_v59, %v2731_v10 }
 0xf4a   :  { %v5856_v53 = vpop.eup %4727  ;;  %v2483_v48 = vadd.f32 %v2482_v57, %v2481_v31  ;;  %v2728_v2 = vmul.f32 %v5706_v15, %v5852_v12 }
 0xf4b   :  { %v2602_v35 = vmul.f32 %v5706_v15, %v5856_v53 }
 0xf4c   :  { %v2484_v58 = vrot.slane %v2483_v48, 4  ;;  %v2734_v23 = vsel %vm1114_vm14, %v2728_v2, 0.0 }
 0xf4d   :  { %v2608_v42 = vsel %vm1114_vm14, %v2602_v35, 0.0  ;;  %v2735_v7 = vadd.f32 %v2734_v23, %v2733_v61 }
 0xf4e   :  { %v2609_v37 = vadd.f32 %v2608_v42, %v2607_v50  ;;  %v2485_v52 = vadd.f32 %v2484_v58, %v2483_v48 }
 0xf4f   :  { %v2736_v56 = vrot.slane %v2735_v7, 4 }
 0xf50   :  { %v2610_v20 = vrot.slane %v2609_v37, 4  ;;  %v2486_v43 = vrot.slane %v2485_v52, 2 }
 0xf51   :  { %v2737_v22 = vadd.f32 %v2736_v56, %v2735_v7 }
 0xf52   :  { %v2487_v41 = vadd.f32 %v2486_v43, %v2485_v52  ;;  %v2611_v11 = vadd.f32 %v2610_v20, %v2609_v37 }
 0xf53   :  { %v2738_v46 = vrot.slane %v2737_v22, 2 }
 0xf54   :  { %v2488_v24 = vrot.slane %v2487_v41, 1  ;;  %v2612_v28 = vrot.slane %v2611_v11, 2 }
 0xf55   :  { %v2739_v36 = vadd.f32 %v2738_v46, %v2737_v22 }
 0xf56   :  { %v2489_v55 = vadd.f32 %v2488_v24, %v2487_v41  ;;  %v2613_v34 = vadd.f32 %v2612_v28, %v2611_v11 }
 0xf57   :  { %v2740_v40 = vrot.slane %v2739_v36, 1 }
 0xf58   :  { %v2491_v32 = vmul.f32 %v5716_v5, %v2489_v55  ;;  %v2490_v38 = vmul.f32 %v5720_v6, %v2489_v55  ;;  %v2614_v54 = vrot.slane %v2613_v34, 1  ;;  %v2493_v50 = vmul.f32 %v5706_v15, %v2489_v55 }
 0xf59   :  { %v2741_v59 = vadd.f32 %v2740_v40, %v2739_v36  ;;  %v2492_v58 = vmul.f32 %v5726_v45, %v2489_v55 }
 0xf5a   :  { %v2497_v33 = vsel %vm729_vm10, %v2491_v32, 0.0  ;;  %v2494_v49 = vsel %vm729_vm10, %v2490_v38, 0.0  ;;  %v2615_v31 = vadd.f32 %v2614_v54, %v2613_v34  ;;  %v2503_v23 = vsel %vm1114_vm14, %v2493_v50, 0.0 }
 0xf5b   :  { %2498 = vadd.xlane.f32.xlu1 %v2497_v33  ;;  %2495 = vadd.xlane.f32.xlu0 %v2494_v49  ;;  %v2743_v48 = vmul.f32 %v5716_v5, %v2741_v59  ;;  %v2742_v2 = vmul.f32 %v5720_v6, %v2741_v59  ;;  %v2500_v42 = vsel %vm729_vm10, %v2492_v58, 0.0  ;;  %v2745_v52 = vmul.f32 %v5706_v15, %v2741_v59 }
 0xf5c   :  { %v2617_v14 = vmul.f32 %v5716_v5, %v2615_v31  ;;  %v2616_v10 = vmul.f32 %v5720_v6, %v2615_v31  ;;  %v2619_v5 = vmul.f32 %v5706_v15, %v2615_v31  ;;  %v2618_v6 = vmul.f32 %v5726_v45, %v2615_v31 }
 0xf5d   :  { %v2749_v61 = vsel %vm729_vm10, %v2743_v48, 0.0  ;;  %v2746_v35 = vsel %vm729_vm10, %v2742_v2, 0.0  ;;  %v2744_v56 = vmul.f32 %v5726_v45, %v2741_v59  ;;  %v2755_v20 = vsel %vm1114_vm14, %v2745_v52, 0.0 }
 0xf5e   :  { %v2623_v57 = vsel %vm729_vm10, %v2617_v14, 0.0  ;;  %v2620_v4 = vsel %vm729_vm10, %v2616_v10, 0.0  ;;  %v2629_v7 = vsel %vm1114_vm14, %v2619_v5, 0.0  ;;  %v2626_v37 = vsel %vm729_vm10, %v2618_v6, 0.0 }
 0xf5f   :  { %2624 = vadd.xlane.f32.xlu1 %v2623_v57  ;;  %2621 = vadd.xlane.f32.xlu0 %v2620_v4  ;;  %v2752_v43 = vsel %vm729_vm10, %v2744_v56, 0.0 }
 0xf63   :  { %2750 = vadd.xlane.f32.xlu1 %v2749_v61  ;;  %2747 = vadd.xlane.f32.xlu0 %v2746_v35 }
 0xf67   :  { %2504 = vadd.xlane.f32.xlu1 %v2503_v23  ;;  %2501 = vadd.xlane.f32.xlu0 %v2500_v42 }
 0xf6b   :  { %2630 = vadd.xlane.f32.xlu1 %v2629_v7  ;;  %2627 = vadd.xlane.f32.xlu0 %v2626_v37 }
 0xf6f   :  { %2756 = vadd.xlane.f32.xlu1 %v2755_v20  ;;  %2753 = vadd.xlane.f32.xlu0 %v2752_v43 }
 0xf95   :  { %v2366_v22 = vpop.xlane.xlu0 %2365  ;;  %v2369_v41 = vpop.xlane.xlu1 %2368 }
 0xf96   :  { %v2376_v11 = vadd.f32 1e-16, %v2366_v22  ;;  %v2377_v46 = vadd.f32 1e-16, %v2369_v41 }
 0xf98   :  { %4729 = vrcp.f32 %v2376_v11 }
 0xf99   :  { %4731 = vrcp.f32 %v2377_v46  ;;  %v2372_v24 = vpop.xlane.xlu0 %2371  ;;  %v2375_v28 = vpop.xlane.xlu1 %2374 }
 0xf9a   :  { %v2378_v36 = vadd.f32 1e-16, %v2372_v24  ;;  %v2379_v15 = vadd.f32 1e-16, %v2375_v28 }
 0xf9c   :  { %4733 = vrcp.f32 %v2378_v36 }
 0xf9d   :  { %4735 = vrcp.f32 %v2379_v15 }
 0xfa2   :  { %v4730_v45 = vpop.eup %4729 }
 0xfa3   :  { %v4732_v55 = vpop.eup %4731  ;;  %v2381_v34 = vmul.f32 %v4730_v45, %v5764_v51 }
 0xfa4   :  { %v2383_v40 = vmul.f32 %v4732_v55, %v5766_v3 }
 0xfa5   :  { %v2388_v32 = vmul.f32 %v2381_v34, %v5556_v30 }
 0xfa6   :  { %v4734_v38 = vpop.eup %4733  ;;  %v2389_v54 = vmul.f32 %v2383_v40, %v5560_v27 }
 0xfa7   :  { %v4736_v33 = vpop.eup %4735  ;;  %v2385_v49 = vmul.f32 %v4734_v38, %v5773_v44 }
 0xfa8   :  { %v4579_v31 = vpack.i.bf16 %v2389_v54, %v2388_v32  ;;  %v2387_v59 = vmul.f32 %v4736_v33, %v5776_v17 }
 0xfa9   :  { %v2390_v14 = vmul.f32 %v2385_v49, %v5564_v39 }
 0xfaa   :  { %4580 = vrot.lane.b32.xlu0 %v4579_v31, %s4824_s17  ;;  %v2391_v10 = vmul.f32 %v2387_v59, %v5568_v8 }
 0xfac   :  { %v4584_v51 = vpack.i.bf16 %v2391_v10, %v2390_v14 }
 0xfae   :  { %4585 = vrot.lane.b32.xlu1 %v4584_v51, %s4824_s17 }
 0xfe8   :  { %v2496_v3 = vpop.xlane.xlu0 %2495  ;;  %v2499_v57 = vpop.xlane.xlu1 %2498 }
 0xfe9   :  { %v2506_v4 = vadd.f32 1e-16, %v2496_v3  ;;  %v2507_v48 = vadd.f32 1e-16, %v2499_v57 }
 0xfeb   :  { %4737 = vrcp.f32 %v2506_v4 }
 0xfec   :  { %4739 = vrcp.f32 %v2507_v48  ;;  %v2622_v2 = vpop.xlane.xlu0 %2621  ;;  %v2625_v44 = vpop.xlane.xlu1 %2624 }
 0xfed   :  { %v2632_v61 = vadd.f32 1e-16, %v2622_v2  ;;  %v2633_v35 = vadd.f32 1e-16, %v2625_v44 }
 0xfef   :  { %4741 = vrcp.f32 %v2632_v61 }
 0xff0   :  { %4743 = vrcp.f32 %v2633_v35  ;;  %v2748_v17 = vpop.xlane.xlu0 %2747  ;;  %v2751_v50 = vpop.xlane.xlu1 %2750 }
 0xff1   :  { %v2758_v58 = vadd.f32 1e-16, %v2748_v17  ;;  %v2759_v23 = vadd.f32 1e-16, %v2751_v50 }
 0xff3   :  { %4745 = vrcp.f32 %v2758_v58 }
 0xff4   :  { %4747 = vrcp.f32 %v2759_v23  ;;  %v2502_v42 = vpop.xlane.xlu0 %2501  ;;  %v2505_v5 = vpop.xlane.xlu1 %2504 }
 0xff5   :  { %v4738_v6 = vpop.eup %4737  ;;  %v2508_v7 = vadd.f32 1e-16, %v2502_v42  ;;  %v2509_v37 = vadd.f32 1e-16, %v2505_v5 }
 0xff6   :  { %v4740_v52 = vpop.eup %4739  ;;  %v2511_v56 = vmul.f32 %v4738_v6, %v5802_v19 }
 0xff7   :  { %4749 = vrcp.f32 %v2508_v7  ;;  %v2513_v20 = vmul.f32 %v4740_v52, %v5805_v47 }
 0xff8   :  { %4751 = vrcp.f32 %v2509_v37  ;;  %v2628_v43 = vpop.xlane.xlu0 %2627  ;;  %v2631_v22 = vpop.xlane.xlu1 %2630  ;;  %v2518_v41 = vmul.f32 %v2511_v56, %v5556_v30 }
 0xff9   :  { %v4742_v11 = vpop.eup %4741  ;;  %v2634_v46 = vadd.f32 1e-16, %v2628_v43  ;;  %v2635_v24 = vadd.f32 1e-16, %v2631_v22  ;;  %v2519_v28 = vmul.f32 %v2513_v20, %v5560_v27 }
 0xffa   :  { %v4744_v36 = vpop.eup %4743  ;;  %v2637_v15 = vmul.f32 %v4742_v11, %v5812_v13 }
 0xffb   :  { %4753 = vrcp.f32 %v2634_v46  ;;  %v4589_v45 = vpack.i.bf16 %v2519_v28, %v2518_v41  ;;  %v2639_v19 = vmul.f32 %v4744_v36, %v5808_v29 }
 0xffc   :  { %4755 = vrcp.f32 %v2635_v24  ;;  %v2754_v55 = vpop.xlane.xlu0 %2753  ;;  %v2757_v47 = vpop.xlane.xlu1 %2756  ;;  %v2644_v34 = vmul.f32 %v2637_v15, %v5556_v30 }
 0xffd   :  { %v4746_v40 = vpop.eup %4745  ;;  %v2760_v32 = vadd.f32 1e-16, %v2754_v55  ;;  %4590 = vrot.lane.b32.xlu1 %v4589_v45, %s4824_s17  ;;  %v2761_v38 = vadd.f32 1e-16, %v2757_v47  ;;  %v2645_v54 = vmul.f32 %v2639_v19, %v5560_v27 }
 0xffe   :  { %v4748_v33 = vpop.eup %4747  ;;  %v2763_v49 = vmul.f32 %v4746_v40, %v5818_v63 }
 0xfff   :  { %4757 = vrcp.f32 %v2760_v32  ;;  %v4594_v13 = vpack.i.bf16 %v2645_v54, %v2644_v34  ;;  %v2765_v31 = vmul.f32 %v4748_v33, %v5820_v18 }
0x1000   :  { %4759 = vrcp.f32 %v2761_v38  ;;  %v2770_v29 = vmul.f32 %v2763_v49, %v5556_v30 }
0x1001   :  { %v4750_v59 = vpop.eup %4749  ;;  %4595 = vrot.lane.b32.xlu1 %v4594_v13, %s4824_s17  ;;  %v2771_v14 = vmul.f32 %v2765_v31, %v5560_v27  ;;  %v2928_v13 = vld [vmem:[%s3841_s16] sm:$0xff]  ;;  %v2929_v31 = vld [vmem:[%s3841_s16 + $0x8] sm:$0xff] }
0x1002   :  { %v4752_v10 = vpop.eup %4751  ;;  %v2515_v51 = vmul.f32 %v4750_v59, %v5810_v62 }
0x1003   :  { %v4599_v3 = vpack.i.bf16 %v2771_v14, %v2770_v29  ;;  %v2517_v57 = vmul.f32 %v4752_v10, %v5841_v9 }
0x1004   :  { %v2520_v63 = vmul.f32 %v2515_v51, %v5564_v39 }
0x1005   :  { %v4754_v4 = vpop.eup %4753  ;;  %4600 = vrot.lane.b32.xlu0 %v4599_v3, %s4824_s17  ;;  %v2521_v18 = vmul.f32 %v2517_v57, %v5568_v8  ;;  %v4418_v3 = vpack.c.bf16 %v2929_v31, %v2928_v13  ;;  %v2930_v57 = vld [vmem:[%s3841_s16 + $0x10] sm:$0xff] }
0x1006   :  { %v4756_v48 = vpop.eup %4755  ;;  %v2641_v30 = vmul.f32 %v4754_v4, %v5824_v16 }
0x1007   :  { %v4604_v2 = vpack.i.bf16 %v2521_v18, %v2520_v63  ;;  %v2643_v44 = vmul.f32 %v4756_v48, %v5856_v53  ;;  %v2931_v63 = vld [vmem:[%s3841_s16 + $0x18] sm:$0xff]  ;;  %v4797_v18 = vld [vmem:[%s5423_s23 + $0x8] sm:$0xff]  ;;  %v3022_v48 = vld [vmem:[%s3843_s1] sm:$0xff]  ;;  %s4834_s23 = smov 26   ;;  %s3854_s16 = sld [smem:[%s6097_s0 + %s4847_s20]]  }
0x1008   :  { %v2646_v27 = vmul.f32 %v2641_v30, %v5564_v39  ;;  %v4422_v4 = vpack.c.bf16 %v2931_v63, %v2930_v57  ;;  %v3023_v30 = vld [vmem:[%s3843_s1 + $0x8] sm:$0xff]  ;;  %s3842_s4 = sld [smem:[%s6097_s0 + %s4834_s23]]   ;;  %s4840_s23 = smov 34  }
0x1009   :  { %v4758_v61 = vpop.eup %4757  ;;  %4605 = vrot.lane.b32.xlu0 %v4604_v2, %s4824_s17  ;;  %v2647_v62 = vmul.f32 %v2643_v44, %v5568_v8  ;;  %v4426_v2 = vpack.c.bf16 %v3023_v30, %v3022_v48  ;;  %v3338_v57 = vld [vmem:[%s3849_s8 + $0x8] sm:$0xff]  ;;  %v3339_v30 = vld [vmem:[%s3849_s8 + $0x10] sm:$0xff] }
0x100a   :  { %v4760_v9 = vpop.eup %4759  ;;  %v2767_v35 = vmul.f32 %v4758_v61, %v5836_v60  ;;  %v3025_v61 = vld [vmem:[%s3843_s1 + $0x18] sm:$0xff] }
0x100b   :  { %v4609_v17 = vpack.i.bf16 %v2647_v62, %v2646_v27  ;;  %v2769_v50 = vmul.f32 %v4760_v9, %v5852_v12  ;;  %v3024_v27 = vld [vmem:[%s3843_s1 + $0x10] sm:$0xff]  ;;  %s3848_s1 = sld [smem:[%s6097_s0 + %s4814_s21]]  }
0x100c   :  { %v2772_v58 = vmul.f32 %v2767_v35, %v5564_v39  ;;  %v4430_v62 = vpack.c.bf16 %v3025_v61, %v3024_v27  ;;  %v3922_v27 = vld [vmem:[%s3846_s29] ss:$0 sm:$0xff] }
0x100d   :  { %4610 = vrot.lane.b32.xlu1 %v4609_v17, %s4824_s17  ;;  %v2773_v16 = vmul.f32 %v2769_v50, %v5568_v8 }
0x100e   :  { %v3916_v9 = vld [vmem:[%s3842_s4] ss:$0 sm:$0xff]  ;;  %s3850_s4 = sld [smem:[%s6097_s0 + %s4840_s23]]  }
0x100f   :  { %v4614_v53 = vpack.i.bf16 %v2773_v16, %v2772_v58 }
0x1011   :  { %4615 = vrot.lane.b32.xlu0 %v4614_v53, %s4824_s17 }
0x101c   :  { %v4581_v5 = vpop.permute.xlu0 %4580 }
0x101d   :  { %v4583_v56 = vunpack.i.h.bf16 %v4581_v5  ;;  %v4582_v20 = vunpack.i.l.bf16 %v4581_v5  ;;  %v3144_v5 = vld [vmem:[%s3845_s10 + $0x10] sm:$0xff] }
0x1020   :  { %v4586_v23 = vpop.permute.xlu1 %4585 }
0x1021   :  { %v4588_v34 = vunpack.i.h.bf16 %v4586_v23  ;;  %v4587_v40 = vunpack.i.l.bf16 %v4586_v23  ;;  %v3142_v23 = vld [vmem:[%s3845_s10] sm:$0xff] }
0x106f   :  { %v4591_v42 = vpop.permute.xlu1 %4590 }
0x1070   :  { %v4593_v7 = vunpack.i.h.bf16 %v4591_v42  ;;  %v4592_v37 = vunpack.i.l.bf16 %v4591_v42  ;;  %v3143_v42 = vld [vmem:[%s3845_s10 + $0x8] sm:$0xff] }
0x1072   :  { %v2839_v39 = vsel %vm1089_vm12, %v4583_v56, %v4593_v7  ;;  %v2838_v43 = vsel %vm1089_vm12, %v4582_v20, %v4592_v37  ;;  %v3145_v7 = vld [vmem:[%s3845_s10 + $0x18] sm:$0xff]  ;;  %v3148_v20 = vld [vmem:[%s3845_s10 + $0x30] sm:$0xff] }
0x1073   :  { %v4596_v6 = vpop.permute.xlu1 %4595  ;;  %v4438_v37 = vpack.c.bf16 %v3145_v7, %v3144_v5 }
0x1074   :  { %v4598_v52 = vunpack.i.h.bf16 %v4596_v6  ;;  %v4597_v60 = vunpack.i.l.bf16 %v4596_v6  ;;  %v4434_v6 = vpack.c.bf16 %v3143_v42, %v3142_v23 }
0x1076   :  { %v2842_v41 = vsel %vm729_vm10, %v2838_v43, %v4597_v60  ;;  %v2843_v11 = vsel %vm729_vm10, %v2839_v39, %v4598_v52  ;;  %v3146_v52 = vld [vmem:[%s3845_s10 + $0x20] sm:$0xff]  ;;  %v3147_v60 = vld [vmem:[%s3845_s10 + $0x28] sm:$0xff] }
0x1077   :  { %v4601_v12 = vpop.permute.xlu0 %4600  ;;  %v4442_v56 = vpack.c.bf16 %v3147_v60, %v3146_v52  ;;  %v3919_v43 = vld [vmem:[%s3844_s18] ss:$0 sm:$0xff] }
0x1078   :  { %v4603_v22 = vunpack.i.h.bf16 %v4601_v12  ;;  %v4602_v8 = vunpack.i.l.bf16 %v4601_v12  ;;  %v3149_v12 = vld [vmem:[%s3845_s10 + $0x38] sm:$0xff]  ;;  %s4844_s10 = smov 37  }
0x1079   :  { %v4446_v39 = vpack.c.bf16 %v3149_v12, %v3148_v20  ;;  %s6048_s13 = sld [smem:[%s6097_s0 + %s4844_s10]]  }
0x107a   :  { %v2846_v46 = vsel %vm1660_vm2, %v2842_v41, %v4602_v8  ;;  %v2847_v24 = vsel %vm1660_vm2, %v2843_v11, %v4603_v22 }
0x107b   :  { %v4408_v28 = vpack.c.bf16 %v2847_v24, %v2846_v46  ;;  %v4606_v36 = vpop.permute.xlu0 %4605 }
0x107c   :  { %v4608_v45 = vunpack.i.h.bf16 %v4606_v36  ;;  %v4607_v19 = vunpack.i.l.bf16 %v4606_v36 }
0x107d   :  { %4409 = vmatprep.subr.bf16.mxu1 %v4408_v28 }
0x107e   :  { %4411 = vmatpush3.bf16.msra.mxu1 %v4408_v28  ;;  %v2840_v38 = vsel %vm1089_vm12, %v4587_v40, %v4607_v19  ;;  %v2841_v54 = vsel %vm1089_vm12, %v4588_v34, %v4608_v45 }
0x107f   :  { %v4611_v15 = vpop.permute.xlu1 %4610 }
0x1080   :  { %v4613_v55 = vunpack.i.h.bf16 %v4611_v15  ;;  %v4612_v47 = vunpack.i.l.bf16 %v4611_v15 }
0x1082   :  { %v2844_v29 = vsel %vm729_vm10, %v2840_v38, %v4612_v47  ;;  %v2845_v59 = vsel %vm729_vm10, %v2841_v54, %v4613_v55 }
0x1083   :  { %v4616_v32 = vpop.permute.xlu0 %4615 }
0x1084   :  { %v4618_v33 = vunpack.i.h.bf16 %v4616_v32  ;;  %v4617_v49 = vunpack.i.l.bf16 %v4616_v32 }
0x1086   :  { %v2848_v14 = vsel %vm1660_vm2, %v2844_v29, %v4617_v49  ;;  %v2849_v10 = vsel %vm1660_vm2, %v2845_v59, %v4618_v33 }
0x1087   :  { %v4412_v51 = vpack.c.bf16 %v2849_v10, %v2848_v14 }
0x1089   :  { %4414 = vmatprep.subr.msk.bf16.mxu1 %vm5458_vm3, %v4412_v51 }
0x108a   :  { %4417 = vmatpush3.bf16.msk.msra.mxu1 %vm5458_vm3, %v4412_v51  ;;  %v3257_v51 = vld [vmem:[%s3847_s24 + $0x8] sm:$0xff] }
0x108b   :  { %4419 = vmatprep.subr.bf16.mxu1 %v4418_v3 }
0x108d   :  { %4187 = vmatmul.mubr.msk.f32.vlgmr.msra.gmra.mrb[30].mxu1 %vm1665_vm15, %v4797_v18  ;;  %v3259_v18 = vld [vmem:[%s3847_s24 + $0x18] sm:$0xff] }
0x108e   :  { %4421 = vmatpush3.bf16.msra.mxu1 %v4418_v3  ;;  %v3337_v3 = vld [vmem:[%s3849_s8] sm:$0xff] }
0x108f   :  { %4423 = vmatprep.subr.bf16.mxu1 %v4422_v4  ;;  %v4456_v63 = vpack.c.bf16 %v3338_v57, %v3337_v3 }
0x1091   :  { %4457 = vmatprep.subr.bf16.mxu0 %v4456_v63 }
0x1092   :  { %4425 = vmatpush3.bf16.msra.mxu1 %v4422_v4  ;;  %v3258_v4 = vld [vmem:[%s3847_s24 + $0x10] sm:$0xff]  ;;  %4459 = vmatpush3.bf16.msra.mxu0 %v4456_v63 }
0x1093   :  { %4427 = vmatprep.subr.bf16.mxu1 %v4426_v2  ;;  %v4454_v48 = vpack.c.bf16 %v3259_v18, %v3258_v4 }
0x1160   :  { %v4188_v44 = vpop.f32.mrb[30].mxu1 }
0x1161   :  { %v2919_v21 = vpop.f32.mrb[31].mxu1 }
0x1162   :  { %4197 = vmatprep.mubr.msk.f32.mxu1 %vm201_vm1, %v2919_v21  ;;  %v5985_v21 = vld [vmem:[%s4865_s9] sm:$0x3] }
0x1163   :  { %4198 = vmatmul.mubr.msk.f32.vlgmr.msra.gmra.mrb[32].mxu1 %vm201_vm1, %v4188_v44 }
0x1164   :  { %4429 = vmatpush3.bf16.msra.mxu1 %v4426_v2  ;;  %v3340_v2 = vld [vmem:[%s3849_s8 + $0x18] sm:$0xff] }
0x1165   :  { %4431 = vmatprep.subr.bf16.mxu1 %v4430_v62  ;;  %v4460_v44 = vpack.c.bf16 %v3340_v2, %v3339_v30 }
0x1167   :  { %4461 = vmatprep.subr.bf16.mxu0 %v4460_v44 }
0x1168   :  { %4433 = vmatpush3.bf16.msra.mxu1 %v4430_v62  ;;  %4463 = vmatpush3.bf16.msra.mxu0 %v4460_v44 }
0x1169   :  { %4435 = vmatprep.subr.bf16.mxu1 %v4434_v6  ;;  %4470 = vmatprep.subr.bf16.mxu0 %v4799_v0 }
0x1236   :  { %v4199_v35 = vpop.f32.mrb[32].mxu1 }
0x1237   :  { %v3017_v17 = vadd.f32 %v4199_v35, %v3916_v9  ;;  %v3011_v50 = vpop.f32.mrb[33].mxu1 }
0x1238   :  { %v3012_v58 = vadd.f32 %v3916_v9, %v3011_v50 }
0x1239   :  { %v3021_v53 = vmax.f32 %v3017_v17, 0.0 }
0x123a   :  { %v3020_v16 = vmax.f32 %v3012_v58, 0.0 }
0x123c   :  { %4208 = vmatprep.mubr.msk.f32.mxu1 %vm201_vm1, %v3020_v16 }
0x123d   :  { %4209 = vmatmul.mubr.msk.f32.vlgmr.msra.gmra.mrb[34].mxu1 %vm201_vm1, %v3021_v53 }
0x123e   :  { %4437 = vmatpush3.bf16.msra.mxu1 %v4434_v6 }
0x123f   :  { %4439 = vmatprep.subr.bf16.mxu1 %v4438_v37 }
0x1242   :  { %4441 = vmatpush3.bf16.msra.mxu1 %v4438_v37 }
0x1243   :  { %4443 = vmatprep.subr.bf16.mxu1 %v4442_v56 }
0x1246   :  { %4445 = vmatpush3.bf16.msra.mxu1 %v4442_v56 }
0x1247   :  { %4447 = vmatprep.subr.bf16.mxu1 %v4446_v39 }
0x124a   :  { %4449 = vmatpush3.bf16.msra.mxu1 %v4446_v39 }
0x124b   :  { %4450 = vmatprep.subr.bf16.mxu1 %v4799_v0 }
0x1310   :  { %v4210_v22 = vpop.f32.mrb[34].mxu1 }
0x1311   :  { %v3111_v8 = vadd.f32 %v4210_v22, %v3919_v43  ;;  %v3105_v41 = vpop.f32.mrb[35].mxu1 }
0x1312   :  { %v3106_v11 = vadd.f32 %v3919_v43, %v3105_v41  ;;  %v3430_v41 = vlaneseq }
0x1313   :  { %v3117_v46 = vmul.f32 %v3111_v8, %v3111_v8  ;;  %v3115_v38 = vmul.f32 0.5, %v3111_v8 }
0x1314   :  { %v3116_v24 = vmul.f32 %v3106_v11, %v3106_v11  ;;  %v3114_v33 = vmul.f32 0.5, %v3106_v11 }
0x1315   :  { %v3119_v28 = vmul.f32 %v3117_v46, %v3111_v8  ;;  %v3925_v46 = vld [vmem:[%s3848_s1] ss:$0 sm:$0xff] }
0x1316   :  { %v3118_v36 = vmul.f32 %v3116_v24, %v3106_v11 }
0x1317   :  { %v3121_v15 = vmul.f32 0.044715, %v3119_v28 }
0x1318   :  { %v3120_v45 = vmul.f32 0.044715, %v3118_v36 }
0x1319   :  { %v3123_v19 = vadd.f32 %v3121_v15, %v3111_v8  ;;  %v3927_v15 = vld [vmem:[%s3850_s4] ss:$0 sm:$0xff] }
0x131a   :  { %v3122_v55 = vadd.f32 %v3120_v45, %v3106_v11  ;;  %v3431_v11 = vshrl.u32 %v3430_v41, 7 }
0x131b   :  { %v3125_v47 = vmul.f32 0.7978846, %v3123_v19 }
0x131c   :  { %v3124_v34 = vmul.f32 0.7978846, %v3122_v55  ;;  %v3531_v28 = vsub.s32 1, %v3431_v11  ;;  %v3432_v36 = vsub.s32 0, %v3431_v11 }
0x131d   :  { %4761 = vtanh.f32 %v3125_v47 }
0x131e   :  { %4763 = vtanh.f32 %v3124_v34 }
0x1327   :  { %v4762_v40 = vpop.eup %4761 }
0x1328   :  { %v4764_v32 = vpop.eup %4763  ;;  %v3129_v54 = vadd.f32 1.0, %v4762_v40 }
0x1329   :  { %v3128_v49 = vadd.f32 1.0, %v4764_v32 }
0x132a   :  { %v3131_v13 = vmul.f32 %v3129_v54, %v3115_v38  ;;  %v4841_v54 = vmov 1  }
0x132b   :  { %v3130_v31 = vmul.f32 %v3128_v49, %v3114_v33  ;;  %4619 = vset.pattern.permute.xlu0 %v4841_v54 }
0x132c   :  { %3136 = vrot.lane.b32.xlu0 %v3131_v13, %s4814_s21 }
0x132d   :  { %3134 = vrot.lane.b32.xlu1 %v3130_v31, %s4814_s21 }
0x139e   :  { %v3137_v29 = vpop.permute.xlu0 %3136 }
0x139f   :  { %v3135_v59 = vpop.permute.xlu1 %3134  ;;  %v3141_v10 = vsel %vm201_vm1, %v4944_v25, %v3137_v29 }
0x13a0   :  { %v3140_v14 = vsel %vm201_vm1, %v4946_v26, %v3135_v59  ;;  %v3256_v26 = vld [vmem:[%s3847_s24] sm:$0xff] }
0x13a1   :  { %4227 = vmatprep.mubr.msk.f32.mxu1 %vm940_vm11, %v3140_v14  ;;  %v4451_v25 = vpack.c.bf16 %v3257_v51, %v3256_v26  ;;  %v3429_v59 = vld [vmem:[%s3824_s7] sm:$0xff] }
0x13a2   :  { %4228 = vmatmul.mubr.msk.f32.vlgmr.msra.gmra.mrb[36].mxu1 %vm940_vm11, %v3141_v10  ;;  %v4843_v10 = vmov 0  }
0x13a3   :  { %4238 = vmatprep.mubr.msk.f32.mxu1 %vm4801_vm0, %v4802_v1  ;;  %4452 = vmatpush3.bf16.msra.mxu1 %v4451_v25 }
0x13a4   :  { %4453 = vmatprep.subr.bf16.mxu1 %v4799_v0  ;;  %4620 = vset.pattern.permute.xlu1 %v4843_v10 }
0x13a7   :  { %4455 = vmatpush3.bf16.msra.mxu1 %v4454_v48 }
0x13a8   :  { %4464 = vmatprep.subr.bf16.mxu1 %v4799_v0 }
0x13aa   :  { %4239 = vmatmul.mubr.msk.f32.vlgmr.msra.gmra.mrb[38].mxu1 %vm201_vm1, %v5985_v21 }
0x13ab   :  { %4260 = vmatprep.mubr.msk.f32.mxu1 %vm4801_vm0, %v4802_v1 }
0x1475   :  { %v4229_v61 = vpop.f32.mrb[36].mxu1 }
0x1476   :  { %v3235_v62 = vadd.f32 %v4229_v61, %v3922_v27  ;;  %v3229_v9 = vpop.f32.mrb[37].mxu1 }
0x1477   :  { %v3230_v35 = vadd.f32 %v3922_v27, %v3229_v9 }
0x1478   :  { %v3241_v17 = vmul.f32 %v3235_v62, %v3235_v62  ;;  %v3239_v12 = vmul.f32 0.5, %v3235_v62 }
0x1479   :  { %v3240_v50 = vmul.f32 %v3230_v35, %v3230_v35  ;;  %v3238_v56 = vmul.f32 0.5, %v3230_v35 }
0x147a   :  { %v3243_v58 = vmul.f32 %v3241_v17, %v3235_v62 }
0x147b   :  { %v3242_v16 = vmul.f32 %v3240_v50, %v3230_v35 }
0x147c   :  { %v3245_v53 = vmul.f32 0.044715, %v3243_v58 }
0x147d   :  { %v3244_v23 = vmul.f32 0.044715, %v3242_v16  ;;  %v3333_v22 = vpop.f32.mrb[38].mxu1 }
0x147e   :  { %v3247_v42 = vadd.f32 %v3245_v53, %v3235_v62  ;;  %v4240_v8 = vpop.f32.mrb[39].mxu1  ;;  %v3334_v24 = vadd.f32 %v3925_v46, %v3333_v22 }
0x147f   :  { %v3246_v5 = vadd.f32 %v3244_v23, %v3230_v35 }
0x1480   :  { %v3249_v6 = vmul.f32 0.7978846, %v3247_v42  ;;  %v3433_v45 = vrot.slane %v3334_v24, %v3432_v36 }
0x1481   :  { %v3248_v7 = vmul.f32 0.7978846, %v3246_v5 }
0x1482   :  { %4765 = vtanh.f32 %v3249_v6 }
0x1483   :  { %4767 = vtanh.f32 %v3248_v7 }
0x148c   :  { %v4766_v37 = vpop.eup %4765 }
0x148d   :  { %v4768_v52 = vpop.eup %4767  ;;  %v3253_v60 = vadd.f32 1.0, %v4766_v37 }
0x148e   :  { %v3252_v20 = vadd.f32 1.0, %v4768_v52 }
0x148f   :  { %v5997_v43 = vmul.f32 %v3253_v60, %v3239_v12 }
0x1490   :  { %v5995_v39 = vmul.f32 %v3252_v20, %v3238_v56 }
0x1492   :  { %4249 = vmatprep.mubr.msk.f32.mxu0 %vm201_vm1, %v5995_v39 }
0x1493   :  { %4250 = vmatmul.mubr.msk.f32.vlgmr.msra.gmra.mrb[22].mxu0 %vm201_vm1, %v5997_v43 }
0x1494   :  { %4279 = vmatprep.mubr.msk.f32.mxu0 %vm4801_vm0, %v4802_v1  ;;  %v3532_v1 = vrot.slane %v3334_v24, %v3531_v28  ;;  %vm3539_vm0 = vcmask 15368  }
0x1566   :  { %v4251_v19 = vpop.f32.mrb[22].mxu0 }
0x1567   :  { %v6012_v55 = vadd.f32 %v4251_v19, %v3927_v15  ;;  %v3420_v47 = vpop.f32.mrb[23].mxu0 }
0x1568   :  { %v6014_v34 = vadd.f32 %v3927_v15, %v3420_v47 }
0x1569   :  { %v3533_v40 = vmul.f32 %v3532_v1, %v6012_v55 }
0x156a   :  { %v3434_v32 = vmul.f32 %v3433_v45, %v6014_v34 }
0x156b   :  { %3573 = vrot.lane.b32.xlu1 %v3533_v40, %s4822_s15  ;;  %v3534_v38 = vsel %vm729_vm10, %v3533_v40, 0.0 }
0x156c   :  { %3475 = vrot.lane.b32.xlu0 %v3434_v32, %s4822_s15  ;;  %v3435_v29 = vsel %vm729_vm10, %v3434_v32, 0.0 }
0x158f   :  { %3535 = vadd.xlane.f32.xlu1 %v3534_v38 }
0x15dd   :  { %v3574_v33 = vpop.permute.xlu1 %3573 }
0x15de   :  { %v3576_v49 = vsel %vm729_vm10, %v3574_v33, 0.0  ;;  %v3476_v13 = vpop.permute.xlu0 %3475 }
0x15df   :  { %v3478_v31 = vsel %vm729_vm10, %v3476_v13, 0.0  ;;  %3577 = vadd.xlane.f32.xlu0 %v3576_v49 }
0x15e0   :  { %3479 = vadd.xlane.f32.xlu1 %v3478_v31 }
0x15e3   :  { %3436 = vadd.xlane.f32.xlu0 %v3435_v29 }
0x161c   :  { %v3536_v14 = vpop.xlane.xlu1 %3535 }
0x161d   :  { %v3537_v26 = vmul.f32 0.25, %v3536_v14 }
0x161f   :  { %v3538_v51 = vadd.f32 %v3537_v26, %v3429_v59 }
0x1621   :  { %v3540_v25 = vsel %vm3539_vm0, %v3538_v51, -inf }
0x1622   :  { %v3541_v3 = vrot.slane %v3540_v25, 4 }
0x1624   :  { %v3542_v57 = vmax.f32 %v3540_v25, %v3541_v3 }
0x1626   :  { %v3543_v63 = vrot.slane %v3542_v57, 2 }
0x1628   :  { %v3544_v4 = vmax.f32 %v3542_v57, %v3543_v63 }
0x162a   :  { %v3545_v18 = vrot.slane %v3544_v4, 1 }
0x162c   :  { %v3546_v48 = vmax.f32 %v3544_v4, %v3545_v18 }
0x162e   :  { %v3547_v30 = vsub.f32 %v3538_v51, %v3546_v48 }
0x1630   :  { %v3548_v2 = vmul.f32 1.442695, %v3547_v30 }
0x1632   :  { %4769 = vpow2.f32 %v3548_v2 }
0x163c   :  { %v4770_v44 = vpop.eup %4769 }
0x163d   :  { %v3550_v27 = vsel %vm3539_vm0, %v4770_v44, 0.0 }
0x163e   :  { %v3551_v61 = vrot.slane %v3550_v27, 4 }
0x1640   :  { %v3552_v62 = vadd.f32 %v3551_v61, %v3550_v27 }
0x1642   :  { %v3553_v9 = vrot.slane %v3552_v62, 2 }
0x1644   :  { %v3554_v35 = vadd.f32 %v3553_v9, %v3552_v62 }
0x1646   :  { %v3555_v17 = vrot.slane %v3554_v35, 1 }
0x1648   :  { %v3556_v50 = vadd.f32 %v3555_v17, %v3554_v35 }
0x164a   :  { %4771 = vrcp.f32 %v3556_v50 }
0x1654   :  { %v4772_v58 = vpop.eup %4771 }
0x1655   :  { %v3558_v16 = vmul.f32 %v4772_v58, %v4770_v44 }
0x1657   :  { %3561 = vperm.xlu0 %4619, %v3558_v16  }
0x165b   :  { %3524 = vrot.lane.b32.xlu0 %v5995_v39, %s4814_s21 }
0x166c   :  { %v3578_v53 = vpop.xlane.xlu0 %3577 }
0x166d   :  { %v3579_v23 = vmul.f32 0.25, %v3578_v53  ;;  %v3480_v42 = vpop.xlane.xlu1 %3479 }
0x166e   :  { %v3481_v5 = vmul.f32 0.25, %v3480_v42 }
0x166f   :  { %v3580_v6 = vadd.f32 %v3579_v23, %v3429_v59 }
0x1670   :  { %v3482_v7 = vadd.f32 %v3481_v5, %v3429_v59  ;;  %v3437_v37 = vpop.xlane.xlu0 %3436 }
0x1671   :  { %v3581_v52 = vsel %vm3539_vm0, %v3580_v6, -inf  ;;  %v3438_v60 = vmul.f32 0.25, %v3437_v37 }
0x1672   :  { %v3582_v56 = vrot.slane %v3581_v52, 4  ;;  %v3483_v20 = vsel %vm3440_vm4, %v3482_v7, -inf }
0x1673   :  { %v3484_v12 = vrot.slane %v3483_v20, 4  ;;  %v3439_v22 = vadd.f32 %v3438_v60, %v3429_v59 }
0x1674   :  { %v3583_v8 = vmax.f32 %v3581_v52, %v3582_v56 }
0x1675   :  { %v3485_v41 = vmax.f32 %v3483_v20, %v3484_v12  ;;  %v3441_v39 = vsel %vm3440_vm4, %v3439_v22, -inf }
0x1676   :  { %v3584_v11 = vrot.slane %v3583_v8, 2  ;;  %v3442_v46 = vrot.slane %v3441_v39, 4 }
0x1677   :  { %v3486_v24 = vrot.slane %v3485_v41, 2 }
0x1678   :  { %v3585_v28 = vmax.f32 %v3583_v8, %v3584_v11  ;;  %v3443_v36 = vmax.f32 %v3441_v39, %v3442_v46  ;;  %v3713_v8 = vld [vmem:[%s6048_s13 + $0x8] sm:$0xff] }
0x1679   :  { %v3487_v15 = vmax.f32 %v3485_v41, %v3486_v24 }
0x167a   :  { %v3586_v1 = vrot.slane %v3585_v28, 1  ;;  %v3444_v45 = vrot.slane %v3443_v36, 2 }
0x167b   :  { %v3488_v19 = vrot.slane %v3487_v15, 1 }
0x167c   :  { %v3587_v47 = vmax.f32 %v3585_v28, %v3586_v1  ;;  %v3445_v40 = vmax.f32 %v3443_v36, %v3444_v45  ;;  %v3714_v36 = vld [vmem:[%s6048_s13 + $0x10] sm:$0xff] }
0x167d   :  { %v3489_v32 = vmax.f32 %v3487_v15, %v3488_v19  ;;  %v3715_v15 = vld [vmem:[%s6048_s13 + $0x18] sm:$0xff] }
0x167e   :  { %v3588_v38 = vsub.f32 %v3580_v6, %v3587_v47  ;;  %v3446_v33 = vrot.slane %v3445_v40, 1  ;;  %v4474_v45 = vpack.c.bf16 %v3715_v15, %v3714_v36 }
0x167f   :  { %v3490_v49 = vsub.f32 %v3482_v7, %v3489_v32 }
0x1680   :  { %v3589_v13 = vmul.f32 1.442695, %v3588_v38  ;;  %v3447_v31 = vmax.f32 %v3445_v40, %v3446_v33 }
0x1681   :  { %v3491_v29 = vmul.f32 1.442695, %v3490_v49 }
0x1682   :  { %4773 = vpow2.f32 %v3589_v13  ;;  %v3448_v59 = vsub.f32 %v3439_v22, %v3447_v31  ;;  %v3716_v13 = vld [vmem:[%s6048_s13 + $0x20] sm:$0xff]  ;;  %v3717_v31 = vld [vmem:[%s6048_s13 + $0x28] sm:$0xff] }
0x1683   :  { %4775 = vpow2.f32 %v3491_v29 }
0x1684   :  { %v3449_v14 = vmul.f32 1.442695, %v3448_v59 }
0x1686   :  { %4777 = vpow2.f32 %v3449_v14  ;;  %v4477_v14 = vpack.c.bf16 %v3717_v31, %v3716_v13 }
0x168c   :  { %v4774_v26 = vpop.eup %4773 }
0x168d   :  { %v4776_v51 = vpop.eup %4775  ;;  %v3591_v25 = vsel %vm3539_vm0, %v4774_v26, 0.0 }
0x168e   :  { %v3592_v3 = vrot.slane %v3591_v25, 4  ;;  %v3493_v57 = vsel %vm3440_vm4, %v4776_v51, 0.0 }
0x168f   :  { %v3494_v63 = vrot.slane %v3493_v57, 4 }
0x1690   :  { %v4778_v4 = vpop.eup %4777  ;;  %v3593_v18 = vadd.f32 %v3592_v3, %v3591_v25 }
0x1691   :  { %v3451_v48 = vsel %vm3440_vm4, %v4778_v4, 0.0  ;;  %v3495_v2 = vadd.f32 %v3494_v63, %v3493_v57 }
0x1692   :  { %v3594_v30 = vrot.slane %v3593_v18, 2  ;;  %v3452_v44 = vrot.slane %v3451_v48, 4 }
0x1693   :  { %v3496_v62 = vrot.slane %v3495_v2, 2 }
0x1694   :  { %v3453_v27 = vadd.f32 %v3452_v44, %v3451_v48  ;;  %v3595_v61 = vadd.f32 %v3594_v30, %v3593_v18  ;;  %v3718_v18 = vld [vmem:[%s6048_s13 + $0x30] sm:$0xff]  ;;  %v3719_v48 = vld [vmem:[%s6048_s13 + $0x38] sm:$0xff] }
0x1695   :  { %v3497_v50 = vadd.f32 %v3496_v62, %v3495_v2  ;;  %v4480_v2 = vpack.c.bf16 %v3719_v48, %v3718_v18 }
0x1696   :  { %v3454_v9 = vrot.slane %v3453_v27, 2  ;;  %v3596_v17 = vrot.slane %v3595_v61, 1 }
0x1697   :  { %v3498_v23 = vrot.slane %v3497_v50, 1 }
0x1698   :  { %v3455_v35 = vadd.f32 %v3454_v9, %v3453_v27  ;;  %v3597_v53 = vadd.f32 %v3596_v17, %v3595_v61 }
0x1699   :  { %v3499_v42 = vadd.f32 %v3498_v23, %v3497_v50 }
0x169a   :  { %v3456_v58 = vrot.slane %v3455_v35, 1 }
0x169c   :  { %v3457_v16 = vadd.f32 %v3456_v58, %v3455_v35 }
0x169e   :  { %4779 = vrcp.f32 %v3457_v16  ;;  %v89_v16 = vstv %s3852_s27 }
0x169f   :  { %4781 = vrcp.f32 %v3597_v53  ;;  %90 = vst [vmem:[#allocation2] sm:$0x1] %v89_v16 }
0x16a0   :  { %4783 = vrcp.f32 %v3499_v42 }
0x16a8   :  { %v4780_v5 = vpop.eup %4779 }
0x16a9   :  { %v3459_v6 = vmul.f32 %v4780_v5, %v4778_v4  ;;  %v4782_v7 = vpop.eup %4781 }
0x16aa   :  { %v3599_v37 = vmul.f32 %v4782_v7, %v4774_v26  ;;  %v4784_v52 = vpop.eup %4783 }
0x16ab   :  { %3462 = vperm.xlu1 %4620, %v3459_v6   ;;  %v3501_v60 = vmul.f32 %v4784_v52, %v4776_v51 }
0x16af   :  { %4621 = vset.pattern.permute.xlu1 %v4841_v54 }
0x16b0   :  { %3602 = vperm.xlu1 %4621, %v3599_v37  }
0x16b4   :  { %4622 = vset.pattern.permute.xlu1 %v4843_v10 }
0x16b5   :  { %3504 = vperm.xlu1 %4622, %v3501_v60  }
0x16b9   :  { %3621 = vrot.lane.b32.xlu1 %v5997_v43, %s4814_s21  ;;  %v3712_v43 = vld [vmem:[%s6048_s13] sm:$0xff]  ;;  %s4845_s21 = smov 35  }
0x16ba   :  { %v4471_v39 = vpack.c.bf16 %v3713_v8, %v3712_v43  ;;  %s3851_s19 = sld [smem:[%s6097_s0 + %s4845_s21]]  }
0x16bc   :  { %4472 = vmatpush3.bf16.msra.mxu0 %v4471_v39 }
0x16bd   :  { %4473 = vmatprep.subr.bf16.mxu0 %v4799_v0 }
0x16c0   :  { %4475 = vmatpush3.bf16.msra.mxu0 %v4474_v45  ;;  %v3631_v38 = vld [vmem:[%s3851_s19] sm:$0xff]  ;;  %v3632_v33 = vld [vmem:[%s3851_s19 + $0x8] sm:$0xff]  ;;  %v3634_v3 = vld [vmem:[%s3851_s19 + $0x18] sm:$0xff] }
0x16c1   :  { %4476 = vmatprep.subr.bf16.mxu0 %v4799_v0  ;;  %v4465_v49 = vpack.c.bf16 %v3632_v33, %v3631_v38 }
0x16c3   :  { %4466 = vmatpush3.bf16.msra.mxu1 %v4465_v49 }
0x16c4   :  { %4478 = vmatpush3.bf16.msra.mxu0 %v4477_v14  ;;  %4467 = vmatprep.subr.bf16.mxu1 %v4799_v0 }
0x16c5   :  { %4479 = vmatprep.subr.bf16.mxu0 %v4799_v0 }
0x16c8   :  { %4481 = vmatpush3.bf16.msra.mxu0 %v4480_v2 }
0x16d6   :  { %v3562_v56 = vpop.permute.xlu0 %3561 }
0x16d7   :  { %v3564_v20 = vmul.f32 %v3562_v56, %v6012_v55 }
0x16d9   :  { %v3565_v12 = vsel %vm3466_vm5, %v3564_v20, 0.0 }
0x16da   :  { %v3566_v54 = vrot.slane %v3565_v12, 4  ;;  %v3525_v60 = vpop.permute.xlu0 %3524 }
0x16dc   :  { %v3567_v10 = vadd.f32 %v3566_v54, %v3565_v12 }
0x16de   :  { %v3568_v22 = vrot.slane %v3567_v10, 2 }
0x16e0   :  { %v3569_v41 = vadd.f32 %v3568_v22, %v3567_v10  ;;  %v3930_v10 = vld [vmem:[#allocation2] ss:$0 sm:$0xff] }
0x16e2   :  { %v3570_v11 = vrot.slane %v3569_v41, 1 }
0x16e4   :  { %v3571_v46 = vadd.f32 %v3570_v11, %v3569_v41 }
0x16e6   :  { %3614 = vrot.lane.b32.xlu1 %v3571_v46, %s4824_s17 }
0x172a   :  { %v3463_v24 = vpop.permute.xlu1 %3462 }
0x172b   :  { %v3465_v28 = vmul.f32 %v3463_v24, %v6014_v34 }
0x172d   :  { %v3467_v1 = vsel %vm3466_vm5, %v3465_v28, 0.0 }
0x172e   :  { %v3468_v19 = vrot.slane %v3467_v1, 4 }
0x172f   :  { %v3603_v47 = vpop.permute.xlu1 %3602 }
0x1730   :  { %v3469_v40 = vadd.f32 %v3468_v19, %v3467_v1  ;;  %v3605_v32 = vmul.f32 %v3603_v47, %v6012_v55  ;;  %v3633_v55 = vld [vmem:[%s3851_s19 + $0x10] sm:$0xff] }
0x1731   :  { %v4468_v4 = vpack.c.bf16 %v3634_v3, %v3633_v55 }
0x1732   :  { %v3470_v29 = vrot.slane %v3469_v40, 2  ;;  %v3606_v59 = vsel %vm3508_vm6, %v3605_v32, 0.0 }
0x1733   :  { %v3607_v26 = vrot.slane %v3606_v59, 4  ;;  %4469 = vmatpush3.bf16.msra.mxu1 %v4468_v4 }
0x1734   :  { %v3471_v51 = vadd.f32 %v3470_v29, %v3469_v40  ;;  %v3505_v25 = vpop.permute.xlu1 %3504 }
0x1735   :  { %v3608_v57 = vadd.f32 %v3607_v26, %v3606_v59  ;;  %v3507_v63 = vmul.f32 %v3505_v25, %v6014_v34 }
0x1736   :  { %v3472_v30 = vrot.slane %v3471_v51, 1  ;;  %4261 = vmatmul.mubr.msk.f32.vlgmr.msra.gmra.mrb[40].mxu1 %vm201_vm1, %v5985_v21  ;;  %v91_v21 = vstv %s3854_s16 }
0x1737   :  { %v3609_v44 = vrot.slane %v3608_v57, 2  ;;  %v3509_v27 = vsel %vm3508_vm6, %v3507_v63, 0.0  ;;  %92 = vst [vmem:[#allocation3] sm:$0x1] %v91_v21 }
0x1738   :  { %v3510_v61 = vrot.slane %v3509_v27, 4  ;;  %v3473_v62 = vadd.f32 %v3472_v30, %v3471_v51  ;;  %v3622_v23 = vpop.permute.xlu1 %3621 }
0x1739   :  { %v3610_v9 = vadd.f32 %v3609_v44, %v3608_v57 }
0x173a   :  { %v3511_v35 = vadd.f32 %v3510_v61, %v3509_v27  ;;  %3517 = vrot.lane.b32.xlu1 %v3473_v62, %s4824_s17 }
0x173b   :  { %v3611_v0 = vrot.slane %v3610_v9, 1 }
0x173c   :  { %v3512_v34 = vrot.slane %v3511_v35, 2 }
0x173d   :  { %v3612_v17 = vadd.f32 %v3611_v0, %v3610_v9 }
0x173e   :  { %v3513_v50 = vadd.f32 %v3512_v34, %v3511_v35  ;;  %v3932_v41 = vld [vmem:[#allocation3] ss:$0 sm:$0xff] }
0x173f   :  { %3618 = vrot.lane.b32.xlu1 %v3612_v17, %s4824_s17 }
0x1740   :  { %v3514_v58 = vrot.slane %v3513_v50, 1 }
0x1742   :  { %v3515_v53 = vadd.f32 %v3514_v58, %v3513_v50 }
0x1744   :  { %3521 = vrot.lane.b32.xlu1 %v3515_v53, %s4824_s17  ;;  %s4848_s17 = smov 40  }
0x1745   :  { %s3856_s9 = sld [smem:[%s6097_s0 + %s4848_s17]]  }
0x1758   :  { %v3615_v42 = vpop.permute.xlu1 %3614 }
0x17ac   :  { %v3518_v5 = vpop.permute.xlu1 %3517 }
0x17b1   :  { %v3619_v6 = vpop.permute.xlu1 %3618 }
0x17b2   :  { %v3624_v7 = vsel %vm729_vm10, %v3615_v42, %v3619_v6 }
0x17b3   :  { %v3625_v37 = vsel %vm201_vm1, %v3624_v7, %v3622_v23 }
0x17b4   :  { %v3627_v56 = vrot.slane %v3625_v37, 7 }
0x17b6   :  { %v3522_v52 = vpop.permute.xlu1 %3521 }
0x17b7   :  { %v3527_v20 = vsel %vm729_vm10, %v3518_v5, %v3522_v52 }
0x17b8   :  { %v3528_v12 = vsel %vm201_vm1, %v3527_v20, %v3525_v60 }
0x17b9   :  { %v3630_v54 = vsel %vm3629_vm7, %v3528_v12, %v3627_v56 }
0x17ba   :  { %4280 = vmatmul.mubr.msk.f32.vlgmr.msra.gmra.mrb[24].mxu0 %vm940_vm11, %v3630_v54 }
0x1809   :  { %v3708_v22 = vpop.f32.mrb[40].mxu1 }
0x180a   :  { %v3709_v43 = vadd.f32 %v3930_v10, %v3708_v22  ;;  %v4262_v8 = vpop.f32.mrb[41].mxu1 }
0x180c   :  { %3801 = vst.msk [vmem:[%s3856_s9] sm:$0x3] %vm3800_vm8, %v3709_v43 }
0x188d   :  { %v3796_v39 = vpop.f32.mrb[24].mxu0 }
0x188e   :  { %v3797_v11 = vadd.f32 %v3932_v41, %v3796_v39  ;;  %v4281_v46 = vpop.f32.mrb[25].mxu0 }
0x1890   :  { %3802 = vst.msk [vmem:[%s3857_s2] sm:$0x3] %vm3800_vm8, %v3797_v11  ;;  %v3803_v24 = vadd.f32 %v3797_v11, %v3709_v43 }
0x1892   :  { %3804 = vst.msk [vmem:[%s3855_s6] sm:$0x3] %vm3800_vm8, %v3803_v24 }

</bundles_post_ra>
